<compile_context>
chip_gen: v7x
topology: tpu7x:2x2x1
jax: 0.10.0
libtpu: 0.0.40
codegen_flags: <defaults>
</compile_context>

<pallas_src>
import functools
import math

import jax
import jax.numpy as jnp
from jax.experimental import pallas as pl
from jax.experimental.pallas import tpu as pltpu


# ----------------------------------------------------------------------------
# Model config (small, shape-consistent with the FashionSAP forward)
# ----------------------------------------------------------------------------
B = 2                 # batch
C = 3                 # image channels
IMG = 16              # image_res
PATCH = 4             # patch size
NPATCH = (IMG // PATCH) ** 2
VIT_SEQ = NPATCH + 1  # + cls token
HID = 32              # shared hidden (ViT embed_dim == BERT hidden_size)
HEADS = 2
DH = HID // HEADS
MLP = 4 * HID
VIT_DEPTH = 2
VOCAB = 100
TEXT_SEQ = 8
TEXT_LAYERS = 2       # BERT 'text' mode layers
FUSION_LAYERS = 2     # BERT 'fusion' mode layers (with cross-attention)
CLASS_NUM = 5
VIT_EPS = 1e-6
BERT_EPS = 1e-12


# ----------------------------------------------------------------------------
# In-kernel helpers (value-level; run inside Pallas kernel bodies)
# ----------------------------------------------------------------------------

def _ln(x, g, b, eps):
    """LayerNorm over the last dim. f32 math."""
    mean = jnp.mean(x, axis=-1, keepdims=True)
    var = jnp.mean(jnp.square(x - mean), axis=-1, keepdims=True)
    return (x - mean) * jax.lax.rsqrt(var + eps) * g + b


def _mm(a, w, b=None):
    """Matmul with bf16 MXU inputs, f32 accumulation, optional bias add."""
    y = jax.lax.dot_general(
        a.astype(jnp.bfloat16), w.astype(jnp.bfloat16),
        dimension_numbers=(((a.ndim - 1,), (0,)), ((), ())),
        preferred_element_type=jnp.float32)
    if b is not None:
        y = y + b
    return y


def _mha(q, k, v, add_mask, num_heads, scale):
    """Multi-head attention for a single batch element.

    q: [Sq, H], k/v: [Sk, H]; add_mask: [1, Sk] additive or None.
    All heads handled in one kernel invocation via static lane slices.
    """
    dh = q.shape[-1] // num_heads
    outs = []
    for h in range(num_heads):
        sl = slice(h * dh, (h + 1) * dh)
        qh = q[:, sl].astype(jnp.bfloat16)
        kh = k[:, sl].astype(jnp.bfloat16)
        vh = v[:, sl].astype(jnp.bfloat16)
        # contract last dims -> no explicit K transpose
        s = jax.lax.dot_general(qh, kh, (((1,), (1,)), ((), ())),
                                preferred_element_type=jnp.float32) * scale
        if add_mask is not None:
            s = s + add_mask
        s = s - jnp.max(s, axis=-1, keepdims=True)
        p = jnp.exp(s)
        p = p * pl.reciprocal(jnp.sum(p, axis=-1, keepdims=True), approx=True)
        outs.append(jax.lax.dot_general(p.astype(jnp.bfloat16), vh,
                                        (((1,), (0,)), ((), ())),
                                        preferred_element_type=jnp.float32))
    return jnp.concatenate(outs, axis=-1)


# ----------------------------------------------------------------------------
# Pallas kernels (one fused kernel per structural block)
# ----------------------------------------------------------------------------

def _patch_embed_kernel(x_ref, w_ref, b_ref, cls_ref, pos_ref, o_ref):
    # x: [NPATCH, C*P*P] unfolded patches for one image
    emb = _mm(x_ref[0], w_ref[...], b_ref[...])            # [NPATCH, HID]
    cls = cls_ref[0]                                       # [1, HID]
    full = jnp.concatenate([cls, emb], axis=0)             # [VIT_SEQ, HID]
    o_ref[0] = full + pos_ref[0]


def _vit_block_kernel(x_ref, ln1_g, ln1_b, qkv_w, qkv_b, proj_w, proj_b,
                      ln2_g, ln2_b, fc1_w, fc1_b, fc2_w, fc2_b, o_ref,
                      *, num_heads, eps):
    x = x_ref[0]                                           # [S, H]
    hdim = x.shape[-1]
    scale = 1.0 / math.sqrt(hdim // num_heads)

    h = _ln(x, ln1_g[...], ln1_b[...], eps)
    qkv = _mm(h, qkv_w[...], qkv_b[...])                   # [S, 3H]
    q, k, v = qkv[:, :hdim], qkv[:, hdim:2 * hdim], qkv[:, 2 * hdim:]
    attn = _mha(q, k, v, None, num_heads, scale)           # ViT: no mask
    x = x + _mm(attn, proj_w[...], proj_b[...])

    h2 = _ln(x, ln2_g[...], ln2_b[...], eps)
    # tanh-approx GELU (EUP friendly); close to exact erf GELU of the reference
    h2 = jax.nn.gelu(_mm(h2, fc1_w[...], fc1_b[...]), approximate=True)
    x = x + _mm(h2, fc2_w[...], fc2_b[...])
    o_ref[0] = x


def _ln_only_kernel(x_ref, g_ref, b_ref, o_ref, *, eps):
    o_ref[0] = _ln(x_ref[0], g_ref[...], b_ref[...], eps)


def _embed_ln_kernel(we_ref, pos_ref, type_ref, g_ref, b_ref, o_ref, *, eps):
    x = we_ref[0] + pos_ref[...] + type_ref[...]
    o_ref[0] = _ln(x, g_ref[...], b_ref[...], eps)


def _bert_text_layer_kernel(x_ref, mask_ref, qkv_w, qkv_b, ao_w, ao_b,
                            aln_g, aln_b, i_w, i_b, o_w, o_b, oln_g, oln_b,
                            o_ref, *, num_heads, eps):
    x = x_ref[0]                                           # [S, H]
    mask = mask_ref[0]                                     # [1, S] additive
    hdim = x.shape[-1]
    scale = 1.0 / math.sqrt(hdim // num_heads)

    qkv = _mm(x, qkv_w[...], qkv_b[...])
    q, k, v = qkv[:, :hdim], qkv[:, hdim:2 * hdim], qkv[:, 2 * hdim:]
    attn = _mha(q, k, v, mask, num_heads, scale)
    x = _ln(x + _mm(attn, ao_w[...], ao_b[...]), aln_g[...], aln_b[...], eps)

    h = jax.nn.gelu(_mm(x, i_w[...], i_b[...]), approximate=True)
    x = _ln(x + _mm(h, o_w[...], o_b[...]), oln_g[...], oln_b[...], eps)
    o_ref[0] = x


def _bert_fusion_layer_kernel(x_ref, img_ref, mask_ref,
                              qkv_w, qkv_b, ao_w, ao_b, aln_g, aln_b,
                              cq_w, cq_b, ckv_w, ckv_b, cao_w, cao_b,
                              caln_g, caln_b,
                              i_w, i_b, o_w, o_b, oln_g, oln_b,
                              o_ref, *, num_heads, eps):
    x = x_ref[0]                                           # [S_txt, H]
    img = img_ref[0]                                       # [S_img, H]
    mask = mask_ref[0]                                     # [1, S_txt]
    hdim = x.shape[-1]
    scale = 1.0 / math.sqrt(hdim // num_heads)

    # self-attention
    qkv = _mm(x, qkv_w[...], qkv_b[...])
    q, k, v = qkv[:, :hdim], qkv[:, hdim:2 * hdim], qkv[:, 2 * hdim:]
    attn = _mha(q, k, v, mask, num_heads, scale)
    x = _ln(x + _mm(attn, ao_w[...], ao_b[...]), aln_g[...], aln_b[...], eps)

    # cross-attention; image_atts is all ones -> run unmasked
    cq = _mm(x, cq_w[...], cq_b[...])
    ckv = _mm(img, ckv_w[...], ckv_b[...])
    ck, cv = ckv[:, :hdim], ckv[:, hdim:]
    cattn = _mha(cq, ck, cv, None, num_heads, scale)
    x = _ln(x + _mm(cattn, cao_w[...], cao_b[...]), caln_g[...], caln_b[...],
            eps)

    # FFN
    h = jax.nn.gelu(_mm(x, i_w[...], i_b[...]), approximate=True)
    x = _ln(x + _mm(h, o_w[...], o_b[...]), oln_g[...], oln_b[...], eps)
    o_ref[0] = x


def _cate_head_kernel(x_ref, w1, b1, g, bb, w2, b2, o_ref, *, eps):
    h = _mm(x_ref[...], w1[...], b1[...])
    h = _ln(h, g[...], bb[...], eps)
    o_ref[...] = _mm(h, w2[...], b2[...])


# ----------------------------------------------------------------------------
# BlockSpec helpers & kernel wrappers
# ----------------------------------------------------------------------------

def _act_spec(shape):
    """Activation tensor: one batch row per grid step."""
    nrest = len(shape) - 1
    return pl.BlockSpec((1,) + tuple(shape[1:]),
                        lambda b, n=nrest: (b,) + (0,) * n)


def _w_spec(shape):
    """Weight / bias / table: full-array block, identical at every grid step."""
    nd = len(shape)
    return pl.BlockSpec(tuple(shape), lambda b, n=nd: (0,) * n)


def _parallel_params():
    return pltpu.CompilerParams(dimension_semantics=("parallel",))


def patch_embed(p, patches):
    Bn = patches.shape[0]
    args = [patches, p["patch_w"], p["patch_b"].reshape(1, HID),
            p["cls_tok"], p["pos_emb"]]
    return pl.pallas_call(
        _patch_embed_kernel,
        grid=(Bn,),
        in_specs=[_act_spec(patches.shape)] + [_w_spec(a.shape) for a in args[1:]],
        out_specs=_act_spec((Bn, VIT_SEQ, HID)),
        out_shape=jax.ShapeDtypeStruct((Bn, VIT_SEQ, HID), jnp.float32),
        compiler_params=_parallel_params(),
    )(*args)


def vit_block(x, bp):
    Bn, S, H = x.shape
    args = [x,
            bp["ln1_g"].reshape(1, H), bp["ln1_b"].reshape(1, H),
            bp["qkv_w"], bp["qkv_b"].reshape(1, -1),
            bp["proj_w"], bp["proj_b"].reshape(1, H),
            bp["ln2_g"].reshape(1, H), bp["ln2_b"].reshape(1, H),
            bp["fc1_w"], bp["fc1_b"].reshape(1, -1),
            bp["fc2_w"], bp["fc2_b"].reshape(1, H)]
    return pl.pallas_call(
        functools.partial(_vit_block_kernel, num_heads=HEADS, eps=VIT_EPS),
        grid=(Bn,),
        in_specs=[_act_spec(x.shape)] + [_w_spec(a.shape) for a in args[1:]],
        out_specs=_act_spec(x.shape),
        out_shape=jax.ShapeDtypeStruct(x.shape, jnp.float32),
        compiler_params=_parallel_params(),
    )(*args)


def layernorm3d(x, g, b, eps):
    Bn, S, H = x.shape
    args = [x, g.reshape(1, H), b.reshape(1, H)]
    return pl.pallas_call(
        functools.partial(_ln_only_kernel, eps=eps),
        grid=(Bn,),
        in_specs=[_act_spec(x.shape)] + [_w_spec(a.shape) for a in args[1:]],
        out_specs=_act_spec(x.shape),
        out_shape=jax.ShapeDtypeStruct(x.shape, jnp.float32),
        compiler_params=_parallel_params(),
    )(*args)


def bert_embed(p, input_ids):
    Bn, S = input_ids.shape
    # TODO(synk): embedding-table gather stays in XLA (jnp.take); a Pallas
    # scalar-prefetch gather is overkill at this scale.
    we = jnp.take(p["word_emb"], input_ids, axis=0)          # [B, S, HID]
    args = [we, p["pos_tab"][:S], p["type_emb"][0:1],
            p["emb_ln_g"].reshape(1, HID), p["emb_ln_b"].reshape(1, HID)]
    return pl.pallas_call(
        functools.partial(_embed_ln_kernel, eps=BERT_EPS),
        grid=(Bn,),
        in_specs=[_act_spec(we.shape)] + [_w_spec(a.shape) for a in args[1:]],
        out_specs=_act_spec(we.shape),
        out_shape=jax.ShapeDtypeStruct((Bn, S, HID), jnp.float32),
        compiler_params=_parallel_params(),
    )(*args)


def bert_text_layer(x, add_mask, lp):
    Bn, S, H = x.shape
    args = [x, add_mask,
            lp["qkv_w"], lp["qkv_b"].reshape(1, -1),
            lp["ao_w"], lp["ao_b"].reshape(1, H),
            lp["aln_g"].reshape(1, H), lp["aln_b"].reshape(1, H),
            lp["i_w"], lp["i_b"].reshape(1, -1),
            lp["o_w"], lp["o_b"].reshape(1, H),
            lp["oln_g"].reshape(1, H), lp["oln_b"].reshape(1, H)]
    in_specs = [_act_spec(x.shape), _act_spec(add_mask.shape)]
    in_specs += [_w_spec(a.shape) for a in args[2:]]
    return pl.pallas_call(
        functools.partial(_bert_text_layer_kernel, num_heads=HEADS,
                          eps=BERT_EPS),
        grid=(Bn,),
        in_specs=in_specs,
        out_specs=_act_spec(x.shape),
        out_shape=jax.ShapeDtypeStruct(x.shape, jnp.float32),
        compiler_params=_parallel_params(),
    )(*args)


def bert_fusion_layer(x, image_embeds, add_mask, lp):
    Bn, S, H = x.shape
    args = [x, image_embeds, add_mask,
            lp["qkv_w"], lp["qkv_b"].reshape(1, -1),
            lp["ao_w"], lp["ao_b"].reshape(1, H),
            lp["aln_g"].reshape(1, H), lp["aln_b"].reshape(1, H),
            lp["cq_w"], lp["cq_b"].reshape(1, H),
            lp["ckv_w"], lp["ckv_b"].reshape(1, -1),
            lp["cao_w"], lp["cao_b"].reshape(1, H),
            lp["caln_g"].reshape(1, H), lp["caln_b"].reshape(1, H),
            lp["i_w"], lp["i_b"].reshape(1, -1),
            lp["o_w"], lp["o_b"].reshape(1, H),
            lp["oln_g"].reshape(1, H), lp["oln_b"].reshape(1, H)]
    in_specs = [_act_spec(x.shape), _act_spec(image_embeds.shape),
                _act_spec(add_mask.shape)]
    in_specs += [_w_spec(a.shape) for a in args[3:]]
    return pl.pallas_call(
        functools.partial(_bert_fusion_layer_kernel, num_heads=HEADS,
                          eps=BERT_EPS),
        grid=(Bn,),
        in_specs=in_specs,
        out_specs=_act_spec(x.shape),
        out_shape=jax.ShapeDtypeStruct(x.shape, jnp.float32),
        compiler_params=_parallel_params(),
    )(*args)


def cate_head(p, x):
    Bn = x.shape[0]
    args = [x, p["cm1_w"], p["cm1_b"].reshape(1, HID),
            p["cm_ln_g"].reshape(1, HID), p["cm_ln_b"].reshape(1, HID),
            p["cm2_w"], p["cm2_b"].reshape(1, CLASS_NUM)]
    return pl.pallas_call(
        functools.partial(_cate_head_kernel, eps=BERT_EPS),
        out_shape=jax.ShapeDtypeStruct((Bn, CLASS_NUM), jnp.float32),
    )(*args)


# ----------------------------------------------------------------------------
# Deterministic parameter init
# ----------------------------------------------------------------------------

class ParamGen:
    def __init__(self, seed):
        self.key = jax.random.PRNGKey(seed)

    def normal(self, shape, std=0.02):
        self.key, sub = jax.random.split(self.key)
        return (std * jax.random.normal(sub, shape)).astype(jnp.float32)

    @staticmethod
    def zeros(shape):
        return jnp.zeros(shape, jnp.float32)

    @staticmethod
    def ones(shape):
        return jnp.ones(shape, jnp.float32)


def make_params(seed=0):
    g = ParamGen(seed)
    p = {}

    # --- Vision Transformer ---
    p["patch_w"] = g.normal((C * PATCH * PATCH, HID))
    p["patch_b"] = g.zeros((HID,))
    p["cls_tok"] = g.normal((1, 1, HID))
    p["pos_emb"] = g.normal((1, VIT_SEQ, HID))
    p["vit_blocks"] = []
    for _ in range(VIT_DEPTH):
        p["vit_blocks"].append(dict(
            ln1_g=g.ones((HID,)), ln1_b=g.zeros((HID,)),
            qkv_w=g.normal((HID, 3 * HID)), qkv_b=g.zeros((3 * HID,)),
            proj_w=g.normal((HID, HID)), proj_b=g.zeros((HID,)),
            ln2_g=g.ones((HID,)), ln2_b=g.zeros((HID,)),
            fc1_w=g.normal((HID, MLP)), fc1_b=g.zeros((MLP,)),
            fc2_w=g.normal((MLP, HID)), fc2_b=g.zeros((HID,)),
        ))
    p["vit_norm_g"] = g.ones((HID,))
    p["vit_norm_b"] = g.zeros((HID,))

    # --- BERT embeddings ---
    p["word_emb"] = g.normal((VOCAB, HID))
    p["pos_tab"] = g.normal((TEXT_SEQ, HID))
    p["type_emb"] = g.normal((2, HID))
    p["emb_ln_g"] = g.ones((HID,))
    p["emb_ln_b"] = g.zeros((HID,))

    def bert_layer(cross):
        d = dict(
            # Q/K/V fused into one [HID, 3*HID] matmul
            qkv_w=g.normal((HID, 3 * HID)), qkv_b=g.zeros((3 * HID,)),
            ao_w=g.normal((HID, HID)), ao_b=g.zeros((HID,)),
            aln_g=g.ones((HID,)), aln_b=g.zeros((HID,)),
            i_w=g.normal((HID, MLP)), i_b=g.zeros((MLP,)),
            o_w=g.normal((MLP, HID)), o_b=g.zeros((HID,)),
            oln_g=g.ones((HID,)), oln_b=g.zeros((HID,)),
        )
        if cross:
            d.update(
                cq_w=g.normal((HID, HID)), cq_b=g.zeros((HID,)),
                # cross K/V fused into one [HID, 2*HID] matmul on the image side
                ckv_w=g.normal((HID, 2 * HID)), ckv_b=g.zeros((2 * HID,)),
                cao_w=g.normal((HID, HID)), cao_b=g.zeros((HID,)),
                caln_g=g.ones((HID,)), caln_b=g.zeros((HID,)),
            )
        return d

    p["text_layers"] = [bert_layer(cross=False) for _ in range(TEXT_LAYERS)]
    p["fusion_layers"] = [bert_layer(cross=True) for _ in range(FUSION_LAYERS)]

    # --- catemap head ---
    p["cm1_w"] = g.normal((HID, HID))
    p["cm1_b"] = g.zeros((HID,))
    p["cm_ln_g"] = g.ones((HID,))
    p["cm_ln_b"] = g.zeros((HID,))
    p["cm2_w"] = g.normal((HID, CLASS_NUM))
    p["cm2_b"] = g.zeros((CLASS_NUM,))
    return p


# ----------------------------------------------------------------------------
# FashionSAP forward
# ----------------------------------------------------------------------------

def fashion_sap_forward(p, image, text_input_ids, text_attention_mask, outpos):
    # --- visual encoder ---
    # unfold NCHW image into patches: [B, C, H, W] -> [B, NPATCH, C*P*P]
    # (mathematically identical to Conv2d with kernel=stride=PATCH)
    x = image.reshape(B, C, IMG // PATCH, PATCH, IMG // PATCH, PATCH)
    patches = x.transpose(0, 2, 4, 1, 3, 5).reshape(B, NPATCH, C * PATCH * PATCH)
    v = patch_embed(p, patches)                               # [B, VIT_SEQ, HID]
    for bp in p["vit_blocks"]:
        v = vit_block(v, bp)
    image_embeds = layernorm3d(v, p["vit_norm_g"], p["vit_norm_b"], VIT_EPS)
    # image_atts is all ones -> cross-attention runs unmasked inside the kernel

    # --- text encoder, mode='text' ---
    txt = bert_embed(p, text_input_ids)                       # [B, TEXT_SEQ, HID]
    self_mask = ((1.0 - text_attention_mask.astype(jnp.float32)) * -1e4
                 ).reshape(B, 1, TEXT_SEQ)                    # broadcast in-kernel
    for lp in p["text_layers"]:
        txt = bert_text_layer(txt, self_mask, lp)

    # --- text encoder, mode='fusion' (cross-attention to image_embeds) ---
    out_state = txt
    for lp in p["fusion_layers"]:
        out_state = bert_fusion_layer(out_state, image_embeds, self_mask, lp)

    # gather the category token state (tiny; XLA glue)
    cate_state = out_state[jnp.arange(B), outpos[:, 0], :]    # [B, HID]

    # catemap head: Linear -> LayerNorm -> Linear, one fused kernel
    return cate_head(p, cate_state)                           # [B, CLASS_NUM]


# ----------------------------------------------------------------------------
# Main
# ----------------------------------------------------------------------------

if __name__ == "__main__":
    params = make_params(seed=0)

    key = jax.random.PRNGKey(0)
    k_img, k_ids = jax.random.split(key)
    image = jax.random.normal(k_img, (B, C, IMG, IMG), jnp.float32)      # NCHW
    text_input_ids = jax.random.randint(k_ids, (B, TEXT_SEQ), 0, VOCAB)
    text_attention_mask = jnp.ones((B, TEXT_SEQ), jnp.int32)
    outpos = jnp.array([[1], [3]], dtype=jnp.int32)                      # [B, 1]

    fwd = jax.jit(fashion_sap_forward)
    logits = fwd(params, image, text_input_ids, text_attention_mask, outpos)
    jax.block_until_ready(logits)

    assert logits.shape == (B, CLASS_NUM), logits.shape
    assert jnp.all(jnp.isfinite(logits))
    print("KERNEL_OK")
</pallas_src>

<mosaic_0001>
module attributes {stable_mosaic.version = 11 : i64} {
  func.func @_embed_ln_kernel(%arg0: i32, %arg1: memref<1x8x32xf32, #tpu.memory_space<vmem>>, %arg2: memref<8x32xf32, #tpu.memory_space<vmem>>, %arg3: memref<1x32xf32, #tpu.memory_space<vmem>>, %arg4: memref<1x32xf32, #tpu.memory_space<vmem>>, %arg5: memref<1x32xf32, #tpu.memory_space<vmem>>, %arg6: memref<1x8x32xf32, #tpu.memory_space<vmem>>) attributes {dimension_semantics = [#tpu.dimension_semantics<parallel>], iteration_bounds = array<i64: 2>, scalar_prefetch = 0 : i64, scratch_operands = 0 : i64, tpu.core_type = #tpu.core_type<tc>, window_params = [{transform_indices = @transform_0, window_bounds = array<i64: 1, 8, 32>}, {pipeline_mode = #tpu.pipeline_mode<synchronous>, transform_indices = @transform_1, window_bounds = array<i64: 8, 32>}, {pipeline_mode = #tpu.pipeline_mode<synchronous>, transform_indices = @transform_2, window_bounds = array<i64: 1, 32>}, {pipeline_mode = #tpu.pipeline_mode<synchronous>, transform_indices = @transform_3, window_bounds = array<i64: 1, 32>}, {pipeline_mode = #tpu.pipeline_mode<synchronous>, transform_indices = @transform_4, window_bounds = array<i64: 1, 32>}, {transform_indices = @transform_5, window_bounds = array<i64: 1, 8, 32>}]} {
    %c0 = arith.constant 0 : index
    %c0_0 = arith.constant 0 : index
    %c0_1 = arith.constant 0 : index
    %0 = vector.load %arg1[%c0, %c0_0, %c0_1] : memref<1x8x32xf32, #tpu.memory_space<vmem>>, vector<1x8x32xf32>
    %1 = vector.shape_cast %0 : vector<1x8x32xf32> to vector<8x32xf32>
    %c0_2 = arith.constant 0 : index
    %c0_3 = arith.constant 0 : index
    %2 = vector.load %arg2[%c0_2, %c0_3] : memref<8x32xf32, #tpu.memory_space<vmem>>, vector<8x32xf32>
    %3 = arith.addf %1, %2 : vector<8x32xf32>
    %c0_4 = arith.constant 0 : index
    %c0_5 = arith.constant 0 : index
    %4 = vector.load %arg3[%c0_4, %c0_5] : memref<1x32xf32, #tpu.memory_space<vmem>>, vector<1x32xf32>
    %5 = vector.broadcast %4 : vector<1x32xf32> to vector<8x32xf32>
    %6 = arith.addf %3, %5 : vector<8x32xf32>
    %c0_6 = arith.constant 0 : index
    %c0_7 = arith.constant 0 : index
    %7 = vector.load %arg4[%c0_6, %c0_7] : memref<1x32xf32, #tpu.memory_space<vmem>>, vector<1x32xf32>
    %c0_8 = arith.constant 0 : index
    %c0_9 = arith.constant 0 : index
    %8 = vector.load %arg5[%c0_8, %c0_9] : memref<1x32xf32, #tpu.memory_space<vmem>>, vector<1x32xf32>
    %cst = arith.constant dense<0.000000e+00> : vector<8xf32>
    %9 = vector.multi_reduction <add>, %6, %cst [1] : vector<8x32xf32> to vector<8xf32>
    %10 = vector.shape_cast %9 : vector<8xf32> to vector<8x1xf32>
    %cst_10 = arith.constant 3.200000e+01 : f32
    %11 = vector.broadcast %cst_10 : f32 to vector<8x1xf32>
    %12 = arith.divf %10, %11 : vector<8x1xf32>
    %13 = vector.broadcast %12 : vector<8x1xf32> to vector<8x32xf32>
    %14 = arith.subf %6, %13 : vector<8x32xf32>
    %15 = arith.mulf %14, %14 : vector<8x32xf32>
    %cst_11 = arith.constant dense<0.000000e+00> : vector<8xf32>
    %16 = vector.multi_reduction <add>, %15, %cst_11 [1] : vector<8x32xf32> to vector<8xf32>
    %17 = vector.shape_cast %16 : vector<8xf32> to vector<8x1xf32>
    %cst_12 = arith.constant 3.200000e+01 : f32
    %18 = vector.broadcast %cst_12 : f32 to vector<8x1xf32>
    %19 = arith.divf %17, %18 : vector<8x1xf32>
    %20 = vector.broadcast %12 : vector<8x1xf32> to vector<8x32xf32>
    %21 = arith.subf %6, %20 : vector<8x32xf32>
    %cst_13 = arith.constant 9.99999996E-13 : f32
    %22 = vector.broadcast %cst_13 : f32 to vector<8x1xf32>
    %23 = arith.addf %19, %22 : vector<8x1xf32>
    %24 = math.rsqrt %23 : vector<8x1xf32>
    %25 = vector.broadcast %24 : vector<8x1xf32> to vector<8x32xf32>
    %26 = arith.mulf %21, %25 : vector<8x32xf32>
    %27 = vector.broadcast %7 : vector<1x32xf32> to vector<8x32xf32>
    %28 = arith.mulf %26, %27 : vector<8x32xf32>
    %29 = vector.broadcast %8 : vector<1x32xf32> to vector<8x32xf32>
    %30 = arith.addf %28, %29 : vector<8x32xf32>
    %c0_14 = arith.constant 0 : index
    %c0_15 = arith.constant 0 : index
    %c0_16 = arith.constant 0 : index
    %31 = vector.load %arg6[%c0_14, %c0_15, %c0_16] : memref<1x8x32xf32, #tpu.memory_space<vmem>>, vector<1x8x32xf32>
    %32 = vector.shape_cast %31 : vector<1x8x32xf32> to vector<8x32xf32>
    %33 = vector.shape_cast %30 : vector<8x32xf32> to vector<1x8x32xf32>
    tpu.vector_store %arg6[%c0_14, %c0_15, %c0_16], %33 {strides = array<i32>} : memref<1x8x32xf32, #tpu.memory_space<vmem>>, vector<1x8x32xf32>,
    return
  }
  func.func @transform_0(%arg0: i32) -> (i32, i32, i32) {
    %c0_i32 = arith.constant 0 : i32
    %c0_i32_0 = arith.constant 0 : i32
    %c0_i32_1 = arith.constant 0 : i32
    return %arg0, %c0_i32, %c0_i32_0 : i32, i32, i32
  }
  func.func @transform_1(%arg0: i32) -> (i32, i32) {
    %c0_i32 = arith.constant 0 : i32
    %c0_i32_0 = arith.constant 0 : i32
    %c0_i32_1 = arith.constant 0 : i32
    return %c0_i32, %c0_i32_0 : i32, i32
  }
  func.func @transform_2(%arg0: i32) -> (i32, i32) {
    %c0_i32 = arith.constant 0 : i32
    %c0_i32_0 = arith.constant 0 : i32
    %c0_i32_1 = arith.constant 0 : i32
    return %c0_i32, %c0_i32_0 : i32, i32
  }
  func.func @transform_3(%arg0: i32) -> (i32, i32) {
    %c0_i32 = arith.constant 0 : i32
    %c0_i32_0 = arith.constant 0 : i32
    %c0_i32_1 = arith.constant 0 : i32
    return %c0_i32, %c0_i32_0 : i32, i32
  }
  func.func @transform_4(%arg0: i32) -> (i32, i32) {
    %c0_i32 = arith.constant 0 : i32
    %c0_i32_0 = arith.constant 0 : i32
    %c0_i32_1 = arith.constant 0 : i32
    return %c0_i32, %c0_i32_0 : i32, i32
  }
  func.func @transform_5(%arg0: i32) -> (i32, i32, i32) {
    %c0_i32 = arith.constant 0 : i32
    %c0_i32_0 = arith.constant 0 : i32
    %c0_i32_1 = arith.constant 0 : i32
    return %arg0, %c0_i32, %c0_i32_0 : i32, i32, i32
  }
}

module attributes {stable_mosaic.version = 11 : i64} {
  func.func @_bert_text_layer_kernel(%arg0: i32, %arg1: memref<1x8x32xf32, #tpu.memory_space<vmem>>, %arg2: memref<1x1x8xf32, #tpu.memory_space<vmem>>, %arg3: memref<32x96xf32, #tpu.memory_space<vmem>>, %arg4: memref<1x96xf32, #tpu.memory_space<vmem>>, %arg5: memref<32x32xf32, #tpu.memory_space<vmem>>, %arg6: memref<1x32xf32, #tpu.memory_space<vmem>>, %arg7: memref<1x32xf32, #tpu.memory_space<vmem>>, %arg8: memref<1x32xf32, #tpu.memory_space<vmem>>, %arg9: memref<32x128xf32, #tpu.memory_space<vmem>>, %arg10: memref<1x128xf32, #tpu.memory_space<vmem>>, %arg11: memref<128x32xf32, #tpu.memory_space<vmem>>, %arg12: memref<1x32xf32, #tpu.memory_space<vmem>>, %arg13: memref<1x32xf32, #tpu.memory_space<vmem>>, %arg14: memref<1x32xf32, #tpu.memory_space<vmem>>, %arg15: memref<1x8x32xf32, #tpu.memory_space<vmem>>) attributes {dimension_semantics = [#tpu.dimension_semantics<parallel>], iteration_bounds = array<i64: 2>, scalar_prefetch = 0 : i64, scratch_operands = 0 : i64, tpu.core_type = #tpu.core_type<tc>, window_params = [{transform_indices = @transform_0, window_bounds = array<i64: 1, 8, 32>}, {transform_indices = @transform_1, window_bounds = array<i64: 1, 1, 8>}, {pipeline_mode = #tpu.pipeline_mode<synchronous>, transform_indices = @transform_2, window_bounds = array<i64: 32, 96>}, {pipeline_mode = #tpu.pipeline_mode<synchronous>, transform_indices = @transform_3, window_bounds = array<i64: 1, 96>}, {pipeline_mode = #tpu.pipeline_mode<synchronous>, transform_indices = @transform_4, window_bounds = array<i64: 32, 32>}, {pipeline_mode = #tpu.pipeline_mode<synchronous>, transform_indices = @transform_5, window_bounds = array<i64: 1, 32>}, {pipeline_mode = #tpu.pipeline_mode<synchronous>, transform_indices = @transform_6, window_bounds = array<i64: 1, 32>}, {pipeline_mode = #tpu.pipeline_mode<synchronous>, transform_indices = @transform_7, window_bounds = array<i64: 1, 32>}, {pipeline_mode = #tpu.pipeline_mode<synchronous>, transform_indices = @transform_8, window_bounds = array<i64: 32, 128>}, {pipeline_mode = #tpu.pipeline_mode<synchronous>, transform_indices = @transform_9, window_bounds = array<i64: 1, 128>}, {pipeline_mode = #tpu.pipeline_mode<synchronous>, transform_indices = @transform_10, window_bounds = array<i64: 128, 32>}, {pipeline_mode = #tpu.pipeline_mode<synchronous>, transform_indices = @transform_11, window_bounds = array<i64: 1, 32>}, {pipeline_mode = #tpu.pipeline_mode<synchronous>, transform_indices = @transform_12, window_bounds = array<i64: 1, 32>}, {pipeline_mode = #tpu.pipeline_mode<synchronous>, transform_indices = @transform_13, window_bounds = array<i64: 1, 32>}, {transform_indices = @transform_14, window_bounds = array<i64: 1, 8, 32>}]} {
    %c0 = arith.constant 0 : index
    %c0_0 = arith.constant 0 : index
    %c0_1 = arith.constant 0 : index
    %0 = vector.load %arg1[%c0, %c0_0, %c0_1] : memref<1x8x32xf32, #tpu.memory_space<vmem>>, vector<1x8x32xf32>
    %1 = vector.shape_cast %0 : vector<1x8x32xf32> to vector<8x32xf32>
    %c0_2 = arith.constant 0 : index
    %c0_3 = arith.constant 0 : index
    %c0_4 = arith.constant 0 : index
    %2 = vector.load %arg2[%c0_2, %c0_3, %c0_4] : memref<1x1x8xf32, #tpu.memory_space<vmem>>, vector<1x1x8xf32>
    %3 = vector.shape_cast %2 : vector<1x1x8xf32> to vector<1x8xf32>
    %c0_5 = arith.constant 0 : index
    %c0_6 = arith.constant 0 : index
    %4 = vector.load %arg3[%c0_5, %c0_6] : memref<32x96xf32, #tpu.memory_space<vmem>>, vector<32x96xf32>
    %c0_7 = arith.constant 0 : index
    %c0_8 = arith.constant 0 : index
    %5 = vector.load %arg4[%c0_7, %c0_8] : memref<1x96xf32, #tpu.memory_space<vmem>>, vector<1x96xf32>
    %6 = arith.truncf %1 : vector<8x32xf32> to vector<8x32xbf16>
    %7 = arith.truncf %4 : vector<32x96xf32> to vector<32x96xbf16>
    %cst = arith.constant dense<0.000000e+00> : vector<8x96xf32>
    %8 = tpu.matmul %6, %7, %cst {dimension_numbers = #tpu.dot_dimension_numbers<[1], [0], [0], [1], [0, 0, 1, 1], [], []>} : vector<8x32xbf16>, vector<32x96xbf16>, vector<8x96xf32> -> vector<8x96xf32>
    %9 = vector.broadcast %5 : vector<1x96xf32> to vector<8x96xf32>
    %10 = arith.addf %8, %9 : vector<8x96xf32>
    %11 = vector.extract_strided_slice %10 {offsets = [0, 0], sizes = [8, 32], strides = [1, 1]} : vector<8x96xf32> to vector<8x32xf32>
    %12 = vector.extract_strided_slice %10 {offsets = [0, 32], sizes = [8, 32], strides = [1, 1]} : vector<8x96xf32> to vector<8x32xf32>
    %13 = vector.extract_strided_slice %10 {offsets = [0, 64], sizes = [8, 32], strides = [1, 1]} : vector<8x96xf32> to vector<8x32xf32>
    %14 = vector.extract_strided_slice %11 {offsets = [0, 0], sizes = [8, 16], strides = [1, 1]} : vector<8x32xf32> to vector<8x16xf32>
    %15 = arith.truncf %14 : vector<8x16xf32> to vector<8x16xbf16>
    %16 = vector.extract_strided_slice %12 {offsets = [0, 0], sizes = [8, 16], strides = [1, 1]} : vector<8x32xf32> to vector<8x16xf32>
    %17 = arith.truncf %16 : vector<8x16xf32> to vector<8x16xbf16>
    %18 = vector.extract_strided_slice %13 {offsets = [0, 0], sizes = [8, 16], strides = [1, 1]} : vector<8x32xf32> to vector<8x16xf32>
    %19 = arith.truncf %18 : vector<8x16xf32> to vector<8x16xbf16>
    %cst_9 = arith.constant dense<0.000000e+00> : vector<8x8xf32>
    %20 = tpu.matmul %15, %17, %cst_9 {dimension_numbers = #tpu.dot_dimension_numbers<[1], [1], [0], [0], [0, 0, 1, 0], [], []>} : vector<8x16xbf16>, vector<8x16xbf16>, vector<8x8xf32> -> vector<8x8xf32>
    %cst_10 = arith.constant 2.500000e-01 : f32
    %21 = vector.broadcast %cst_10 : f32 to vector<8x8xf32>
    %22 = arith.mulf %20, %21 : vector<8x8xf32>
    %23 = vector.broadcast %3 : vector<1x8xf32> to vector<8x8xf32>
    %24 = arith.addf %22, %23 : vector<8x8xf32>
    %cst_11 = arith.constant dense<0xFF800000> : vector<8xf32>
    %25 = vector.multi_reduction <maximumf>, %24, %cst_11 [1] : vector<8x8xf32> to vector<8xf32>
    %26 = vector.shape_cast %25 : vector<8xf32> to vector<8x1xf32>
    %27 = vector.broadcast %26 : vector<8x1xf32> to vector<8x8xf32>
    %28 = arith.subf %24, %27 : vector<8x8xf32>
    %29 = math.exp %28 : vector<8x8xf32>
    %cst_12 = arith.constant dense<0.000000e+00> : vector<8xf32>
    %30 = vector.multi_reduction <add>, %29, %cst_12 [1] : vector<8x8xf32> to vector<8xf32>
    %31 = vector.shape_cast %30 : vector<8xf32> to vector<8x1xf32>
    %32 = tpu.reciprocal %31 {approx = true} : vector<8x1xf32> -> vector<8x1xf32>
    %33 = vector.broadcast %32 : vector<8x1xf32> to vector<8x8xf32>
    %34 = arith.mulf %29, %33 : vector<8x8xf32>
    %35 = arith.truncf %34 : vector<8x8xf32> to vector<8x8xbf16>
    %cst_13 = arith.constant dense<0.000000e+00> : vector<8x16xf32>
    %36 = tpu.matmul %35, %19, %cst_13 {dimension_numbers = #tpu.dot_dimension_numbers<[1], [0], [0], [1], [0, 0, 1, 1], [], []>} : vector<8x8xbf16>, vector<8x16xbf16>, vector<8x16xf32> -> vector<8x16xf32>
    %37 = vector.extract_strided_slice %11 {offsets = [0, 16], sizes = [8, 16], strides = [1, 1]} : vector<8x32xf32> to vector<8x16xf32>
    %38 = arith.truncf %37 : vector<8x16xf32> to vector<8x16xbf16>
    %39 = vector.extract_strided_slice %12 {offsets = [0, 16], sizes = [8, 16], strides = [1, 1]} : vector<8x32xf32> to vector<8x16xf32>
    %40 = arith.truncf %39 : vector<8x16xf32> to vector<8x16xbf16>
    %41 = vector.extract_strided_slice %13 {offsets = [0, 16], sizes = [8, 16], strides = [1, 1]} : vector<8x32xf32> to vector<8x16xf32>
    %42 = arith.truncf %41 : vector<8x16xf32> to vector<8x16xbf16>
    %cst_14 = arith.constant dense<0.000000e+00> : vector<8x8xf32>
    %43 = tpu.matmul %38, %40, %cst_14 {dimension_numbers = #tpu.dot_dimension_numbers<[1], [1], [0], [0], [0, 0, 1, 0], [], []>} : vector<8x16xbf16>, vector<8x16xbf16>, vector<8x8xf32> -> vector<8x8xf32>
    %cst_15 = arith.constant 2.500000e-01 : f32
    %44 = vector.broadcast %cst_15 : f32 to vector<8x8xf32>
    %45 = arith.mulf %43, %44 : vector<8x8xf32>
    %46 = vector.broadcast %3 : vector<1x8xf32> to vector<8x8xf32>
    %47 = arith.addf %45, %46 : vector<8x8xf32>
    %cst_16 = arith.constant dense<0xFF800000> : vector<8xf32>
    %48 = vector.multi_reduction <maximumf>, %47, %cst_16 [1] : vector<8x8xf32> to vector<8xf32>
    %49 = vector.shape_cast %48 : vector<8xf32> to vector<8x1xf32>
    %50 = vector.broadcast %49 : vector<8x1xf32> to vector<8x8xf32>
    %51 = arith.subf %47, %50 : vector<8x8xf32>
    %52 = math.exp %51 : vector<8x8xf32>
    %cst_17 = arith.constant dense<0.000000e+00> : vector<8xf32>
    %53 = vector.multi_reduction <add>, %52, %cst_17 [1] : vector<8x8xf32> to vector<8xf32>
    %54 = vector.shape_cast %53 : vector<8xf32> to vector<8x1xf32>
    %55 = tpu.reciprocal %54 {approx = true} : vector<8x1xf32> -> vector<8x1xf32>
    %56 = vector.broadcast %55 : vector<8x1xf32> to vector<8x8xf32>
    %57 = arith.mulf %52, %56 : vector<8x8xf32>
    %58 = arith.truncf %57 : vector<8x8xf32> to vector<8x8xbf16>
    %cst_18 = arith.constant dense<0.000000e+00> : vector<8x16xf32>
    %59 = tpu.matmul %58, %42, %cst_18 {dimension_numbers = #tpu.dot_dimension_numbers<[1], [0], [0], [1], [0, 0, 1, 1], [], []>} : vector<8x8xbf16>, vector<8x16xbf16>, vector<8x16xf32> -> vector<8x16xf32>
    %60 = tpu.concatenate %36, %59 in 1 : vector<8x16xf32>, vector<8x16xf32> -> vector<8x32xf32>
    %c0_19 = arith.constant 0 : index
    %c0_20 = arith.constant 0 : index
    %61 = vector.load %arg5[%c0_19, %c0_20] : memref<32x32xf32, #tpu.memory_space<vmem>>, vector<32x32xf32>
    %c0_21 = arith.constant 0 : index
    %c0_22 = arith.constant 0 : index
    %62 = vector.load %arg6[%c0_21, %c0_22] : memref<1x32xf32, #tpu.memory_space<vmem>>, vector<1x32xf32>
    %63 = arith.truncf %60 : vector<8x32xf32> to vector<8x32xbf16>
    %64 = arith.truncf %61 : vector<32x32xf32> to vector<32x32xbf16>
    %cst_23 = arith.constant dense<0.000000e+00> : vector<8x32xf32>
    %65 = tpu.matmul %63, %64, %cst_23 {dimension_numbers = #tpu.dot_dimension_numbers<[1], [0], [0], [1], [0, 0, 1, 1], [], []>} : vector<8x32xbf16>, vector<32x32xbf16>, vector<8x32xf32> -> vector<8x32xf32>
    %66 = vector.broadcast %62 : vector<1x32xf32> to vector<8x32xf32>
    %67 = arith.addf %65, %66 : vector<8x32xf32>
    %68 = arith.addf %1, %67 : vector<8x32xf32>
    %c0_24 = arith.constant 0 : index
    %c0_25 = arith.constant 0 : index
    %69 = vector.load %arg7[%c0_24, %c0_25] : memref<1x32xf32, #tpu.memory_space<vmem>>, vector<1x32xf32>
    %c0_26 = arith.constant 0 : index
    %c0_27 = arith.constant 0 : index
    %70 = vector.load %arg8[%c0_26, %c0_27] : memref<1x32xf32, #tpu.memory_space<vmem>>, vector<1x32xf32>
    %cst_28 = arith.constant dense<0.000000e+00> : vector<8xf32>
    %71 = vector.multi_reduction <add>, %68, %cst_28 [1] : vector<8x32xf32> to vector<8xf32>
    %72 = vector.shape_cast %71 : vector<8xf32> to vector<8x1xf32>
    %cst_29 = arith.constant 3.200000e+01 : f32
    %73 = vector.broadcast %cst_29 : f32 to vector<8x1xf32>
    %74 = arith.divf %72, %73 : vector<8x1xf32>
    %75 = vector.broadcast %74 : vector<8x1xf32> to vector<8x32xf32>
    %76 = arith.subf %68, %75 : vector<8x32xf32>
    %77 = arith.mulf %76, %76 : vector<8x32xf32>
    %cst_30 = arith.constant dense<0.000000e+00> : vector<8xf32>
    %78 = vector.multi_reduction <add>, %77, %cst_30 [1] : vector<8x32xf32> to vector<8xf32>
    %79 = vector.shape_cast %78 : vector<8xf32> to vector<8x1xf32>
    %cst_31 = arith.constant 3.200000e+01 : f32
    %80 = vector.broadcast %cst_31 : f32 to vector<8x1xf32>
    %81 = arith.divf %79, %80 : vector<8x1xf32>
    %82 = vector.broadcast %74 : vector<8x1xf32> to vector<8x32xf32>
    %83 = arith.subf %68, %82 : vector<8x32xf32>
    %cst_32 = arith.constant 9.99999996E-13 : f32
    %84 = vector.broadcast %cst_32 : f32 to vector<8x1xf32>
    %85 = arith.addf %81, %84 : vector<8x1xf32>
    %86 = math.rsqrt %85 : vector<8x1xf32>
    %87 = vector.broadcast %86 : vector<8x1xf32> to vector<8x32xf32>
    %88 = arith.mulf %83, %87 : vector<8x32xf32>
    %89 = vector.broadcast %69 : vector<1x32xf32> to vector<8x32xf32>
    %90 = arith.mulf %88, %89 : vector<8x32xf32>
    %91 = vector.broadcast %70 : vector<1x32xf32> to vector<8x32xf32>
    %92 = arith.addf %90, %91 : vector<8x32xf32>
    %c0_33 = arith.constant 0 : index
    %c0_34 = arith.constant 0 : index
    %93 = vector.load %arg9[%c0_33, %c0_34] : memref<32x128xf32, #tpu.memory_space<vmem>>, vector<32x128xf32>
    %c0_35 = arith.constant 0 : index
    %c0_36 = arith.constant 0 : index
    %94 = vector.load %arg10[%c0_35, %c0_36] : memref<1x128xf32, #tpu.memory_space<vmem>>, vector<1x128xf32>
    %95 = arith.truncf %92 : vector<8x32xf32> to vector<8x32xbf16>
    %96 = arith.truncf %93 : vector<32x128xf32> to vector<32x128xbf16>
    %cst_37 = arith.constant dense<0.000000e+00> : vector<8x128xf32>
    %97 = tpu.matmul %95, %96, %cst_37 {dimension_numbers = #tpu.dot_dimension_numbers<[1], [0], [0], [1], [0, 0, 1, 1], [], []>} : vector<8x32xbf16>, vector<32x128xbf16>, vector<8x128xf32> -> vector<8x128xf32>
    %98 = vector.broadcast %94 : vector<1x128xf32> to vector<8x128xf32>
    %99 = arith.addf %97, %98 : vector<8x128xf32>
    %100 = arith.mulf %99, %99 : vector<8x128xf32>
    %101 = arith.mulf %99, %100 : vector<8x128xf32>
    %cst_38 = arith.constant 4.471500e-02 : f32
    %102 = vector.broadcast %cst_38 : f32 to vector<8x128xf32>
    %103 = arith.mulf %102, %101 : vector<8x128xf32>
    %104 = arith.addf %99, %103 : vector<8x128xf32>
    %cst_39 = arith.constant 0.797884583 : f32
    %105 = vector.broadcast %cst_39 : f32 to vector<8x128xf32>
    %106 = arith.mulf %105, %104 : vector<8x128xf32>
    %107 = math.tanh %106 : vector<8x128xf32>
    %cst_40 = arith.constant 1.000000e+00 : f32
    %108 = vector.broadcast %cst_40 : f32 to vector<8x128xf32>
    %109 = arith.addf %108, %107 : vector<8x128xf32>
    %cst_41 = arith.constant 5.000000e-01 : f32
    %110 = vector.broadcast %cst_41 : f32 to vector<8x128xf32>
    %111 = arith.mulf %110, %109 : vector<8x128xf32>
    %112 = arith.mulf %99, %111 : vector<8x128xf32>
    %c0_42 = arith.constant 0 : index
    %c0_43 = arith.constant 0 : index
    %113 = vector.load %arg11[%c0_42, %c0_43] : memref<128x32xf32, #tpu.memory_space<vmem>>, vector<128x32xf32>
    %c0_44 = arith.constant 0 : index
    %c0_45 = arith.constant 0 : index
    %114 = vector.load %arg12[%c0_44, %c0_45] : memref<1x32xf32, #tpu.memory_space<vmem>>, vector<1x32xf32>
    %115 = arith.truncf %112 : vector<8x128xf32> to vector<8x128xbf16>
    %116 = arith.truncf %113 : vector<128x32xf32> to vector<128x32xbf16>
    %cst_46 = arith.constant dense<0.000000e+00> : vector<8x32xf32>
    %117 = tpu.matmul %115, %116, %cst_46 {dimension_numbers = #tpu.dot_dimension_numbers<[1], [0], [0], [1], [0, 0, 1, 1], [], []>} : vector<8x128xbf16>, vector<128x32xbf16>, vector<8x32xf32> -> vector<8x32xf32>
    %118 = vector.broadcast %114 : vector<1x32xf32> to vector<8x32xf32>
    %119 = arith.addf %117, %118 : vector<8x32xf32>
    %120 = arith.addf %92, %119 : vector<8x32xf32>
    %c0_47 = arith.constant 0 : index
    %c0_48 = arith.constant 0 : index
    %121 = vector.load %arg13[%c0_47, %c0_48] : memref<1x32xf32, #tpu.memory_space<vmem>>, vector<1x32xf32>
    %c0_49 = arith.constant 0 : index
    %c0_50 = arith.constant 0 : index
    %122 = vector.load %arg14[%c0_49, %c0_50] : memref<1x32xf32, #tpu.memory_space<vmem>>, vector<1x32xf32>
    %cst_51 = arith.constant dense<0.000000e+00> : vector<8xf32>
    %123 = vector.multi_reduction <add>, %120, %cst_51 [1] : vector<8x32xf32> to vector<8xf32>
    %124 = vector.shape_cast %123 : vector<8xf32> to vector<8x1xf32>
    %cst_52 = arith.constant 3.200000e+01 : f32
    %125 = vector.broadcast %cst_52 : f32 to vector<8x1xf32>
    %126 = arith.divf %124, %125 : vector<8x1xf32>
    %127 = vector.broadcast %126 : vector<8x1xf32> to vector<8x32xf32>
    %128 = arith.subf %120, %127 : vector<8x32xf32>
    %129 = arith.mulf %128, %128 : vector<8x32xf32>
    %cst_53 = arith.constant dense<0.000000e+00> : vector<8xf32>
    %130 = vector.multi_reduction <add>, %129, %cst_53 [1] : vector<8x32xf32> to vector<8xf32>
    %131 = vector.shape_cast %130 : vector<8xf32> to vector<8x1xf32>
    %cst_54 = arith.constant 3.200000e+01 : f32
    %132 = vector.broadcast %cst_54 : f32 to vector<8x1xf32>
    %133 = arith.divf %131, %132 : vector<8x1xf32>
    %134 = vector.broadcast %126 : vector<8x1xf32> to vector<8x32xf32>
    %135 = arith.subf %120, %134 : vector<8x32xf32>
    %cst_55 = arith.constant 9.99999996E-13 : f32
    %136 = vector.broadcast %cst_55 : f32 to vector<8x1xf32>
    %137 = arith.addf %133, %136 : vector<8x1xf32>
    %138 = math.rsqrt %137 : vector<8x1xf32>
    %139 = vector.broadcast %138 : vector<8x1xf32> to vector<8x32xf32>
    %140 = arith.mulf %135, %139 : vector<8x32xf32>
    %141 = vector.broadcast %121 : vector<1x32xf32> to vector<8x32xf32>
    %142 = arith.mulf %140, %141 : vector<8x32xf32>
    %143 = vector.broadcast %122 : vector<1x32xf32> to vector<8x32xf32>
    %144 = arith.addf %142, %143 : vector<8x32xf32>
    %c0_56 = arith.constant 0 : index
    %c0_57 = arith.constant 0 : index
    %c0_58 = arith.constant 0 : index
    %145 = vector.load %arg15[%c0_56, %c0_57, %c0_58] : memref<1x8x32xf32, #tpu.memory_space<vmem>>, vector<1x8x32xf32>
    %146 = vector.shape_cast %145 : vector<1x8x32xf32> to vector<8x32xf32>
    %147 = vector.shape_cast %144 : vector<8x32xf32> to vector<1x8x32xf32>
    tpu.vector_store %arg15[%c0_56, %c0_57, %c0_58], %147 {strides = array<i32>} : memref<1x8x32xf32, #tpu.memory_space<vmem>>, vector<1x8x32xf32>,
    return
  }
  func.func @transform_0(%arg0: i32) -> (i32, i32, i32) {
    %c0_i32 = arith.constant 0 : i32
    %c0_i32_0 = arith.constant 0 : i32
    %c0_i32_1 = arith.constant 0 : i32
    return %arg0, %c0_i32, %c0_i32_0 : i32, i32, i32
  }
  func.func @transform_1(%arg0: i32) -> (i32, i32, i32) {
    %c0_i32 = arith.constant 0 : i32
    %c0_i32_0 = arith.constant 0 : i32
    %c0_i32_1 = arith.constant 0 : i32
    return %arg0, %c0_i32, %c0_i32_0 : i32, i32, i32
  }
  func.func @transform_2(%arg0: i32) -> (i32, i32) {
    %c0_i32 = arith.constant 0 : i32
    %c0_i32_0 = arith.constant 0 : i32
    %c0_i32_1 = arith.constant 0 : i32
    return %c0_i32, %c0_i32_0 : i32, i32
  }
  func.func @transform_3(%arg0: i32) -> (i32, i32) {
    %c0_i32 = arith.constant 0 : i32
    %c0_i32_0 = arith.constant 0 : i32
    %c0_i32_1 = arith.constant 0 : i32
    return %c0_i32, %c0_i32_0 : i32, i32
  }
  func.func @transform_4(%arg0: i32) -> (i32, i32) {
    %c0_i32 = arith.constant 0 : i32
    %c0_i32_0 = arith.constant 0 : i32
    %c0_i32_1 = arith.constant 0 : i32
    return %c0_i32, %c0_i32_0 : i32, i32
  }
  func.func @transform_5(%arg0: i32) -> (i32, i32) {
    %c0_i32 = arith.constant 0 : i32
    %c0_i32_0 = arith.constant 0 : i32
    %c0_i32_1 = arith.constant 0 : i32
    return %c0_i32, %c0_i32_0 : i32, i32
  }
  func.func @transform_6(%arg0: i32) -> (i32, i32) {
    %c0_i32 = arith.constant 0 : i32
    %c0_i32_0 = arith.constant 0 : i32
    %c0_i32_1 = arith.constant 0 : i32
    return %c0_i32, %c0_i32_0 : i32, i32
  }
  func.func @transform_7(%arg0: i32) -> (i32, i32) {
    %c0_i32 = arith.constant 0 : i32
    %c0_i32_0 = arith.constant 0 : i32
    %c0_i32_1 = arith.constant 0 : i32
    return %c0_i32, %c0_i32_0 : i32, i32
  }
  func.func @transform_8(%arg0: i32) -> (i32, i32) {
    %c0_i32 = arith.constant 0 : i32
    %c0_i32_0 = arith.constant 0 : i32
    %c0_i32_1 = arith.constant 0 : i32
    return %c0_i32, %c0_i32_0 : i32, i32
  }
  func.func @transform_9(%arg0: i32) -> (i32, i32) {
    %c0_i32 = arith.constant 0 : i32
    %c0_i32_0 = arith.constant 0 : i32
    %c0_i32_1 = arith.constant 0 : i32
    return %c0_i32, %c0_i32_0 : i32, i32
  }
  func.func @transform_10(%arg0: i32) -> (i32, i32) {
    %c0_i32 = arith.constant 0 : i32
    %c0_i32_0 = arith.constant 0 : i32
    %c0_i32_1 = arith.constant 0 : i32
    return %c0_i32, %c0_i32_0 : i32, i32
  }
  func.func @transform_11(%arg0: i32) -> (i32, i32) {
    %c0_i32 = arith.constant 0 : i32
    %c0_i32_0 = arith.constant 0 : i32
    %c0_i32_1 = arith.constant 0 : i32
    return %c0_i32, %c0_i32_0 : i32, i32
  }
  func.func @transform_12(%arg0: i32) -> (i32, i32) {
    %c0_i32 = arith.constant 0 : i32
    %c0_i32_0 = arith.constant 0 : i32
    %c0_i32_1 = arith.constant 0 : i32
    return %c0_i32, %c0_i32_0 : i32, i32
  }
  func.func @transform_13(%arg0: i32) -> (i32, i32) {
    %c0_i32 = arith.constant 0 : i32
    %c0_i32_0 = arith.constant 0 : i32
    %c0_i32_1 = arith.constant 0 : i32
    return %c0_i32, %c0_i32_0 : i32, i32
  }
  func.func @transform_14(%arg0: i32) -> (i32, i32, i32) {
    %c0_i32 = arith.constant 0 : i32
    %c0_i32_0 = arith.constant 0 : i32
    %c0_i32_1 = arith.constant 0 : i32
    return %arg0, %c0_i32, %c0_i32_0 : i32, i32, i32
  }
}

module attributes {stable_mosaic.version = 11 : i64} {
  func.func @_ln_only_kernel(%arg0: i32, %arg1: memref<1x17x32xf32, #tpu.memory_space<vmem>>, %arg2: memref<1x32xf32, #tpu.memory_space<vmem>>, %arg3: memref<1x32xf32, #tpu.memory_space<vmem>>, %arg4: memref<1x17x32xf32, #tpu.memory_space<vmem>>) attributes {dimension_semantics = [#tpu.dimension_semantics<parallel>], iteration_bounds = array<i64: 2>, scalar_prefetch = 0 : i64, scratch_operands = 0 : i64, tpu.core_type = #tpu.core_type<tc>, window_params = [{transform_indices = @transform_0, window_bounds = array<i64: 1, 17, 32>}, {pipeline_mode = #tpu.pipeline_mode<synchronous>, transform_indices = @transform_1, window_bounds = array<i64: 1, 32>}, {pipeline_mode = #tpu.pipeline_mode<synchronous>, transform_indices = @transform_2, window_bounds = array<i64: 1, 32>}, {transform_indices = @transform_3, window_bounds = array<i64: 1, 17, 32>}]} {
    %c0 = arith.constant 0 : index
    %c0_0 = arith.constant 0 : index
    %c0_1 = arith.constant 0 : index
    %0 = vector.load %arg1[%c0, %c0_0, %c0_1] : memref<1x17x32xf32, #tpu.memory_space<vmem>>, vector<1x17x32xf32>
    %1 = vector.shape_cast %0 : vector<1x17x32xf32> to vector<17x32xf32>
    %c0_2 = arith.constant 0 : index
    %c0_3 = arith.constant 0 : index
    %2 = vector.load %arg2[%c0_2, %c0_3] : memref<1x32xf32, #tpu.memory_space<vmem>>, vector<1x32xf32>
    %c0_4 = arith.constant 0 : index
    %c0_5 = arith.constant 0 : index
    %3 = vector.load %arg3[%c0_4, %c0_5] : memref<1x32xf32, #tpu.memory_space<vmem>>, vector<1x32xf32>
    %cst = arith.constant dense<0.000000e+00> : vector<17xf32>
    %4 = vector.multi_reduction <add>, %1, %cst [1] : vector<17x32xf32> to vector<17xf32>
    %5 = vector.shape_cast %4 : vector<17xf32> to vector<17x1xf32>
    %cst_6 = arith.constant 3.200000e+01 : f32
    %6 = vector.broadcast %cst_6 : f32 to vector<17x1xf32>
    %7 = arith.divf %5, %6 : vector<17x1xf32>
    %8 = vector.broadcast %7 : vector<17x1xf32> to vector<17x32xf32>
    %9 = arith.subf %1, %8 : vector<17x32xf32>
    %10 = arith.mulf %9, %9 : vector<17x32xf32>
    %cst_7 = arith.constant dense<0.000000e+00> : vector<17xf32>
    %11 = vector.multi_reduction <add>, %10, %cst_7 [1] : vector<17x32xf32> to vector<17xf32>
    %12 = vector.shape_cast %11 : vector<17xf32> to vector<17x1xf32>
    %cst_8 = arith.constant 3.200000e+01 : f32
    %13 = vector.broadcast %cst_8 : f32 to vector<17x1xf32>
    %14 = arith.divf %12, %13 : vector<17x1xf32>
    %15 = vector.broadcast %7 : vector<17x1xf32> to vector<17x32xf32>
    %16 = arith.subf %1, %15 : vector<17x32xf32>
    %cst_9 = arith.constant 9.99999997E-7 : f32
    %17 = vector.broadcast %cst_9 : f32 to vector<17x1xf32>
    %18 = arith.addf %14, %17 : vector<17x1xf32>
    %19 = math.rsqrt %18 : vector<17x1xf32>
    %20 = vector.broadcast %19 : vector<17x1xf32> to vector<17x32xf32>
    %21 = arith.mulf %16, %20 : vector<17x32xf32>
    %22 = vector.broadcast %2 : vector<1x32xf32> to vector<17x32xf32>
    %23 = arith.mulf %21, %22 : vector<17x32xf32>
    %24 = vector.broadcast %3 : vector<1x32xf32> to vector<17x32xf32>
    %25 = arith.addf %23, %24 : vector<17x32xf32>
    %c0_10 = arith.constant 0 : index
    %c0_11 = arith.constant 0 : index
    %c0_12 = arith.constant 0 : index
    %26 = vector.load %arg4[%c0_10, %c0_11, %c0_12] : memref<1x17x32xf32, #tpu.memory_space<vmem>>, vector<1x17x32xf32>
    %27 = vector.shape_cast %26 : vector<1x17x32xf32> to vector<17x32xf32>
    %28 = vector.shape_cast %25 : vector<17x32xf32> to vector<1x17x32xf32>
    tpu.vector_store %arg4[%c0_10, %c0_11, %c0_12], %28 {strides = array<i32>} : memref<1x17x32xf32, #tpu.memory_space<vmem>>, vector<1x17x32xf32>,
    return
  }
  func.func @transform_0(%arg0: i32) -> (i32, i32, i32) {
    %c0_i32 = arith.constant 0 : i32
    %c0_i32_0 = arith.constant 0 : i32
    %c0_i32_1 = arith.constant 0 : i32
    return %arg0, %c0_i32, %c0_i32_0 : i32, i32, i32
  }
  func.func @transform_1(%arg0: i32) -> (i32, i32) {
    %c0_i32 = arith.constant 0 : i32
    %c0_i32_0 = arith.constant 0 : i32
    %c0_i32_1 = arith.constant 0 : i32
    return %c0_i32, %c0_i32_0 : i32, i32
  }
  func.func @transform_2(%arg0: i32) -> (i32, i32) {
    %c0_i32 = arith.constant 0 : i32
    %c0_i32_0 = arith.constant 0 : i32
    %c0_i32_1 = arith.constant 0 : i32
    return %c0_i32, %c0_i32_0 : i32, i32
  }
  func.func @transform_3(%arg0: i32) -> (i32, i32, i32) {
    %c0_i32 = arith.constant 0 : i32
    %c0_i32_0 = arith.constant 0 : i32
    %c0_i32_1 = arith.constant 0 : i32
    return %arg0, %c0_i32, %c0_i32_0 : i32, i32, i32
  }
}

module attributes {stable_mosaic.version = 11 : i64} {
  func.func @_patch_embed_kernel(%arg0: i32, %arg1: memref<1x16x48xf32, #tpu.memory_space<vmem>>, %arg2: memref<48x32xf32, #tpu.memory_space<vmem>>, %arg3: memref<1x32xf32, #tpu.memory_space<vmem>>, %arg4: memref<1x1x32xf32, #tpu.memory_space<vmem>>, %arg5: memref<1x17x32xf32, #tpu.memory_space<vmem>>, %arg6: memref<1x17x32xf32, #tpu.memory_space<vmem>>) attributes {dimension_semantics = [#tpu.dimension_semantics<parallel>], iteration_bounds = array<i64: 2>, scalar_prefetch = 0 : i64, scratch_operands = 0 : i64, tpu.core_type = #tpu.core_type<tc>, window_params = [{transform_indices = @transform_0, window_bounds = array<i64: 1, 16, 48>}, {pipeline_mode = #tpu.pipeline_mode<synchronous>, transform_indices = @transform_1, window_bounds = array<i64: 48, 32>}, {pipeline_mode = #tpu.pipeline_mode<synchronous>, transform_indices = @transform_2, window_bounds = array<i64: 1, 32>}, {pipeline_mode = #tpu.pipeline_mode<synchronous>, transform_indices = @transform_3, window_bounds = array<i64: 1, 1, 32>}, {pipeline_mode = #tpu.pipeline_mode<synchronous>, transform_indices = @transform_4, window_bounds = array<i64: 1, 17, 32>}, {transform_indices = @transform_5, window_bounds = array<i64: 1, 17, 32>}]} {
    %c0 = arith.constant 0 : index
    %c0_0 = arith.constant 0 : index
    %c0_1 = arith.constant 0 : index
    %0 = vector.load %arg1[%c0, %c0_0, %c0_1] : memref<1x16x48xf32, #tpu.memory_space<vmem>>, vector<1x16x48xf32>
    %1 = vector.shape_cast %0 : vector<1x16x48xf32> to vector<16x48xf32>
    %c0_2 = arith.constant 0 : index
    %c0_3 = arith.constant 0 : index
    %2 = vector.load %arg2[%c0_2, %c0_3] : memref<48x32xf32, #tpu.memory_space<vmem>>, vector<48x32xf32>
    %c0_4 = arith.constant 0 : index
    %c0_5 = arith.constant 0 : index
    %3 = vector.load %arg3[%c0_4, %c0_5] : memref<1x32xf32, #tpu.memory_space<vmem>>, vector<1x32xf32>
    %4 = arith.truncf %1 : vector<16x48xf32> to vector<16x48xbf16>
    %5 = arith.truncf %2 : vector<48x32xf32> to vector<48x32xbf16>
    %cst = arith.constant dense<0.000000e+00> : vector<16x32xf32>
    %6 = tpu.matmul %4, %5, %cst {dimension_numbers = #tpu.dot_dimension_numbers<[1], [0], [0], [1], [0, 0, 1, 1], [], []>} : vector<16x48xbf16>, vector<48x32xbf16>, vector<16x32xf32> -> vector<16x32xf32>
    %7 = vector.broadcast %3 : vector<1x32xf32> to vector<16x32xf32>
    %8 = arith.addf %6, %7 : vector<16x32xf32>
    %c0_6 = arith.constant 0 : index
    %c0_7 = arith.constant 0 : index
    %c0_8 = arith.constant 0 : index
    %9 = vector.load %arg4[%c0_6, %c0_7, %c0_8] : memref<1x1x32xf32, #tpu.memory_space<vmem>>, vector<1x1x32xf32>
    %10 = vector.shape_cast %9 : vector<1x1x32xf32> to vector<1x32xf32>
    %11 = tpu.concatenate %10, %8 in 0 : vector<1x32xf32>, vector<16x32xf32> -> vector<17x32xf32>
    %c0_9 = arith.constant 0 : index
    %c0_10 = arith.constant 0 : index
    %c0_11 = arith.constant 0 : index
    %12 = vector.load %arg5[%c0_9, %c0_10, %c0_11] : memref<1x17x32xf32, #tpu.memory_space<vmem>>, vector<1x17x32xf32>
    %13 = vector.shape_cast %12 : vector<1x17x32xf32> to vector<17x32xf32>
    %14 = arith.addf %11, %13 : vector<17x32xf32>
    %c0_12 = arith.constant 0 : index
    %c0_13 = arith.constant 0 : index
    %c0_14 = arith.constant 0 : index
    %15 = vector.load %arg6[%c0_12, %c0_13, %c0_14] : memref<1x17x32xf32, #tpu.memory_space<vmem>>, vector<1x17x32xf32>
    %16 = vector.shape_cast %15 : vector<1x17x32xf32> to vector<17x32xf32>
    %17 = vector.shape_cast %14 : vector<17x32xf32> to vector<1x17x32xf32>
    tpu.vector_store %arg6[%c0_12, %c0_13, %c0_14], %17 {strides = array<i32>} : memref<1x17x32xf32, #tpu.memory_space<vmem>>, vector<1x17x32xf32>,
    return
  }
  func.func @transform_0(%arg0: i32) -> (i32, i32, i32) {
    %c0_i32 = arith.constant 0 : i32
    %c0_i32_0 = arith.constant 0 : i32
    %c0_i32_1 = arith.constant 0 : i32
    return %arg0, %c0_i32, %c0_i32_0 : i32, i32, i32
  }
  func.func @transform_1(%arg0: i32) -> (i32, i32) {
    %c0_i32 = arith.constant 0 : i32
    %c0_i32_0 = arith.constant 0 : i32
    %c0_i32_1 = arith.constant 0 : i32
    return %c0_i32, %c0_i32_0 : i32, i32
  }
  func.func @transform_2(%arg0: i32) -> (i32, i32) {
    %c0_i32 = arith.constant 0 : i32
    %c0_i32_0 = arith.constant 0 : i32
    %c0_i32_1 = arith.constant 0 : i32
    return %c0_i32, %c0_i32_0 : i32, i32
  }
  func.func @transform_3(%arg0: i32) -> (i32, i32, i32) {
    %c0_i32 = arith.constant 0 : i32
    %c0_i32_0 = arith.constant 0 : i32
    %c0_i32_1 = arith.constant 0 : i32
    %c0_i32_2 = arith.constant 0 : i32
    return %c0_i32, %c0_i32_0, %c0_i32_1 : i32, i32, i32
  }
  func.func @transform_4(%arg0: i32) -> (i32, i32, i32) {
    %c0_i32 = arith.constant 0 : i32
    %c0_i32_0 = arith.constant 0 : i32
    %c0_i32_1 = arith.constant 0 : i32
    %c0_i32_2 = arith.constant 0 : i32
    return %c0_i32, %c0_i32_0, %c0_i32_1 : i32, i32, i32
  }
  func.func @transform_5(%arg0: i32) -> (i32, i32, i32) {
    %c0_i32 = arith.constant 0 : i32
    %c0_i32_0 = arith.constant 0 : i32
    %c0_i32_1 = arith.constant 0 : i32
    return %arg0, %c0_i32, %c0_i32_0 : i32, i32, i32
  }
}

module attributes {stable_mosaic.version = 11 : i64} {
  func.func @_vit_block_kernel(%arg0: i32, %arg1: memref<1x17x32xf32, #tpu.memory_space<vmem>>, %arg2: memref<1x32xf32, #tpu.memory_space<vmem>>, %arg3: memref<1x32xf32, #tpu.memory_space<vmem>>, %arg4: memref<32x96xf32, #tpu.memory_space<vmem>>, %arg5: memref<1x96xf32, #tpu.memory_space<vmem>>, %arg6: memref<32x32xf32, #tpu.memory_space<vmem>>, %arg7: memref<1x32xf32, #tpu.memory_space<vmem>>, %arg8: memref<1x32xf32, #tpu.memory_space<vmem>>, %arg9: memref<1x32xf32, #tpu.memory_space<vmem>>, %arg10: memref<32x128xf32, #tpu.memory_space<vmem>>, %arg11: memref<1x128xf32, #tpu.memory_space<vmem>>, %arg12: memref<128x32xf32, #tpu.memory_space<vmem>>, %arg13: memref<1x32xf32, #tpu.memory_space<vmem>>, %arg14: memref<1x17x32xf32, #tpu.memory_space<vmem>>) attributes {dimension_semantics = [#tpu.dimension_semantics<parallel>], iteration_bounds = array<i64: 2>, scalar_prefetch = 0 : i64, scratch_operands = 0 : i64, tpu.core_type = #tpu.core_type<tc>, window_params = [{transform_indices = @transform_0, window_bounds = array<i64: 1, 17, 32>}, {pipeline_mode = #tpu.pipeline_mode<synchronous>, transform_indices = @transform_1, window_bounds = array<i64: 1, 32>}, {pipeline_mode = #tpu.pipeline_mode<synchronous>, transform_indices = @transform_2, window_bounds = array<i64: 1, 32>}, {pipeline_mode = #tpu.pipeline_mode<synchronous>, transform_indices = @transform_3, window_bounds = array<i64: 32, 96>}, {pipeline_mode = #tpu.pipeline_mode<synchronous>, transform_indices = @transform_4, window_bounds = array<i64: 1, 96>}, {pipeline_mode = #tpu.pipeline_mode<synchronous>, transform_indices = @transform_5, window_bounds = array<i64: 32, 32>}, {pipeline_mode = #tpu.pipeline_mode<synchronous>, transform_indices = @transform_6, window_bounds = array<i64: 1, 32>}, {pipeline_mode = #tpu.pipeline_mode<synchronous>, transform_indices = @transform_7, window_bounds = array<i64: 1, 32>}, {pipeline_mode = #tpu.pipeline_mode<synchronous>, transform_indices = @transform_8, window_bounds = array<i64: 1, 32>}, {pipeline_mode = #tpu.pipeline_mode<synchronous>, transform_indices = @transform_9, window_bounds = array<i64: 32, 128>}, {pipeline_mode = #tpu.pipeline_mode<synchronous>, transform_indices = @transform_10, window_bounds = array<i64: 1, 128>}, {pipeline_mode = #tpu.pipeline_mode<synchronous>, transform_indices = @transform_11, window_bounds = array<i64: 128, 32>}, {pipeline_mode = #tpu.pipeline_mode<synchronous>, transform_indices = @transform_12, window_bounds = array<i64: 1, 32>}, {transform_indices = @transform_13, window_bounds = array<i64: 1, 17, 32>}]} {
    %c0 = arith.constant 0 : index
    %c0_0 = arith.constant 0 : index
    %c0_1 = arith.constant 0 : index
    %0 = vector.load %arg1[%c0, %c0_0, %c0_1] : memref<1x17x32xf32, #tpu.memory_space<vmem>>, vector<1x17x32xf32>
    %1 = vector.shape_cast %0 : vector<1x17x32xf32> to vector<17x32xf32>
    %c0_2 = arith.constant 0 : index
    %c0_3 = arith.constant 0 : index
    %2 = vector.load %arg2[%c0_2, %c0_3] : memref<1x32xf32, #tpu.memory_space<vmem>>, vector<1x32xf32>
    %c0_4 = arith.constant 0 : index
    %c0_5 = arith.constant 0 : index
    %3 = vector.load %arg3[%c0_4, %c0_5] : memref<1x32xf32, #tpu.memory_space<vmem>>, vector<1x32xf32>
    %cst = arith.constant dense<0.000000e+00> : vector<17xf32>
    %4 = vector.multi_reduction <add>, %1, %cst [1] : vector<17x32xf32> to vector<17xf32>
    %5 = vector.shape_cast %4 : vector<17xf32> to vector<17x1xf32>
    %cst_6 = arith.constant 3.200000e+01 : f32
    %6 = vector.broadcast %cst_6 : f32 to vector<17x1xf32>
    %7 = arith.divf %5, %6 : vector<17x1xf32>
    %8 = vector.broadcast %7 : vector<17x1xf32> to vector<17x32xf32>
    %9 = arith.subf %1, %8 : vector<17x32xf32>
    %10 = arith.mulf %9, %9 : vector<17x32xf32>
    %cst_7 = arith.constant dense<0.000000e+00> : vector<17xf32>
    %11 = vector.multi_reduction <add>, %10, %cst_7 [1] : vector<17x32xf32> to vector<17xf32>
    %12 = vector.shape_cast %11 : vector<17xf32> to vector<17x1xf32>
    %cst_8 = arith.constant 3.200000e+01 : f32
    %13 = vector.broadcast %cst_8 : f32 to vector<17x1xf32>
    %14 = arith.divf %12, %13 : vector<17x1xf32>
    %15 = vector.broadcast %7 : vector<17x1xf32> to vector<17x32xf32>
    %16 = arith.subf %1, %15 : vector<17x32xf32>
    %cst_9 = arith.constant 9.99999997E-7 : f32
    %17 = vector.broadcast %cst_9 : f32 to vector<17x1xf32>
    %18 = arith.addf %14, %17 : vector<17x1xf32>
    %19 = math.rsqrt %18 : vector<17x1xf32>
    %20 = vector.broadcast %19 : vector<17x1xf32> to vector<17x32xf32>
    %21 = arith.mulf %16, %20 : vector<17x32xf32>
    %22 = vector.broadcast %2 : vector<1x32xf32> to vector<17x32xf32>
    %23 = arith.mulf %21, %22 : vector<17x32xf32>
    %24 = vector.broadcast %3 : vector<1x32xf32> to vector<17x32xf32>
    %25 = arith.addf %23, %24 : vector<17x32xf32>
    %c0_10 = arith.constant 0 : index
    %c0_11 = arith.constant 0 : index
    %26 = vector.load %arg4[%c0_10, %c0_11] : memref<32x96xf32, #tpu.memory_space<vmem>>, vector<32x96xf32>
    %c0_12 = arith.constant 0 : index
    %c0_13 = arith.constant 0 : index
    %27 = vector.load %arg5[%c0_12, %c0_13] : memref<1x96xf32, #tpu.memory_space<vmem>>, vector<1x96xf32>
    %28 = arith.truncf %25 : vector<17x32xf32> to vector<17x32xbf16>
    %29 = arith.truncf %26 : vector<32x96xf32> to vector<32x96xbf16>
    %cst_14 = arith.constant dense<0.000000e+00> : vector<17x96xf32>
    %30 = tpu.matmul %28, %29, %cst_14 {dimension_numbers = #tpu.dot_dimension_numbers<[1], [0], [0], [1], [0, 0, 1, 1], [], []>} : vector<17x32xbf16>, vector<32x96xbf16>, vector<17x96xf32> -> vector<17x96xf32>
    %31 = vector.broadcast %27 : vector<1x96xf32> to vector<17x96xf32>
    %32 = arith.addf %30, %31 : vector<17x96xf32>
    %33 = vector.extract_strided_slice %32 {offsets = [0, 0], sizes = [17, 32], strides = [1, 1]} : vector<17x96xf32> to vector<17x32xf32>
    %34 = vector.extract_strided_slice %32 {offsets = [0, 32], sizes = [17, 32], strides = [1, 1]} : vector<17x96xf32> to vector<17x32xf32>
    %35 = vector.extract_strided_slice %32 {offsets = [0, 64], sizes = [17, 32], strides = [1, 1]} : vector<17x96xf32> to vector<17x32xf32>
    %36 = vector.extract_strided_slice %33 {offsets = [0, 0], sizes = [17, 16], strides = [1, 1]} : vector<17x32xf32> to vector<17x16xf32>
    %37 = arith.truncf %36 : vector<17x16xf32> to vector<17x16xbf16>
    %38 = vector.extract_strided_slice %34 {offsets = [0, 0], sizes = [17, 16], strides = [1, 1]} : vector<17x32xf32> to vector<17x16xf32>
    %39 = arith.truncf %38 : vector<17x16xf32> to vector<17x16xbf16>
    %40 = vector.extract_strided_slice %35 {offsets = [0, 0], sizes = [17, 16], strides = [1, 1]} : vector<17x32xf32> to vector<17x16xf32>
    %41 = arith.truncf %40 : vector<17x16xf32> to vector<17x16xbf16>
    %cst_15 = arith.constant dense<0.000000e+00> : vector<17x17xf32>
    %42 = tpu.matmul %37, %39, %cst_15 {dimension_numbers = #tpu.dot_dimension_numbers<[1], [1], [0], [0], [0, 0, 1, 0], [], []>} : vector<17x16xbf16>, vector<17x16xbf16>, vector<17x17xf32> -> vector<17x17xf32>
    %cst_16 = arith.constant 2.500000e-01 : f32
    %43 = vector.broadcast %cst_16 : f32 to vector<17x17xf32>
    %44 = arith.mulf %42, %43 : vector<17x17xf32>
    %cst_17 = arith.constant dense<0xFF800000> : vector<17xf32>
    %45 = vector.multi_reduction <maximumf>, %44, %cst_17 [1] : vector<17x17xf32> to vector<17xf32>
    %46 = vector.shape_cast %45 : vector<17xf32> to vector<17x1xf32>
    %47 = vector.broadcast %46 : vector<17x1xf32> to vector<17x17xf32>
    %48 = arith.subf %44, %47 : vector<17x17xf32>
    %49 = math.exp %48 : vector<17x17xf32>
    %cst_18 = arith.constant dense<0.000000e+00> : vector<17xf32>
    %50 = vector.multi_reduction <add>, %49, %cst_18 [1] : vector<17x17xf32> to vector<17xf32>
    %51 = vector.shape_cast %50 : vector<17xf32> to vector<17x1xf32>
    %52 = tpu.reciprocal %51 {approx = true} : vector<17x1xf32> -> vector<17x1xf32>
    %53 = vector.broadcast %52 : vector<17x1xf32> to vector<17x17xf32>
    %54 = arith.mulf %49, %53 : vector<17x17xf32>
    %55 = arith.truncf %54 : vector<17x17xf32> to vector<17x17xbf16>
    %cst_19 = arith.constant dense<0.000000e+00> : vector<17x16xf32>
    %56 = tpu.matmul %55, %41, %cst_19 {dimension_numbers = #tpu.dot_dimension_numbers<[1], [0], [0], [1], [0, 0, 1, 1], [], []>} : vector<17x17xbf16>, vector<17x16xbf16>, vector<17x16xf32> -> vector<17x16xf32>
    %57 = vector.extract_strided_slice %33 {offsets = [0, 16], sizes = [17, 16], strides = [1, 1]} : vector<17x32xf32> to vector<17x16xf32>
    %58 = arith.truncf %57 : vector<17x16xf32> to vector<17x16xbf16>
    %59 = vector.extract_strided_slice %34 {offsets = [0, 16], sizes = [17, 16], strides = [1, 1]} : vector<17x32xf32> to vector<17x16xf32>
    %60 = arith.truncf %59 : vector<17x16xf32> to vector<17x16xbf16>
    %61 = vector.extract_strided_slice %35 {offsets = [0, 16], sizes = [17, 16], strides = [1, 1]} : vector<17x32xf32> to vector<17x16xf32>
    %62 = arith.truncf %61 : vector<17x16xf32> to vector<17x16xbf16>
    %cst_20 = arith.constant dense<0.000000e+00> : vector<17x17xf32>
    %63 = tpu.matmul %58, %60, %cst_20 {dimension_numbers = #tpu.dot_dimension_numbers<[1], [1], [0], [0], [0, 0, 1, 0], [], []>} : vector<17x16xbf16>, vector<17x16xbf16>, vector<17x17xf32> -> vector<17x17xf32>
    %cst_21 = arith.constant 2.500000e-01 : f32
    %64 = vector.broadcast %cst_21 : f32 to vector<17x17xf32>
    %65 = arith.mulf %63, %64 : vector<17x17xf32>
    %cst_22 = arith.constant dense<0xFF800000> : vector<17xf32>
    %66 = vector.multi_reduction <maximumf>, %65, %cst_22 [1] : vector<17x17xf32> to vector<17xf32>
    %67 = vector.shape_cast %66 : vector<17xf32> to vector<17x1xf32>
    %68 = vector.broadcast %67 : vector<17x1xf32> to vector<17x17xf32>
    %69 = arith.subf %65, %68 : vector<17x17xf32>
    %70 = math.exp %69 : vector<17x17xf32>
    %cst_23 = arith.constant dense<0.000000e+00> : vector<17xf32>
    %71 = vector.multi_reduction <add>, %70, %cst_23 [1] : vector<17x17xf32> to vector<17xf32>
    %72 = vector.shape_cast %71 : vector<17xf32> to vector<17x1xf32>
    %73 = tpu.reciprocal %72 {approx = true} : vector<17x1xf32> -> vector<17x1xf32>
    %74 = vector.broadcast %73 : vector<17x1xf32> to vector<17x17xf32>
    %75 = arith.mulf %70, %74 : vector<17x17xf32>
    %76 = arith.truncf %75 : vector<17x17xf32> to vector<17x17xbf16>
    %cst_24 = arith.constant dense<0.000000e+00> : vector<17x16xf32>
    %77 = tpu.matmul %76, %62, %cst_24 {dimension_numbers = #tpu.dot_dimension_numbers<[1], [0], [0], [1], [0, 0, 1, 1], [], []>} : vector<17x17xbf16>, vector<17x16xbf16>, vector<17x16xf32> -> vector<17x16xf32>
    %78 = tpu.concatenate %56, %77 in 1 : vector<17x16xf32>, vector<17x16xf32> -> vector<17x32xf32>
    %c0_25 = arith.constant 0 : index
    %c0_26 = arith.constant 0 : index
    %79 = vector.load %arg6[%c0_25, %c0_26] : memref<32x32xf32, #tpu.memory_space<vmem>>, vector<32x32xf32>
    %c0_27 = arith.constant 0 : index
    %c0_28 = arith.constant 0 : index
    %80 = vector.load %arg7[%c0_27, %c0_28] : memref<1x32xf32, #tpu.memory_space<vmem>>, vector<1x32xf32>
    %81 = arith.truncf %78 : vector<17x32xf32> to vector<17x32xbf16>
    %82 = arith.truncf %79 : vector<32x32xf32> to vector<32x32xbf16>
    %cst_29 = arith.constant dense<0.000000e+00> : vector<17x32xf32>
    %83 = tpu.matmul %81, %82, %cst_29 {dimension_numbers = #tpu.dot_dimension_numbers<[1], [0], [0], [1], [0, 0, 1, 1], [], []>} : vector<17x32xbf16>, vector<32x32xbf16>, vector<17x32xf32> -> vector<17x32xf32>
    %84 = vector.broadcast %80 : vector<1x32xf32> to vector<17x32xf32>
    %85 = arith.addf %83, %84 : vector<17x32xf32>
    %86 = arith.addf %1, %85 : vector<17x32xf32>
    %c0_30 = arith.constant 0 : index
    %c0_31 = arith.constant 0 : index
    %87 = vector.load %arg8[%c0_30, %c0_31] : memref<1x32xf32, #tpu.memory_space<vmem>>, vector<1x32xf32>
    %c0_32 = arith.constant 0 : index
    %c0_33 = arith.constant 0 : index
    %88 = vector.load %arg9[%c0_32, %c0_33] : memref<1x32xf32, #tpu.memory_space<vmem>>, vector<1x32xf32>
    %cst_34 = arith.constant dense<0.000000e+00> : vector<17xf32>
    %89 = vector.multi_reduction <add>, %86, %cst_34 [1] : vector<17x32xf32> to vector<17xf32>
    %90 = vector.shape_cast %89 : vector<17xf32> to vector<17x1xf32>
    %cst_35 = arith.constant 3.200000e+01 : f32
    %91 = vector.broadcast %cst_35 : f32 to vector<17x1xf32>
    %92 = arith.divf %90, %91 : vector<17x1xf32>
    %93 = vector.broadcast %92 : vector<17x1xf32> to vector<17x32xf32>
    %94 = arith.subf %86, %93 : vector<17x32xf32>
    %95 = arith.mulf %94, %94 : vector<17x32xf32>
    %cst_36 = arith.constant dense<0.000000e+00> : vector<17xf32>
    %96 = vector.multi_reduction <add>, %95, %cst_36 [1] : vector<17x32xf32> to vector<17xf32>
    %97 = vector.shape_cast %96 : vector<17xf32> to vector<17x1xf32>
    %cst_37 = arith.constant 3.200000e+01 : f32
    %98 = vector.broadcast %cst_37 : f32 to vector<17x1xf32>
    %99 = arith.divf %97, %98 : vector<17x1xf32>
    %100 = vector.broadcast %92 : vector<17x1xf32> to vector<17x32xf32>
    %101 = arith.subf %86, %100 : vector<17x32xf32>
    %cst_38 = arith.constant 9.99999997E-7 : f32
    %102 = vector.broadcast %cst_38 : f32 to vector<17x1xf32>
    %103 = arith.addf %99, %102 : vector<17x1xf32>
    %104 = math.rsqrt %103 : vector<17x1xf32>
    %105 = vector.broadcast %104 : vector<17x1xf32> to vector<17x32xf32>
    %106 = arith.mulf %101, %105 : vector<17x32xf32>
    %107 = vector.broadcast %87 : vector<1x32xf32> to vector<17x32xf32>
    %108 = arith.mulf %106, %107 : vector<17x32xf32>
    %109 = vector.broadcast %88 : vector<1x32xf32> to vector<17x32xf32>
    %110 = arith.addf %108, %109 : vector<17x32xf32>
    %c0_39 = arith.constant 0 : index
    %c0_40 = arith.constant 0 : index
    %111 = vector.load %arg10[%c0_39, %c0_40] : memref<32x128xf32, #tpu.memory_space<vmem>>, vector<32x128xf32>
    %c0_41 = arith.constant 0 : index
    %c0_42 = arith.constant 0 : index
    %112 = vector.load %arg11[%c0_41, %c0_42] : memref<1x128xf32, #tpu.memory_space<vmem>>, vector<1x128xf32>
    %113 = arith.truncf %110 : vector<17x32xf32> to vector<17x32xbf16>
    %114 = arith.truncf %111 : vector<32x128xf32> to vector<32x128xbf16>
    %cst_43 = arith.constant dense<0.000000e+00> : vector<17x128xf32>
    %115 = tpu.matmul %113, %114, %cst_43 {dimension_numbers = #tpu.dot_dimension_numbers<[1], [0], [0], [1], [0, 0, 1, 1], [], []>} : vector<17x32xbf16>, vector<32x128xbf16>, vector<17x128xf32> -> vector<17x128xf32>
    %116 = vector.broadcast %112 : vector<1x128xf32> to vector<17x128xf32>
    %117 = arith.addf %115, %116 : vector<17x128xf32>
    %118 = arith.mulf %117, %117 : vector<17x128xf32>
    %119 = arith.mulf %117, %118 : vector<17x128xf32>
    %cst_44 = arith.constant 4.471500e-02 : f32
    %120 = vector.broadcast %cst_44 : f32 to vector<17x128xf32>
    %121 = arith.mulf %120, %119 : vector<17x128xf32>
    %122 = arith.addf %117, %121 : vector<17x128xf32>
    %cst_45 = arith.constant 0.797884583 : f32
    %123 = vector.broadcast %cst_45 : f32 to vector<17x128xf32>
    %124 = arith.mulf %123, %122 : vector<17x128xf32>
    %125 = math.tanh %124 : vector<17x128xf32>
    %cst_46 = arith.constant 1.000000e+00 : f32
    %126 = vector.broadcast %cst_46 : f32 to vector<17x128xf32>
    %127 = arith.addf %126, %125 : vector<17x128xf32>
    %cst_47 = arith.constant 5.000000e-01 : f32
    %128 = vector.broadcast %cst_47 : f32 to vector<17x128xf32>
    %129 = arith.mulf %128, %127 : vector<17x128xf32>
    %130 = arith.mulf %117, %129 : vector<17x128xf32>
    %c0_48 = arith.constant 0 : index
    %c0_49 = arith.constant 0 : index
    %131 = vector.load %arg12[%c0_48, %c0_49] : memref<128x32xf32, #tpu.memory_space<vmem>>, vector<128x32xf32>
    %c0_50 = arith.constant 0 : index
    %c0_51 = arith.constant 0 : index
    %132 = vector.load %arg13[%c0_50, %c0_51] : memref<1x32xf32, #tpu.memory_space<vmem>>, vector<1x32xf32>
    %133 = arith.truncf %130 : vector<17x128xf32> to vector<17x128xbf16>
    %134 = arith.truncf %131 : vector<128x32xf32> to vector<128x32xbf16>
    %cst_52 = arith.constant dense<0.000000e+00> : vector<17x32xf32>
    %135 = tpu.matmul %133, %134, %cst_52 {dimension_numbers = #tpu.dot_dimension_numbers<[1], [0], [0], [1], [0, 0, 1, 1], [], []>} : vector<17x128xbf16>, vector<128x32xbf16>, vector<17x32xf32> -> vector<17x32xf32>
    %136 = vector.broadcast %132 : vector<1x32xf32> to vector<17x32xf32>
    %137 = arith.addf %135, %136 : vector<17x32xf32>
    %138 = arith.addf %86, %137 : vector<17x32xf32>
    %c0_53 = arith.constant 0 : index
    %c0_54 = arith.constant 0 : index
    %c0_55 = arith.constant 0 : index
    %139 = vector.load %arg14[%c0_53, %c0_54, %c0_55] : memref<1x17x32xf32, #tpu.memory_space<vmem>>, vector<1x17x32xf32>
    %140 = vector.shape_cast %139 : vector<1x17x32xf32> to vector<17x32xf32>
    %141 = vector.shape_cast %138 : vector<17x32xf32> to vector<1x17x32xf32>
    tpu.vector_store %arg14[%c0_53, %c0_54, %c0_55], %141 {strides = array<i32>} : memref<1x17x32xf32, #tpu.memory_space<vmem>>, vector<1x17x32xf32>,
    return
  }
  func.func @transform_0(%arg0: i32) -> (i32, i32, i32) {
    %c0_i32 = arith.constant 0 : i32
    %c0_i32_0 = arith.constant 0 : i32
    %c0_i32_1 = arith.constant 0 : i32
    return %arg0, %c0_i32, %c0_i32_0 : i32, i32, i32
  }
  func.func @transform_1(%arg0: i32) -> (i32, i32) {
    %c0_i32 = arith.constant 0 : i32
    %c0_i32_0 = arith.constant 0 : i32
    %c0_i32_1 = arith.constant 0 : i32
    return %c0_i32, %c0_i32_0 : i32, i32
  }
  func.func @transform_2(%arg0: i32) -> (i32, i32) {
    %c0_i32 = arith.constant 0 : i32
    %c0_i32_0 = arith.constant 0 : i32
    %c0_i32_1 = arith.constant 0 : i32
    return %c0_i32, %c0_i32_0 : i32, i32
  }
  func.func @transform_3(%arg0: i32) -> (i32, i32) {
    %c0_i32 = arith.constant 0 : i32
    %c0_i32_0 = arith.constant 0 : i32
    %c0_i32_1 = arith.constant 0 : i32
    return %c0_i32, %c0_i32_0 : i32, i32
  }
  func.func @transform_4(%arg0: i32) -> (i32, i32) {
    %c0_i32 = arith.constant 0 : i32
    %c0_i32_0 = arith.constant 0 : i32
    %c0_i32_1 = arith.constant 0 : i32
    return %c0_i32, %c0_i32_0 : i32, i32
  }
  func.func @transform_5(%arg0: i32) -> (i32, i32) {
    %c0_i32 = arith.constant 0 : i32
    %c0_i32_0 = arith.constant 0 : i32
    %c0_i32_1 = arith.constant 0 : i32
    return %c0_i32, %c0_i32_0 : i32, i32
  }
  func.func @transform_6(%arg0: i32) -> (i32, i32) {
    %c0_i32 = arith.constant 0 : i32
    %c0_i32_0 = arith.constant 0 : i32
    %c0_i32_1 = arith.constant 0 : i32
    return %c0_i32, %c0_i32_0 : i32, i32
  }
  func.func @transform_7(%arg0: i32) -> (i32, i32) {
    %c0_i32 = arith.constant 0 : i32
    %c0_i32_0 = arith.constant 0 : i32
    %c0_i32_1 = arith.constant 0 : i32
    return %c0_i32, %c0_i32_0 : i32, i32
  }
  func.func @transform_8(%arg0: i32) -> (i32, i32) {
    %c0_i32 = arith.constant 0 : i32
    %c0_i32_0 = arith.constant 0 : i32
    %c0_i32_1 = arith.constant 0 : i32
    return %c0_i32, %c0_i32_0 : i32, i32
  }
  func.func @transform_9(%arg0: i32) -> (i32, i32) {
    %c0_i32 = arith.constant 0 : i32
    %c0_i32_0 = arith.constant 0 : i32
    %c0_i32_1 = arith.constant 0 : i32
    return %c0_i32, %c0_i32_0 : i32, i32
  }
  func.func @transform_10(%arg0: i32) -> (i32, i32) {
    %c0_i32 = arith.constant 0 : i32
    %c0_i32_0 = arith.constant 0 : i32
    %c0_i32_1 = arith.constant 0 : i32
    return %c0_i32, %c0_i32_0 : i32, i32
  }
  func.func @transform_11(%arg0: i32) -> (i32, i32) {
    %c0_i32 = arith.constant 0 : i32
    %c0_i32_0 = arith.constant 0 : i32
    %c0_i32_1 = arith.constant 0 : i32
    return %c0_i32, %c0_i32_0 : i32, i32
  }
  func.func @transform_12(%arg0: i32) -> (i32, i32) {
    %c0_i32 = arith.constant 0 : i32
    %c0_i32_0 = arith.constant 0 : i32
    %c0_i32_1 = arith.constant 0 : i32
    return %c0_i32, %c0_i32_0 : i32, i32
  }
  func.func @transform_13(%arg0: i32) -> (i32, i32, i32) {
    %c0_i32 = arith.constant 0 : i32
    %c0_i32_0 = arith.constant 0 : i32
    %c0_i32_1 = arith.constant 0 : i32
    return %arg0, %c0_i32, %c0_i32_0 : i32, i32, i32
  }
}

module attributes {stable_mosaic.version = 11 : i64} {
  func.func @_bert_fusion_layer_kernel(%arg0: i32, %arg1: memref<1x8x32xf32, #tpu.memory_space<vmem>>, %arg2: memref<1x17x32xf32, #tpu.memory_space<vmem>>, %arg3: memref<1x1x8xf32, #tpu.memory_space<vmem>>, %arg4: memref<32x96xf32, #tpu.memory_space<vmem>>, %arg5: memref<1x96xf32, #tpu.memory_space<vmem>>, %arg6: memref<32x32xf32, #tpu.memory_space<vmem>>, %arg7: memref<1x32xf32, #tpu.memory_space<vmem>>, %arg8: memref<1x32xf32, #tpu.memory_space<vmem>>, %arg9: memref<1x32xf32, #tpu.memory_space<vmem>>, %arg10: memref<32x32xf32, #tpu.memory_space<vmem>>, %arg11: memref<1x32xf32, #tpu.memory_space<vmem>>, %arg12: memref<32x64xf32, #tpu.memory_space<vmem>>, %arg13: memref<1x64xf32, #tpu.memory_space<vmem>>, %arg14: memref<32x32xf32, #tpu.memory_space<vmem>>, %arg15: memref<1x32xf32, #tpu.memory_space<vmem>>, %arg16: memref<1x32xf32, #tpu.memory_space<vmem>>, %arg17: memref<1x32xf32, #tpu.memory_space<vmem>>, %arg18: memref<32x128xf32, #tpu.memory_space<vmem>>, %arg19: memref<1x128xf32, #tpu.memory_space<vmem>>, %arg20: memref<128x32xf32, #tpu.memory_space<vmem>>, %arg21: memref<1x32xf32, #tpu.memory_space<vmem>>, %arg22: memref<1x32xf32, #tpu.memory_space<vmem>>, %arg23: memref<1x32xf32, #tpu.memory_space<vmem>>, %arg24: memref<1x8x32xf32, #tpu.memory_space<vmem>>) attributes {dimension_semantics = [#tpu.dimension_semantics<parallel>], iteration_bounds = array<i64: 2>, scalar_prefetch = 0 : i64, scratch_operands = 0 : i64, tpu.core_type = #tpu.core_type<tc>, window_params = [{transform_indices = @transform_0, window_bounds = array<i64: 1, 8, 32>}, {transform_indices = @transform_1, window_bounds = array<i64: 1, 17, 32>}, {transform_indices = @transform_2, window_bounds = array<i64: 1, 1, 8>}, {pipeline_mode = #tpu.pipeline_mode<synchronous>, transform_indices = @transform_3, window_bounds = array<i64: 32, 96>}, {pipeline_mode = #tpu.pipeline_mode<synchronous>, transform_indices = @transform_4, window_bounds = array<i64: 1, 96>}, {pipeline_mode = #tpu.pipeline_mode<synchronous>, transform_indices = @transform_5, window_bounds = array<i64: 32, 32>}, {pipeline_mode = #tpu.pipeline_mode<synchronous>, transform_indices = @transform_6, window_bounds = array<i64: 1, 32>}, {pipeline_mode = #tpu.pipeline_mode<synchronous>, transform_indices = @transform_7, window_bounds = array<i64: 1, 32>}, {pipeline_mode = #tpu.pipeline_mode<synchronous>, transform_indices = @transform_8, window_bounds = array<i64: 1, 32>}, {pipeline_mode = #tpu.pipeline_mode<synchronous>, transform_indices = @transform_9, window_bounds = array<i64: 32, 32>}, {pipeline_mode = #tpu.pipeline_mode<synchronous>, transform_indices = @transform_10, window_bounds = array<i64: 1, 32>}, {pipeline_mode = #tpu.pipeline_mode<synchronous>, transform_indices = @transform_11, window_bounds = array<i64: 32, 64>}, {pipeline_mode = #tpu.pipeline_mode<synchronous>, transform_indices = @transform_12, window_bounds = array<i64: 1, 64>}, {pipeline_mode = #tpu.pipeline_mode<synchronous>, transform_indices = @transform_13, window_bounds = array<i64: 32, 32>}, {pipeline_mode = #tpu.pipeline_mode<synchronous>, transform_indices = @transform_14, window_bounds = array<i64: 1, 32>}, {pipeline_mode = #tpu.pipeline_mode<synchronous>, transform_indices = @transform_15, window_bounds = array<i64: 1, 32>}, {pipeline_mode = #tpu.pipeline_mode<synchronous>, transform_indices = @transform_16, window_bounds = array<i64: 1, 32>}, {pipeline_mode = #tpu.pipeline_mode<synchronous>, transform_indices = @transform_17, window_bounds = array<i64: 32, 128>}, {pipeline_mode = #tpu.pipeline_mode<synchronous>, transform_indices = @transform_18, window_bounds = array<i64: 1, 128>}, {pipeline_mode = #tpu.pipeline_mode<synchronous>, transform_indices = @transform_19, window_bounds = array<i64: 128, 32>}, {pipeline_mode = #tpu.pipeline_mode<synchronous>, transform_indices = @transform_20, window_bounds = array<i64: 1, 32>}, {pipeline_mode = #tpu.pipeline_mode<synchronous>, transform_indices = @transform_21, window_bounds = array<i64: 1, 32>}, {pipeline_mode = #tpu.pipeline_mode<synchronous>, transform_indices = @transform_22, window_bounds = array<i64: 1, 32>}, {transform_indices = @transform_23, window_bounds = array<i64: 1, 8, 32>}]} {
    %c0 = arith.constant 0 : index
    %c0_0 = arith.constant 0 : index
    %c0_1 = arith.constant 0 : index
    %0 = vector.load %arg1[%c0, %c0_0, %c0_1] : memref<1x8x32xf32, #tpu.memory_space<vmem>>, vector<1x8x32xf32>
    %1 = vector.shape_cast %0 : vector<1x8x32xf32> to vector<8x32xf32>
    %c0_2 = arith.constant 0 : index
    %c0_3 = arith.constant 0 : index
    %c0_4 = arith.constant 0 : index
    %2 = vector.load %arg2[%c0_2, %c0_3, %c0_4] : memref<1x17x32xf32, #tpu.memory_space<vmem>>, vector<1x17x32xf32>
    %3 = vector.shape_cast %2 : vector<1x17x32xf32> to vector<17x32xf32>
    %c0_5 = arith.constant 0 : index
    %c0_6 = arith.constant 0 : index
    %c0_7 = arith.constant 0 : index
    %4 = vector.load %arg3[%c0_5, %c0_6, %c0_7] : memref<1x1x8xf32, #tpu.memory_space<vmem>>, vector<1x1x8xf32>
    %5 = vector.shape_cast %4 : vector<1x1x8xf32> to vector<1x8xf32>
    %c0_8 = arith.constant 0 : index
    %c0_9 = arith.constant 0 : index
    %6 = vector.load %arg4[%c0_8, %c0_9] : memref<32x96xf32, #tpu.memory_space<vmem>>, vector<32x96xf32>
    %c0_10 = arith.constant 0 : index
    %c0_11 = arith.constant 0 : index
    %7 = vector.load %arg5[%c0_10, %c0_11] : memref<1x96xf32, #tpu.memory_space<vmem>>, vector<1x96xf32>
    %8 = arith.truncf %1 : vector<8x32xf32> to vector<8x32xbf16>
    %9 = arith.truncf %6 : vector<32x96xf32> to vector<32x96xbf16>
    %cst = arith.constant dense<0.000000e+00> : vector<8x96xf32>
    %10 = tpu.matmul %8, %9, %cst {dimension_numbers = #tpu.dot_dimension_numbers<[1], [0], [0], [1], [0, 0, 1, 1], [], []>} : vector<8x32xbf16>, vector<32x96xbf16>, vector<8x96xf32> -> vector<8x96xf32>
    %11 = vector.broadcast %7 : vector<1x96xf32> to vector<8x96xf32>
    %12 = arith.addf %10, %11 : vector<8x96xf32>
    %13 = vector.extract_strided_slice %12 {offsets = [0, 0], sizes = [8, 32], strides = [1, 1]} : vector<8x96xf32> to vector<8x32xf32>
    %14 = vector.extract_strided_slice %12 {offsets = [0, 32], sizes = [8, 32], strides = [1, 1]} : vector<8x96xf32> to vector<8x32xf32>
    %15 = vector.extract_strided_slice %12 {offsets = [0, 64], sizes = [8, 32], strides = [1, 1]} : vector<8x96xf32> to vector<8x32xf32>
    %16 = vector.extract_strided_slice %13 {offsets = [0, 0], sizes = [8, 16], strides = [1, 1]} : vector<8x32xf32> to vector<8x16xf32>
    %17 = arith.truncf %16 : vector<8x16xf32> to vector<8x16xbf16>
    %18 = vector.extract_strided_slice %14 {offsets = [0, 0], sizes = [8, 16], strides = [1, 1]} : vector<8x32xf32> to vector<8x16xf32>
    %19 = arith.truncf %18 : vector<8x16xf32> to vector<8x16xbf16>
    %20 = vector.extract_strided_slice %15 {offsets = [0, 0], sizes = [8, 16], strides = [1, 1]} : vector<8x32xf32> to vector<8x16xf32>
    %21 = arith.truncf %20 : vector<8x16xf32> to vector<8x16xbf16>
    %cst_12 = arith.constant dense<0.000000e+00> : vector<8x8xf32>
    %22 = tpu.matmul %17, %19, %cst_12 {dimension_numbers = #tpu.dot_dimension_numbers<[1], [1], [0], [0], [0, 0, 1, 0], [], []>} : vector<8x16xbf16>, vector<8x16xbf16>, vector<8x8xf32> -> vector<8x8xf32>
    %cst_13 = arith.constant 2.500000e-01 : f32
    %23 = vector.broadcast %cst_13 : f32 to vector<8x8xf32>
    %24 = arith.mulf %22, %23 : vector<8x8xf32>
    %25 = vector.broadcast %5 : vector<1x8xf32> to vector<8x8xf32>
    %26 = arith.addf %24, %25 : vector<8x8xf32>
    %cst_14 = arith.constant dense<0xFF800000> : vector<8xf32>
    %27 = vector.multi_reduction <maximumf>, %26, %cst_14 [1] : vector<8x8xf32> to vector<8xf32>
    %28 = vector.shape_cast %27 : vector<8xf32> to vector<8x1xf32>
    %29 = vector.broadcast %28 : vector<8x1xf32> to vector<8x8xf32>
    %30 = arith.subf %26, %29 : vector<8x8xf32>
    %31 = math.exp %30 : vector<8x8xf32>
    %cst_15 = arith.constant dense<0.000000e+00> : vector<8xf32>
    %32 = vector.multi_reduction <add>, %31, %cst_15 [1] : vector<8x8xf32> to vector<8xf32>
    %33 = vector.shape_cast %32 : vector<8xf32> to vector<8x1xf32>
    %34 = tpu.reciprocal %33 {approx = true} : vector<8x1xf32> -> vector<8x1xf32>
    %35 = vector.broadcast %34 : vector<8x1xf32> to vector<8x8xf32>
    %36 = arith.mulf %31, %35 : vector<8x8xf32>
    %37 = arith.truncf %36 : vector<8x8xf32> to vector<8x8xbf16>
    %cst_16 = arith.constant dense<0.000000e+00> : vector<8x16xf32>
    %38 = tpu.matmul %37, %21, %cst_16 {dimension_numbers = #tpu.dot_dimension_numbers<[1], [0], [0], [1], [0, 0, 1, 1], [], []>} : vector<8x8xbf16>, vector<8x16xbf16>, vector<8x16xf32> -> vector<8x16xf32>
    %39 = vector.extract_strided_slice %13 {offsets = [0, 16], sizes = [8, 16], strides = [1, 1]} : vector<8x32xf32> to vector<8x16xf32>
    %40 = arith.truncf %39 : vector<8x16xf32> to vector<8x16xbf16>
    %41 = vector.extract_strided_slice %14 {offsets = [0, 16], sizes = [8, 16], strides = [1, 1]} : vector<8x32xf32> to vector<8x16xf32>
    %42 = arith.truncf %41 : vector<8x16xf32> to vector<8x16xbf16>
    %43 = vector.extract_strided_slice %15 {offsets = [0, 16], sizes = [8, 16], strides = [1, 1]} : vector<8x32xf32> to vector<8x16xf32>
    %44 = arith.truncf %43 : vector<8x16xf32> to vector<8x16xbf16>
    %cst_17 = arith.constant dense<0.000000e+00> : vector<8x8xf32>
    %45 = tpu.matmul %40, %42, %cst_17 {dimension_numbers = #tpu.dot_dimension_numbers<[1], [1], [0], [0], [0, 0, 1, 0], [], []>} : vector<8x16xbf16>, vector<8x16xbf16>, vector<8x8xf32> -> vector<8x8xf32>
    %cst_18 = arith.constant 2.500000e-01 : f32
    %46 = vector.broadcast %cst_18 : f32 to vector<8x8xf32>
    %47 = arith.mulf %45, %46 : vector<8x8xf32>
    %48 = vector.broadcast %5 : vector<1x8xf32> to vector<8x8xf32>
    %49 = arith.addf %47, %48 : vector<8x8xf32>
    %cst_19 = arith.constant dense<0xFF800000> : vector<8xf32>
    %50 = vector.multi_reduction <maximumf>, %49, %cst_19 [1] : vector<8x8xf32> to vector<8xf32>
    %51 = vector.shape_cast %50 : vector<8xf32> to vector<8x1xf32>
    %52 = vector.broadcast %51 : vector<8x1xf32> to vector<8x8xf32>
    %53 = arith.subf %49, %52 : vector<8x8xf32>
    %54 = math.exp %53 : vector<8x8xf32>
    %cst_20 = arith.constant dense<0.000000e+00> : vector<8xf32>
    %55 = vector.multi_reduction <add>, %54, %cst_20 [1] : vector<8x8xf32> to vector<8xf32>
    %56 = vector.shape_cast %55 : vector<8xf32> to vector<8x1xf32>
    %57 = tpu.reciprocal %56 {approx = true} : vector<8x1xf32> -> vector<8x1xf32>
    %58 = vector.broadcast %57 : vector<8x1xf32> to vector<8x8xf32>
    %59 = arith.mulf %54, %58 : vector<8x8xf32>
    %60 = arith.truncf %59 : vector<8x8xf32> to vector<8x8xbf16>
    %cst_21 = arith.constant dense<0.000000e+00> : vector<8x16xf32>
    %61 = tpu.matmul %60, %44, %cst_21 {dimension_numbers = #tpu.dot_dimension_numbers<[1], [0], [0], [1], [0, 0, 1, 1], [], []>} : vector<8x8xbf16>, vector<8x16xbf16>, vector<8x16xf32> -> vector<8x16xf32>
    %62 = tpu.concatenate %38, %61 in 1 : vector<8x16xf32>, vector<8x16xf32> -> vector<8x32xf32>
    %c0_22 = arith.constant 0 : index
    %c0_23 = arith.constant 0 : index
    %63 = vector.load %arg6[%c0_22, %c0_23] : memref<32x32xf32, #tpu.memory_space<vmem>>, vector<32x32xf32>
    %c0_24 = arith.constant 0 : index
    %c0_25 = arith.constant 0 : index
    %64 = vector.load %arg7[%c0_24, %c0_25] : memref<1x32xf32, #tpu.memory_space<vmem>>, vector<1x32xf32>
    %65 = arith.truncf %62 : vector<8x32xf32> to vector<8x32xbf16>
    %66 = arith.truncf %63 : vector<32x32xf32> to vector<32x32xbf16>
    %cst_26 = arith.constant dense<0.000000e+00> : vector<8x32xf32>
    %67 = tpu.matmul %65, %66, %cst_26 {dimension_numbers = #tpu.dot_dimension_numbers<[1], [0], [0], [1], [0, 0, 1, 1], [], []>} : vector<8x32xbf16>, vector<32x32xbf16>, vector<8x32xf32> -> vector<8x32xf32>
    %68 = vector.broadcast %64 : vector<1x32xf32> to vector<8x32xf32>
    %69 = arith.addf %67, %68 : vector<8x32xf32>
    %70 = arith.addf %1, %69 : vector<8x32xf32>
    %c0_27 = arith.constant 0 : index
    %c0_28 = arith.constant 0 : index
    %71 = vector.load %arg8[%c0_27, %c0_28] : memref<1x32xf32, #tpu.memory_space<vmem>>, vector<1x32xf32>
    %c0_29 = arith.constant 0 : index
    %c0_30 = arith.constant 0 : index
    %72 = vector.load %arg9[%c0_29, %c0_30] : memref<1x32xf32, #tpu.memory_space<vmem>>, vector<1x32xf32>
    %cst_31 = arith.constant dense<0.000000e+00> : vector<8xf32>
    %73 = vector.multi_reduction <add>, %70, %cst_31 [1] : vector<8x32xf32> to vector<8xf32>
    %74 = vector.shape_cast %73 : vector<8xf32> to vector<8x1xf32>
    %cst_32 = arith.constant 3.200000e+01 : f32
    %75 = vector.broadcast %cst_32 : f32 to vector<8x1xf32>
    %76 = arith.divf %74, %75 : vector<8x1xf32>
    %77 = vector.broadcast %76 : vector<8x1xf32> to vector<8x32xf32>
    %78 = arith.subf %70, %77 : vector<8x32xf32>
    %79 = arith.mulf %78, %78 : vector<8x32xf32>
    %cst_33 = arith.constant dense<0.000000e+00> : vector<8xf32>
    %80 = vector.multi_reduction <add>, %79, %cst_33 [1] : vector<8x32xf32> to vector<8xf32>
    %81 = vector.shape_cast %80 : vector<8xf32> to vector<8x1xf32>
    %cst_34 = arith.constant 3.200000e+01 : f32
    %82 = vector.broadcast %cst_34 : f32 to vector<8x1xf32>
    %83 = arith.divf %81, %82 : vector<8x1xf32>
    %84 = vector.broadcast %76 : vector<8x1xf32> to vector<8x32xf32>
    %85 = arith.subf %70, %84 : vector<8x32xf32>
    %cst_35 = arith.constant 9.99999996E-13 : f32
    %86 = vector.broadcast %cst_35 : f32 to vector<8x1xf32>
    %87 = arith.addf %83, %86 : vector<8x1xf32>
    %88 = math.rsqrt %87 : vector<8x1xf32>
    %89 = vector.broadcast %88 : vector<8x1xf32> to vector<8x32xf32>
    %90 = arith.mulf %85, %89 : vector<8x32xf32>
    %91 = vector.broadcast %71 : vector<1x32xf32> to vector<8x32xf32>
    %92 = arith.mulf %90, %91 : vector<8x32xf32>
    %93 = vector.broadcast %72 : vector<1x32xf32> to vector<8x32xf32>
    %94 = arith.addf %92, %93 : vector<8x32xf32>
    %c0_36 = arith.constant 0 : index
    %c0_37 = arith.constant 0 : index
    %95 = vector.load %arg10[%c0_36, %c0_37] : memref<32x32xf32, #tpu.memory_space<vmem>>, vector<32x32xf32>
    %c0_38 = arith.constant 0 : index
    %c0_39 = arith.constant 0 : index
    %96 = vector.load %arg11[%c0_38, %c0_39] : memref<1x32xf32, #tpu.memory_space<vmem>>, vector<1x32xf32>
    %97 = arith.truncf %94 : vector<8x32xf32> to vector<8x32xbf16>
    %98 = arith.truncf %95 : vector<32x32xf32> to vector<32x32xbf16>
    %cst_40 = arith.constant dense<0.000000e+00> : vector<8x32xf32>
    %99 = tpu.matmul %97, %98, %cst_40 {dimension_numbers = #tpu.dot_dimension_numbers<[1], [0], [0], [1], [0, 0, 1, 1], [], []>} : vector<8x32xbf16>, vector<32x32xbf16>, vector<8x32xf32> -> vector<8x32xf32>
    %100 = vector.broadcast %96 : vector<1x32xf32> to vector<8x32xf32>
    %101 = arith.addf %99, %100 : vector<8x32xf32>
    %c0_41 = arith.constant 0 : index
    %c0_42 = arith.constant 0 : index
    %102 = vector.load %arg12[%c0_41, %c0_42] : memref<32x64xf32, #tpu.memory_space<vmem>>, vector<32x64xf32>
    %c0_43 = arith.constant 0 : index
    %c0_44 = arith.constant 0 : index
    %103 = vector.load %arg13[%c0_43, %c0_44] : memref<1x64xf32, #tpu.memory_space<vmem>>, vector<1x64xf32>
    %104 = arith.truncf %3 : vector<17x32xf32> to vector<17x32xbf16>
    %105 = arith.truncf %102 : vector<32x64xf32> to vector<32x64xbf16>
    %cst_45 = arith.constant dense<0.000000e+00> : vector<17x64xf32>
    %106 = tpu.matmul %104, %105, %cst_45 {dimension_numbers = #tpu.dot_dimension_numbers<[1], [0], [0], [1], [0, 0, 1, 1], [], []>} : vector<17x32xbf16>, vector<32x64xbf16>, vector<17x64xf32> -> vector<17x64xf32>
    %107 = vector.broadcast %103 : vector<1x64xf32> to vector<17x64xf32>
    %108 = arith.addf %106, %107 : vector<17x64xf32>
    %109 = vector.extract_strided_slice %108 {offsets = [0, 0], sizes = [17, 32], strides = [1, 1]} : vector<17x64xf32> to vector<17x32xf32>
    %110 = vector.extract_strided_slice %108 {offsets = [0, 32], sizes = [17, 32], strides = [1, 1]} : vector<17x64xf32> to vector<17x32xf32>
    %111 = vector.extract_strided_slice %101 {offsets = [0, 0], sizes = [8, 16], strides = [1, 1]} : vector<8x32xf32> to vector<8x16xf32>
    %112 = arith.truncf %111 : vector<8x16xf32> to vector<8x16xbf16>
    %113 = vector.extract_strided_slice %109 {offsets = [0, 0], sizes = [17, 16], strides = [1, 1]} : vector<17x32xf32> to vector<17x16xf32>
    %114 = arith.truncf %113 : vector<17x16xf32> to vector<17x16xbf16>
    %115 = vector.extract_strided_slice %110 {offsets = [0, 0], sizes = [17, 16], strides = [1, 1]} : vector<17x32xf32> to vector<17x16xf32>
    %116 = arith.truncf %115 : vector<17x16xf32> to vector<17x16xbf16>
    %cst_46 = arith.constant dense<0.000000e+00> : vector<8x17xf32>
    %117 = tpu.matmul %112, %114, %cst_46 {dimension_numbers = #tpu.dot_dimension_numbers<[1], [1], [0], [0], [0, 0, 1, 0], [], []>} : vector<8x16xbf16>, vector<17x16xbf16>, vector<8x17xf32> -> vector<8x17xf32>
    %cst_47 = arith.constant 2.500000e-01 : f32
    %118 = vector.broadcast %cst_47 : f32 to vector<8x17xf32>
    %119 = arith.mulf %117, %118 : vector<8x17xf32>
    %cst_48 = arith.constant dense<0xFF800000> : vector<8xf32>
    %120 = vector.multi_reduction <maximumf>, %119, %cst_48 [1] : vector<8x17xf32> to vector<8xf32>
    %121 = vector.shape_cast %120 : vector<8xf32> to vector<8x1xf32>
    %122 = vector.broadcast %121 : vector<8x1xf32> to vector<8x17xf32>
    %123 = arith.subf %119, %122 : vector<8x17xf32>
    %124 = math.exp %123 : vector<8x17xf32>
    %cst_49 = arith.constant dense<0.000000e+00> : vector<8xf32>
    %125 = vector.multi_reduction <add>, %124, %cst_49 [1] : vector<8x17xf32> to vector<8xf32>
    %126 = vector.shape_cast %125 : vector<8xf32> to vector<8x1xf32>
    %127 = tpu.reciprocal %126 {approx = true} : vector<8x1xf32> -> vector<8x1xf32>
    %128 = vector.broadcast %127 : vector<8x1xf32> to vector<8x17xf32>
    %129 = arith.mulf %124, %128 : vector<8x17xf32>
    %130 = arith.truncf %129 : vector<8x17xf32> to vector<8x17xbf16>
    %cst_50 = arith.constant dense<0.000000e+00> : vector<8x16xf32>
    %131 = tpu.matmul %130, %116, %cst_50 {dimension_numbers = #tpu.dot_dimension_numbers<[1], [0], [0], [1], [0, 0, 1, 1], [], []>} : vector<8x17xbf16>, vector<17x16xbf16>, vector<8x16xf32> -> vector<8x16xf32>
    %132 = vector.extract_strided_slice %101 {offsets = [0, 16], sizes = [8, 16], strides = [1, 1]} : vector<8x32xf32> to vector<8x16xf32>
    %133 = arith.truncf %132 : vector<8x16xf32> to vector<8x16xbf16>
    %134 = vector.extract_strided_slice %109 {offsets = [0, 16], sizes = [17, 16], strides = [1, 1]} : vector<17x32xf32> to vector<17x16xf32>
    %135 = arith.truncf %134 : vector<17x16xf32> to vector<17x16xbf16>
    %136 = vector.extract_strided_slice %110 {offsets = [0, 16], sizes = [17, 16], strides = [1, 1]} : vector<17x32xf32> to vector<17x16xf32>
    %137 = arith.truncf %136 : vector<17x16xf32> to vector<17x16xbf16>
    %cst_51 = arith.constant dense<0.000000e+00> : vector<8x17xf32>
    %138 = tpu.matmul %133, %135, %cst_51 {dimension_numbers = #tpu.dot_dimension_numbers<[1], [1], [0], [0], [0, 0, 1, 0], [], []>} : vector<8x16xbf16>, vector<17x16xbf16>, vector<8x17xf32> -> vector<8x17xf32>
    %cst_52 = arith.constant 2.500000e-01 : f32
    %139 = vector.broadcast %cst_52 : f32 to vector<8x17xf32>
    %140 = arith.mulf %138, %139 : vector<8x17xf32>
    %cst_53 = arith.constant dense<0xFF800000> : vector<8xf32>
    %141 = vector.multi_reduction <maximumf>, %140, %cst_53 [1] : vector<8x17xf32> to vector<8xf32>
    %142 = vector.shape_cast %141 : vector<8xf32> to vector<8x1xf32>
    %143 = vector.broadcast %142 : vector<8x1xf32> to vector<8x17xf32>
    %144 = arith.subf %140, %143 : vector<8x17xf32>
    %145 = math.exp %144 : vector<8x17xf32>
    %cst_54 = arith.constant dense<0.000000e+00> : vector<8xf32>
    %146 = vector.multi_reduction <add>, %145, %cst_54 [1] : vector<8x17xf32> to vector<8xf32>
    %147 = vector.shape_cast %146 : vector<8xf32> to vector<8x1xf32>
    %148 = tpu.reciprocal %147 {approx = true} : vector<8x1xf32> -> vector<8x1xf32>
    %149 = vector.broadcast %148 : vector<8x1xf32> to vector<8x17xf32>
    %150 = arith.mulf %145, %149 : vector<8x17xf32>
    %151 = arith.truncf %150 : vector<8x17xf32> to vector<8x17xbf16>
    %cst_55 = arith.constant dense<0.000000e+00> : vector<8x16xf32>
    %152 = tpu.matmul %151, %137, %cst_55 {dimension_numbers = #tpu.dot_dimension_numbers<[1], [0], [0], [1], [0, 0, 1, 1], [], []>} : vector<8x17xbf16>, vector<17x16xbf16>, vector<8x16xf32> -> vector<8x16xf32>
    %153 = tpu.concatenate %131, %152 in 1 : vector<8x16xf32>, vector<8x16xf32> -> vector<8x32xf32>
    %c0_56 = arith.constant 0 : index
    %c0_57 = arith.constant 0 : index
    %154 = vector.load %arg14[%c0_56, %c0_57] : memref<32x32xf32, #tpu.memory_space<vmem>>, vector<32x32xf32>
    %c0_58 = arith.constant 0 : index
    %c0_59 = arith.constant 0 : index
    %155 = vector.load %arg15[%c0_58, %c0_59] : memref<1x32xf32, #tpu.memory_space<vmem>>, vector<1x32xf32>
    %156 = arith.truncf %153 : vector<8x32xf32> to vector<8x32xbf16>
    %157 = arith.truncf %154 : vector<32x32xf32> to vector<32x32xbf16>
    %cst_60 = arith.constant dense<0.000000e+00> : vector<8x32xf32>
    %158 = tpu.matmul %156, %157, %cst_60 {dimension_numbers = #tpu.dot_dimension_numbers<[1], [0], [0], [1], [0, 0, 1, 1], [], []>} : vector<8x32xbf16>, vector<32x32xbf16>, vector<8x32xf32> -> vector<8x32xf32>
    %159 = vector.broadcast %155 : vector<1x32xf32> to vector<8x32xf32>
    %160 = arith.addf %158, %159 : vector<8x32xf32>
    %161 = arith.addf %94, %160 : vector<8x32xf32>
    %c0_61 = arith.constant 0 : index
    %c0_62 = arith.constant 0 : index
    %162 = vector.load %arg16[%c0_61, %c0_62] : memref<1x32xf32, #tpu.memory_space<vmem>>, vector<1x32xf32>
    %c0_63 = arith.constant 0 : index
    %c0_64 = arith.constant 0 : index
    %163 = vector.load %arg17[%c0_63, %c0_64] : memref<1x32xf32, #tpu.memory_space<vmem>>, vector<1x32xf32>
    %cst_65 = arith.constant dense<0.000000e+00> : vector<8xf32>
    %164 = vector.multi_reduction <add>, %161, %cst_65 [1] : vector<8x32xf32> to vector<8xf32>
    %165 = vector.shape_cast %164 : vector<8xf32> to vector<8x1xf32>
    %cst_66 = arith.constant 3.200000e+01 : f32
    %166 = vector.broadcast %cst_66 : f32 to vector<8x1xf32>
    %167 = arith.divf %165, %166 : vector<8x1xf32>
    %168 = vector.broadcast %167 : vector<8x1xf32> to vector<8x32xf32>
    %169 = arith.subf %161, %168 : vector<8x32xf32>
    %170 = arith.mulf %169, %169 : vector<8x32xf32>
    %cst_67 = arith.constant dense<0.000000e+00> : vector<8xf32>
    %171 = vector.multi_reduction <add>, %170, %cst_67 [1] : vector<8x32xf32> to vector<8xf32>
    %172 = vector.shape_cast %171 : vector<8xf32> to vector<8x1xf32>
    %cst_68 = arith.constant 3.200000e+01 : f32
    %173 = vector.broadcast %cst_68 : f32 to vector<8x1xf32>
    %174 = arith.divf %172, %173 : vector<8x1xf32>
    %175 = vector.broadcast %167 : vector<8x1xf32> to vector<8x32xf32>
    %176 = arith.subf %161, %175 : vector<8x32xf32>
    %cst_69 = arith.constant 9.99999996E-13 : f32
    %177 = vector.broadcast %cst_69 : f32 to vector<8x1xf32>
    %178 = arith.addf %174, %177 : vector<8x1xf32>
    %179 = math.rsqrt %178 : vector<8x1xf32>
    %180 = vector.broadcast %179 : vector<8x1xf32> to vector<8x32xf32>
    %181 = arith.mulf %176, %180 : vector<8x32xf32>
    %182 = vector.broadcast %162 : vector<1x32xf32> to vector<8x32xf32>
    %183 = arith.mulf %181, %182 : vector<8x32xf32>
    %184 = vector.broadcast %163 : vector<1x32xf32> to vector<8x32xf32>
    %185 = arith.addf %183, %184 : vector<8x32xf32>
    %c0_70 = arith.constant 0 : index
    %c0_71 = arith.constant 0 : index
    %186 = vector.load %arg18[%c0_70, %c0_71] : memref<32x128xf32, #tpu.memory_space<vmem>>, vector<32x128xf32>
    %c0_72 = arith.constant 0 : index
    %c0_73 = arith.constant 0 : index
    %187 = vector.load %arg19[%c0_72, %c0_73] : memref<1x128xf32, #tpu.memory_space<vmem>>, vector<1x128xf32>
    %188 = arith.truncf %185 : vector<8x32xf32> to vector<8x32xbf16>
    %189 = arith.truncf %186 : vector<32x128xf32> to vector<32x128xbf16>
    %cst_74 = arith.constant dense<0.000000e+00> : vector<8x128xf32>
    %190 = tpu.matmul %188, %189, %cst_74 {dimension_numbers = #tpu.dot_dimension_numbers<[1], [0], [0], [1], [0, 0, 1, 1], [], []>} : vector<8x32xbf16>, vector<32x128xbf16>, vector<8x128xf32> -> vector<8x128xf32>
    %191 = vector.broadcast %187 : vector<1x128xf32> to vector<8x128xf32>
    %192 = arith.addf %190, %191 : vector<8x128xf32>
    %193 = arith.mulf %192, %192 : vector<8x128xf32>
    %194 = arith.mulf %192, %193 : vector<8x128xf32>
    %cst_75 = arith.constant 4.471500e-02 : f32
    %195 = vector.broadcast %cst_75 : f32 to vector<8x128xf32>
    %196 = arith.mulf %195, %194 : vector<8x128xf32>
    %197 = arith.addf %192, %196 : vector<8x128xf32>
    %cst_76 = arith.constant 0.797884583 : f32
    %198 = vector.broadcast %cst_76 : f32 to vector<8x128xf32>
    %199 = arith.mulf %198, %197 : vector<8x128xf32>
    %200 = math.tanh %199 : vector<8x128xf32>
    %cst_77 = arith.constant 1.000000e+00 : f32
    %201 = vector.broadcast %cst_77 : f32 to vector<8x128xf32>
    %202 = arith.addf %201, %200 : vector<8x128xf32>
    %cst_78 = arith.constant 5.000000e-01 : f32
    %203 = vector.broadcast %cst_78 : f32 to vector<8x128xf32>
    %204 = arith.mulf %203, %202 : vector<8x128xf32>
    %205 = arith.mulf %192, %204 : vector<8x128xf32>
    %c0_79 = arith.constant 0 : index
    %c0_80 = arith.constant 0 : index
    %206 = vector.load %arg20[%c0_79, %c0_80] : memref<128x32xf32, #tpu.memory_space<vmem>>, vector<128x32xf32>
    %c0_81 = arith.constant 0 : index
    %c0_82 = arith.constant 0 : index
    %207 = vector.load %arg21[%c0_81, %c0_82] : memref<1x32xf32, #tpu.memory_space<vmem>>, vector<1x32xf32>
    %208 = arith.truncf %205 : vector<8x128xf32> to vector<8x128xbf16>
    %209 = arith.truncf %206 : vector<128x32xf32> to vector<128x32xbf16>
    %cst_83 = arith.constant dense<0.000000e+00> : vector<8x32xf32>
    %210 = tpu.matmul %208, %209, %cst_83 {dimension_numbers = #tpu.dot_dimension_numbers<[1], [0], [0], [1], [0, 0, 1, 1], [], []>} : vector<8x128xbf16>, vector<128x32xbf16>, vector<8x32xf32> -> vector<8x32xf32>
    %211 = vector.broadcast %207 : vector<1x32xf32> to vector<8x32xf32>
    %212 = arith.addf %210, %211 : vector<8x32xf32>
    %213 = arith.addf %185, %212 : vector<8x32xf32>
    %c0_84 = arith.constant 0 : index
    %c0_85 = arith.constant 0 : index
    %214 = vector.load %arg22[%c0_84, %c0_85] : memref<1x32xf32, #tpu.memory_space<vmem>>, vector<1x32xf32>
    %c0_86 = arith.constant 0 : index
    %c0_87 = arith.constant 0 : index
    %215 = vector.load %arg23[%c0_86, %c0_87] : memref<1x32xf32, #tpu.memory_space<vmem>>, vector<1x32xf32>
    %cst_88 = arith.constant dense<0.000000e+00> : vector<8xf32>
    %216 = vector.multi_reduction <add>, %213, %cst_88 [1] : vector<8x32xf32> to vector<8xf32>
    %217 = vector.shape_cast %216 : vector<8xf32> to vector<8x1xf32>
    %cst_89 = arith.constant 3.200000e+01 : f32
    %218 = vector.broadcast %cst_89 : f32 to vector<8x1xf32>
    %219 = arith.divf %217, %218 : vector<8x1xf32>
    %220 = vector.broadcast %219 : vector<8x1xf32> to vector<8x32xf32>
    %221 = arith.subf %213, %220 : vector<8x32xf32>
    %222 = arith.mulf %221, %221 : vector<8x32xf32>
    %cst_90 = arith.constant dense<0.000000e+00> : vector<8xf32>
    %223 = vector.multi_reduction <add>, %222, %cst_90 [1] : vector<8x32xf32> to vector<8xf32>
    %224 = vector.shape_cast %223 : vector<8xf32> to vector<8x1xf32>
    %cst_91 = arith.constant 3.200000e+01 : f32
    %225 = vector.broadcast %cst_91 : f32 to vector<8x1xf32>
    %226 = arith.divf %224, %225 : vector<8x1xf32>
    %227 = vector.broadcast %219 : vector<8x1xf32> to vector<8x32xf32>
    %228 = arith.subf %213, %227 : vector<8x32xf32>
    %cst_92 = arith.constant 9.99999996E-13 : f32
    %229 = vector.broadcast %cst_92 : f32 to vector<8x1xf32>
    %230 = arith.addf %226, %229 : vector<8x1xf32>
    %231 = math.rsqrt %230 : vector<8x1xf32>
    %232 = vector.broadcast %231 : vector<8x1xf32> to vector<8x32xf32>
    %233 = arith.mulf %228, %232 : vector<8x32xf32>
    %234 = vector.broadcast %214 : vector<1x32xf32> to vector<8x32xf32>
    %235 = arith.mulf %233, %234 : vector<8x32xf32>
    %236 = vector.broadcast %215 : vector<1x32xf32> to vector<8x32xf32>
    %237 = arith.addf %235, %236 : vector<8x32xf32>
    %c0_93 = arith.constant 0 : index
    %c0_94 = arith.constant 0 : index
    %c0_95 = arith.constant 0 : index
    %238 = vector.load %arg24[%c0_93, %c0_94, %c0_95] : memref<1x8x32xf32, #tpu.memory_space<vmem>>, vector<1x8x32xf32>
    %239 = vector.shape_cast %238 : vector<1x8x32xf32> to vector<8x32xf32>
    %240 = vector.shape_cast %237 : vector<8x32xf32> to vector<1x8x32xf32>
    tpu.vector_store %arg24[%c0_93, %c0_94, %c0_95], %240 {strides = array<i32>} : memref<1x8x32xf32, #tpu.memory_space<vmem>>, vector<1x8x32xf32>,
    return
  }
  func.func @transform_0(%arg0: i32) -> (i32, i32, i32) {
    %c0_i32 = arith.constant 0 : i32
    %c0_i32_0 = arith.constant 0 : i32
    %c0_i32_1 = arith.constant 0 : i32
    return %arg0, %c0_i32, %c0_i32_0 : i32, i32, i32
  }
  func.func @transform_1(%arg0: i32) -> (i32, i32, i32) {
    %c0_i32 = arith.constant 0 : i32
    %c0_i32_0 = arith.constant 0 : i32
    %c0_i32_1 = arith.constant 0 : i32
    return %arg0, %c0_i32, %c0_i32_0 : i32, i32, i32
  }
  func.func @transform_2(%arg0: i32) -> (i32, i32, i32) {
    %c0_i32 = arith.constant 0 : i32
    %c0_i32_0 = arith.constant 0 : i32
    %c0_i32_1 = arith.constant 0 : i32
    return %arg0, %c0_i32, %c0_i32_0 : i32, i32, i32
  }
  func.func @transform_3(%arg0: i32) -> (i32, i32) {
    %c0_i32 = arith.constant 0 : i32
    %c0_i32_0 = arith.constant 0 : i32
    %c0_i32_1 = arith.constant 0 : i32
    return %c0_i32, %c0_i32_0 : i32, i32
  }
  func.func @transform_4(%arg0: i32) -> (i32, i32) {
    %c0_i32 = arith.constant 0 : i32
    %c0_i32_0 = arith.constant 0 : i32
    %c0_i32_1 = arith.constant 0 : i32
    return %c0_i32, %c0_i32_0 : i32, i32
  }
  func.func @transform_5(%arg0: i32) -> (i32, i32) {
    %c0_i32 = arith.constant 0 : i32
    %c0_i32_0 = arith.constant 0 : i32
    %c0_i32_1 = arith.constant 0 : i32
    return %c0_i32, %c0_i32_0 : i32, i32
  }
  func.func @transform_6(%arg0: i32) -> (i32, i32) {
    %c0_i32 = arith.constant 0 : i32
    %c0_i32_0 = arith.constant 0 : i32
    %c0_i32_1 = arith.constant 0 : i32
    return %c0_i32, %c0_i32_0 : i32, i32
  }
  func.func @transform_7(%arg0: i32) -> (i32, i32) {
    %c0_i32 = arith.constant 0 : i32
    %c0_i32_0 = arith.constant 0 : i32
    %c0_i32_1 = arith.constant 0 : i32
    return %c0_i32, %c0_i32_0 : i32, i32
  }
  func.func @transform_8(%arg0: i32) -> (i32, i32) {
    %c0_i32 = arith.constant 0 : i32
    %c0_i32_0 = arith.constant 0 : i32
    %c0_i32_1 = arith.constant 0 : i32
    return %c0_i32, %c0_i32_0 : i32, i32
  }
  func.func @transform_9(%arg0: i32) -> (i32, i32) {
    %c0_i32 = arith.constant 0 : i32
    %c0_i32_0 = arith.constant 0 : i32
    %c0_i32_1 = arith.constant 0 : i32
    return %c0_i32, %c0_i32_0 : i32, i32
  }
  func.func @transform_10(%arg0: i32) -> (i32, i32) {
    %c0_i32 = arith.constant 0 : i32
    %c0_i32_0 = arith.constant 0 : i32
    %c0_i32_1 = arith.constant 0 : i32
    return %c0_i32, %c0_i32_0 : i32, i32
  }
  func.func @transform_11(%arg0: i32) -> (i32, i32) {
    %c0_i32 = arith.constant 0 : i32
    %c0_i32_0 = arith.constant 0 : i32
    %c0_i32_1 = arith.constant 0 : i32
    return %c0_i32, %c0_i32_0 : i32, i32
  }
  func.func @transform_12(%arg0: i32) -> (i32, i32) {
    %c0_i32 = arith.constant 0 : i32
    %c0_i32_0 = arith.constant 0 : i32
    %c0_i32_1 = arith.constant 0 : i32
    return %c0_i32, %c0_i32_0 : i32, i32
  }
  func.func @transform_13(%arg0: i32) -> (i32, i32) {
    %c0_i32 = arith.constant 0 : i32
    %c0_i32_0 = arith.constant 0 : i32
    %c0_i32_1 = arith.constant 0 : i32
    return %c0_i32, %c0_i32_0 : i32, i32
  }
  func.func @transform_14(%arg0: i32) -> (i32, i32) {
    %c0_i32 = arith.constant 0 : i32
    %c0_i32_0 = arith.constant 0 : i32
    %c0_i32_1 = arith.constant 0 : i32
    return %c0_i32, %c0_i32_0 : i32, i32
  }
  func.func @transform_15(%arg0: i32) -> (i32, i32) {
    %c0_i32 = arith.constant 0 : i32
    %c0_i32_0 = arith.constant 0 : i32
    %c0_i32_1 = arith.constant 0 : i32
    return %c0_i32, %c0_i32_0 : i32, i32
  }
  func.func @transform_16(%arg0: i32) -> (i32, i32) {
    %c0_i32 = arith.constant 0 : i32
    %c0_i32_0 = arith.constant 0 : i32
    %c0_i32_1 = arith.constant 0 : i32
    return %c0_i32, %c0_i32_0 : i32, i32
  }
  func.func @transform_17(%arg0: i32) -> (i32, i32) {
    %c0_i32 = arith.constant 0 : i32
    %c0_i32_0 = arith.constant 0 : i32
    %c0_i32_1 = arith.constant 0 : i32
    return %c0_i32, %c0_i32_0 : i32, i32
  }
  func.func @transform_18(%arg0: i32) -> (i32, i32) {
    %c0_i32 = arith.constant 0 : i32
    %c0_i32_0 = arith.constant 0 : i32
    %c0_i32_1 = arith.constant 0 : i32
    return %c0_i32, %c0_i32_0 : i32, i32
  }
  func.func @transform_19(%arg0: i32) -> (i32, i32) {
    %c0_i32 = arith.constant 0 : i32
    %c0_i32_0 = arith.constant 0 : i32
    %c0_i32_1 = arith.constant 0 : i32
    return %c0_i32, %c0_i32_0 : i32, i32
  }
  func.func @transform_20(%arg0: i32) -> (i32, i32) {
    %c0_i32 = arith.constant 0 : i32
    %c0_i32_0 = arith.constant 0 : i32
    %c0_i32_1 = arith.constant 0 : i32
    return %c0_i32, %c0_i32_0 : i32, i32
  }
  func.func @transform_21(%arg0: i32) -> (i32, i32) {
    %c0_i32 = arith.constant 0 : i32
    %c0_i32_0 = arith.constant 0 : i32
    %c0_i32_1 = arith.constant 0 : i32
    return %c0_i32, %c0_i32_0 : i32, i32
  }
  func.func @transform_22(%arg0: i32) -> (i32, i32) {
    %c0_i32 = arith.constant 0 : i32
    %c0_i32_0 = arith.constant 0 : i32
    %c0_i32_1 = arith.constant 0 : i32
    return %c0_i32, %c0_i32_0 : i32, i32
  }
  func.func @transform_23(%arg0: i32) -> (i32, i32, i32) {
    %c0_i32 = arith.constant 0 : i32
    %c0_i32_0 = arith.constant 0 : i32
    %c0_i32_1 = arith.constant 0 : i32
    return %arg0, %c0_i32, %c0_i32_0 : i32, i32, i32
  }
}

module attributes {stable_mosaic.version = 11 : i64} {
  func.func @_cate_head_kernel(%arg0: memref<2x32xf32, #tpu.memory_space<vmem>>, %arg1: memref<32x32xf32, #tpu.memory_space<vmem>>, %arg2: memref<1x32xf32, #tpu.memory_space<vmem>>, %arg3: memref<1x32xf32, #tpu.memory_space<vmem>>, %arg4: memref<1x32xf32, #tpu.memory_space<vmem>>, %arg5: memref<32x5xf32, #tpu.memory_space<vmem>>, %arg6: memref<1x5xf32, #tpu.memory_space<vmem>>, %arg7: memref<2x5xf32, #tpu.memory_space<vmem>>) attributes {dimension_semantics = [], scalar_prefetch = 0 : i64, scratch_operands = 0 : i64, tpu.core_type = #tpu.core_type<tc>} {
    %c0 = arith.constant 0 : index
    %c0_0 = arith.constant 0 : index
    %0 = vector.load %arg0[%c0, %c0_0] : memref<2x32xf32, #tpu.memory_space<vmem>>, vector<2x32xf32>
    %c0_1 = arith.constant 0 : index
    %c0_2 = arith.constant 0 : index
    %1 = vector.load %arg1[%c0_1, %c0_2] : memref<32x32xf32, #tpu.memory_space<vmem>>, vector<32x32xf32>
    %c0_3 = arith.constant 0 : index
    %c0_4 = arith.constant 0 : index
    %2 = vector.load %arg2[%c0_3, %c0_4] : memref<1x32xf32, #tpu.memory_space<vmem>>, vector<1x32xf32>
    %3 = arith.truncf %0 : vector<2x32xf32> to vector<2x32xbf16>
    %4 = arith.truncf %1 : vector<32x32xf32> to vector<32x32xbf16>
    %cst = arith.constant dense<0.000000e+00> : vector<2x32xf32>
    %5 = tpu.matmul %3, %4, %cst {dimension_numbers = #tpu.dot_dimension_numbers<[1], [0], [0], [1], [0, 0, 1, 1], [], []>} : vector<2x32xbf16>, vector<32x32xbf16>, vector<2x32xf32> -> vector<2x32xf32>
    %6 = vector.broadcast %2 : vector<1x32xf32> to vector<2x32xf32>
    %7 = arith.addf %5, %6 : vector<2x32xf32>
    %c0_5 = arith.constant 0 : index
    %c0_6 = arith.constant 0 : index
    %8 = vector.load %arg3[%c0_5, %c0_6] : memref<1x32xf32, #tpu.memory_space<vmem>>, vector<1x32xf32>
    %c0_7 = arith.constant 0 : index
    %c0_8 = arith.constant 0 : index
    %9 = vector.load %arg4[%c0_7, %c0_8] : memref<1x32xf32, #tpu.memory_space<vmem>>, vector<1x32xf32>
    %cst_9 = arith.constant dense<0.000000e+00> : vector<2xf32>
    %10 = vector.multi_reduction <add>, %7, %cst_9 [1] : vector<2x32xf32> to vector<2xf32>
    %11 = vector.shape_cast %10 : vector<2xf32> to vector<2x1xf32>
    %cst_10 = arith.constant 3.200000e+01 : f32
    %12 = vector.broadcast %cst_10 : f32 to vector<2x1xf32>
    %13 = arith.divf %11, %12 : vector<2x1xf32>
    %14 = vector.broadcast %13 : vector<2x1xf32> to vector<2x32xf32>
    %15 = arith.subf %7, %14 : vector<2x32xf32>
    %16 = arith.mulf %15, %15 : vector<2x32xf32>
    %cst_11 = arith.constant dense<0.000000e+00> : vector<2xf32>
    %17 = vector.multi_reduction <add>, %16, %cst_11 [1] : vector<2x32xf32> to vector<2xf32>
    %18 = vector.shape_cast %17 : vector<2xf32> to vector<2x1xf32>
    %cst_12 = arith.constant 3.200000e+01 : f32
    %19 = vector.broadcast %cst_12 : f32 to vector<2x1xf32>
    %20 = arith.divf %18, %19 : vector<2x1xf32>
    %21 = vector.broadcast %13 : vector<2x1xf32> to vector<2x32xf32>
    %22 = arith.subf %7, %21 : vector<2x32xf32>
    %cst_13 = arith.constant 9.99999996E-13 : f32
    %23 = vector.broadcast %cst_13 : f32 to vector<2x1xf32>
    %24 = arith.addf %20, %23 : vector<2x1xf32>
    %25 = math.rsqrt %24 : vector<2x1xf32>
    %26 = vector.broadcast %25 : vector<2x1xf32> to vector<2x32xf32>
    %27 = arith.mulf %22, %26 : vector<2x32xf32>
    %28 = vector.broadcast %8 : vector<1x32xf32> to vector<2x32xf32>
    %29 = arith.mulf %27, %28 : vector<2x32xf32>
    %30 = vector.broadcast %9 : vector<1x32xf32> to vector<2x32xf32>
    %31 = arith.addf %29, %30 : vector<2x32xf32>
    %c0_14 = arith.constant 0 : index
    %c0_15 = arith.constant 0 : index
    %32 = vector.load %arg5[%c0_14, %c0_15] : memref<32x5xf32, #tpu.memory_space<vmem>>, vector<32x5xf32>
    %c0_16 = arith.constant 0 : index
    %c0_17 = arith.constant 0 : index
    %33 = vector.load %arg6[%c0_16, %c0_17] : memref<1x5xf32, #tpu.memory_space<vmem>>, vector<1x5xf32>
    %34 = arith.truncf %31 : vector<2x32xf32> to vector<2x32xbf16>
    %35 = arith.truncf %32 : vector<32x5xf32> to vector<32x5xbf16>
    %cst_18 = arith.constant dense<0.000000e+00> : vector<2x5xf32>
    %36 = tpu.matmul %34, %35, %cst_18 {dimension_numbers = #tpu.dot_dimension_numbers<[1], [0], [0], [1], [0, 0, 1, 1], [], []>} : vector<2x32xbf16>, vector<32x5xbf16>, vector<2x5xf32> -> vector<2x5xf32>
    %37 = vector.broadcast %33 : vector<1x5xf32> to vector<2x5xf32>
    %38 = arith.addf %36, %37 : vector<2x5xf32>
    %c0_19 = arith.constant 0 : index
    %c0_20 = arith.constant 0 : index
    %39 = vector.load %arg7[%c0_19, %c0_20] : memref<2x5xf32, #tpu.memory_space<vmem>>, vector<2x5xf32>
    tpu.vector_store %arg7[%c0_19, %c0_20], %38 {strides = array<i32>} : memref<2x5xf32, #tpu.memory_space<vmem>>, vector<2x5xf32>,
    return
  }
}

</mosaic_0001>

<bundles_post_ra>
// kernel: fashion_sap_forward.14
= control target key start
LH: loop header
LB: loop body
LE: loop exit
PB: predicated region body
PF: predicated region fallthrough
CT: control target
= control target key end

     0   :  { %s376_s18 = smov 0   ;;  %s408_s0 = inlined_call_operand.vmem [shape: f32[2,8,32], index: 0, kind: input, shape index: {}]   ;;  %s409_s1 = inlined_call_operand.vmem [shape: f32[8,32], index: 1, kind: input, shape index: {}]   ;;  %s410_s2 = inlined_call_operand.vmem [shape: f32[1,32], index: 2, kind: input, shape index: {}]   ;;  %s411_s3 = inlined_call_operand.vmem [shape: f32[1,32], index: 3, kind: input, shape index: {}]   ;;  %s412_s4 = inlined_call_operand.vmem [shape: f32[1,32], index: 4, kind: input, shape index: {}]   ;;  %s413_s5 = inlined_call_operand.vmem [shape: f32[2,8,32], index: 5, kind: output, shape index: {}]  }
   0x1 LB: > { %s316_s19 = sadd.s32 4294967295, %s344_s18   ;;  %p320_p0 = scmp.ge.s32.totalorder %s344_s18, 1  ;;  %s344_s18 = sphi %s376_s18, %s15_s18  }
   0x2   : > { %p186_p1 = scmp.lt.s32.totalorder %s344_s18, 3 }
   0x4   : > { %p187_p2 = pnand %p320_p0, %p186_p1 }
   0x5   : > { %p212_p3 = scmp.lt.s32.totalorder (!%p187_p2), %s316_s19, 1  ;;  %v221_v0 = vld [vmem:[%s409_s1] sm:$0xff] (!%p187_p2)  ;;  %vm233_vm0 = vcmask (!%p187_p2), 261120  }
   0x6   : > { %190 = sbr.rel (%p187_p2) target bundleno = 335 (0x14f), region = 40  ;;  %v323_v2 = vld [vmem:[%s410_s2] ss:$0 sm:$0xff] (!%p187_p2) }
   0x7   : > { %v324_v15 = vld [vmem:[%s411_s3] ss:$0 sm:$0xff] (!%p187_p2) }
   0x8   : > { %v325_v17 = vld [vmem:[%s412_s4] ss:$0 sm:$0xff] (!%p187_p2) }
   0xd   : > { %s415_s19 = smov (!%p212_p3, %s316_s19), 1 }
   0xe   : > { %s321_s20 = sshll.u32 %s415_s19, 3 }
   0xf   : > { %s215_s25 = scalar_lea.vmem %s408_s0, %s321_s20  ;;  %s219_s9 = scalar_lea.vmem %s413_s5, %s321_s20 }
  0x10   : > { %v220_v1 = vld [vmem:[%s215_s25] sm:$0xff] }
  0x11   : > { %v222_v3 = vadd.f32 %v221_v0, %v220_v1 }
  0x13   : > { %v230_v4 = vadd.f32 %v323_v2, %v222_v3 }
  0x15   : > { %v234_v5 = vsel %vm233_vm0, %v230_v4, 0.0 }
  0x16   : > { %235 = vadd.xlane.f32.xlu0 %v234_v5 }
  0xa3   : > { %v236_v6 = vpop.xlane.xlu0 %235 }
  0xa4   : > { %v238_v7 = vmul.f32 0.03125, %v236_v6 }
  0xa6   : > { %v239_v8 = vsub.f32 %v230_v4, %v238_v7 }
  0xa8   : > { %v240_v9 = vmul.f32 %v239_v8, %v239_v8 }
  0xaa   : > { %v241_v10 = vsel %vm233_vm0, %v240_v9, 0.0 }
  0xab   : > { %242 = vadd.xlane.f32.xlu0 %v241_v10 }
 0x138   : > { %v243_v11 = vpop.xlane.xlu0 %242 }
 0x139   : > { %v244_v12 = vmul.f32 0.03125, %v243_v11 }
 0x13b   : > { %v245_v13 = vadd.f32 1e-12, %v244_v12 }
 0x13d   : > { %336 = vrsqrt.f32 %v245_v13 }
 0x147   : > { %v337_v14 = vpop.eup %336 }
 0x148   : > { %v247_v16 = vmul.f32 %v337_v14, %v239_v8 }
 0x14a   : > { %v254_v18 = vmul.f32 %v324_v15, %v247_v16 }
 0x14c   : > { %v261_v19 = vadd.f32 %v325_v17, %v254_v18 }
 0x14e   : > { %262 = vst.msk [vmem:[%s219_s9] sm:$0xff] %vm233_vm0, %v261_v19 }
 0x14f PF: > { %s15_s18 = sadd.s32 1, %s344_s18  }
 0x150   : > { %p12_p4 = scmp.ge.s32.totalorder %s15_s18, 4  }
 0x152   :  { %14 = sbr.rel (!%p12_p4) target bundleno = 1 (0x1), region = 70 }

// kernel: fashion_sap_forward.15
= control target key start
LH: loop header
LB: loop body
LE: loop exit
PB: predicated region body
PF: predicated region fallthrough
CT: control target
= control target key end

     0   :  { %s1335_s29 = smov 0   ;;  %s1534_s0 = inlined_call_operand.vmem [shape: f32[2,8,32], index: 0, kind: input, shape index: {}]   ;;  %s1535_s1 = inlined_call_operand.vmem [shape: f32[2,1,8], index: 1, kind: input, shape index: {}]   ;;  %s1536_s2 = inlined_call_operand.vmem [shape: f32[32,96], index: 2, kind: input, shape index: {}]   ;;  %s1537_s3 = inlined_call_operand.vmem [shape: f32[1,96], index: 3, kind: input, shape index: {}]   ;;  %s1538_s4 = inlined_call_operand.vmem [shape: f32[32,32], index: 4, kind: input, shape index: {}]   ;;  %s1539_s5 = inlined_call_operand.vmem [shape: f32[1,32], index: 5, kind: input, shape index: {}]   ;;  %s1540_s6 = inlined_call_operand.vmem [shape: f32[1,32], index: 6, kind: input, shape index: {}]   ;;  %s1541_s7 = inlined_call_operand.vmem [shape: f32[1,32], index: 7, kind: input, shape index: {}]   ;;  %s1542_s8 = inlined_call_operand.vmem [shape: f32[32,128], index: 8, kind: input, shape index: {}]   ;;  %s1543_s9 = inlined_call_operand.vmem [shape: f32[1,128], index: 9, kind: input, shape index: {}]   ;;  %s1544_s10 = inlined_call_operand.vmem [shape: f32[128,32], index: 10, kind: input, shape index: {}]   ;;  %s1545_s11 = inlined_call_operand.vmem [shape: f32[1,32], index: 11, kind: input, shape index: {}]   ;;  %s1546_s12 = inlined_call_operand.vmem [shape: f32[1,32], index: 12, kind: input, shape index: {}]   ;;  %s1547_s13 = inlined_call_operand.vmem [shape: f32[1,32], index: 13, kind: input, shape index: {}]   ;;  %s1548_s14 = inlined_call_operand.vmem [shape: f32[2,8,32], index: 14, kind: output, shape index: {}]  }
   0x1 LB: > { %s1095_s30 = sadd.s32 4294967295, %s1250_s29   ;;  %p1099_p0 = scmp.ge.s32.totalorder %s1250_s29, 1  ;;  %s1250_s29 = sphi %s1335_s29, %s24_s29  }
   0x2   : > { %p419_p1 = scmp.lt.s32.totalorder %s1250_s29, 3 }
   0x4   : > { %p420_p2 = pnand %p1099_p0, %p419_p1 }
   0x5   : > { %v480_v0 = vld [vmem:[%s1536_s2] sm:$0xff] (!%p420_p2)  ;;  %v481_v1 = vld [vmem:[%s1536_s2 + $0x8] sm:$0xff] (!%p420_p2)  ;;  %v482_v2 = vld [vmem:[%s1536_s2 + $0x10] sm:$0xff] (!%p420_p2)  ;;  %p466_p3 = scmp.lt.s32.totalorder (!%p420_p2), %s1095_s30, 1  ;;  %v1252_v3 = vmov (!%p420_p2), 0.0   ;;  %vm1253_vm0 = vmmov (!%p420_p2), 0  }
   0x6   : > { %423 = sbr.rel (%p420_p2) target bundleno = 2532 (0x9e4), region = 76  ;;  %1146 = vmatprep.subr.bf16.mxu0 (!%p420_p2), %v1252_v3  ;;  %v486_v4 = vpack.c.bf16 (!%p420_p2), %v481_v1, %v480_v0  ;;  %v483_v5 = vld [vmem:[%s1536_s2 + $0x18] sm:$0xff] (!%p420_p2)  ;;  %1150 = vmatprep.mubr.msk.bf16.mxu0 (!%p420_p2), %vm1253_vm0, %v1252_v3  ;;  %vm494_vm1 = vcmask (!%p420_p2), 261120   ;;  %v1102_v9 = vld [vmem:[%s1537_s3] ss:$0 sm:$0xff] (!%p420_p2)  ;;  %s1254_s15 = smov (!%p420_p2), 112  }
   0x7   : > { %1166 = vmatprep.subr.bf16.mxu1 (!%p420_p2), %v1252_v3  ;;  %1168 = vmatprep.mubr.msk.bf16.mxu1 (!%p420_p2), %vm1253_vm0, %v1252_v3  ;;  %v487_v6 = vpack.c.bf16 (!%p420_p2), %v483_v5, %v482_v2  ;;  %s1255_s16 = smov (!%p420_p2), 96   ;;  %s1256_s17 = smov (!%p420_p2), 80   ;;  %vm542_vm2 = vcmask (!%p420_p2), 130048   ;;  %vm597_vm3 = vcmask (!%p420_p2), 64512   ;;  %vm615_vm4 = vcmask (!%p420_p2), 1043456   ;;  %v776_v58 = vld [vmem:[%s1538_s4] sm:$0xff] (!%p420_p2) }
   0x8   : > { %1147 = vmatpush3.bf16.msra.mxu0 (!%p420_p2), %v486_v4  ;;  %s1257_s21 = smov (!%p420_p2), 48   ;;  %s1258_s22 = smov (!%p420_p2), 64   ;;  %v777_v59 = vld [vmem:[%s1538_s4 + $0x8] sm:$0xff] (!%p420_p2)  ;;  %v778_v61 = vld [vmem:[%s1538_s4 + $0x10] sm:$0xff] (!%p420_p2)  ;;  %v779_v62 = vld [vmem:[%s1538_s4 + $0x18] sm:$0xff] (!%p420_p2) }
   0x9   : > { %1148 = vmatprep.subr.bf16.mxu0 (!%p420_p2), %v1252_v3  ;;  %v782_v60 = vpack.c.bf16 (!%p420_p2), %v777_v59, %v776_v58  ;;  %v783_v63 = vpack.c.bf16 (!%p420_p2), %v779_v62, %v778_v61  ;;  %s1259_s18 = smov (!%p420_p2), 16   ;;  %v942_v59 = vld [vmem:[%s1544_s10 + $0x60] sm:$0xff] (!%p420_p2)  ;;  %v944_v62 = vld [vmem:[%s1544_s10 + $0x70] sm:$0xff] (!%p420_p2) }
   0xc   : > { %1149 = vmatpush3.bf16.msra.mxu0 (!%p420_p2), %v487_v6 }
   0xd   : > { %s1550_s30 = smov (!%p466_p3, %s1095_s30), 1  ;;  %1154 = vmatprep.subr.bf16.mxu0 %v1252_v3 }
   0xe   : > { %s1100_s23 = sshll.u32 %s1550_s30, 3  ;;  %s472_s20 = scalar_lea.vmem %s1535_s1, %s1550_s30 }
   0xf   : > { %s469_s26 = scalar_lea.vmem %s1534_s0, %s1100_s23  ;;  %v1105_v22 = vld [vmem:[%s472_s20] ss:$0 sm:$0xff]  ;;  %s476_s24 = scalar_lea.vmem %s1548_s14, %s1100_s23 }
  0x10   : > { %v1370_v7 = vld [vmem:[%s469_s26] sm:$0xff] }
  0x11   : > { %v485_v8 = vpack.c.bf16 %v1370_v7, %v1370_v7 }
  0x13   : > { %1151 = vmatmul.mubr.msk.bf16.vlgmr.msra.gmra.mrb[0].mxu0 %vm494_vm1, %v485_v8 }
  0x14   : > { %1156 = vmatprep.mubr.msk.bf16.mxu0 %vm1253_vm0, %v1252_v3 }
  0xe6   : > { %v532_v10 = vpop.f32.mrb[0].mxu0 }
  0xe7   : > { %v533_v11 = vadd.f32 %v1102_v9, %v532_v10  ;;  %v1152_v12 = vpop.f32.mrb[1].mxu0 }
  0xe8   : > { %v535_v13 = vpop.f32.mrb[2].mxu0 }
  0xe9   : > { %v538_v14 = vpack.c.bf16 %v533_v11, %v533_v11  ;;  %v1153_v15 = vpop.f32.mrb[3].mxu0  ;;  %v1109_v13 = vld [vmem:[%s1539_s5] ss:$0 sm:$0xff] }
  0xeb   : > { %659 = vrot.lane.b32.xlu1 %v538_v14, %s1254_s15  ;;  %540 = vrot.lane.b32.xlu0 %v538_v14, %s1255_s16 }
  0xef   : > { %661 = vrot.lane.b32.xlu0 %v538_v14, %s1256_s17 }
 0x15d   : > { %v541_v16 = vpop.permute.xlu0 %540  ;;  %v660_v20 = vpop.permute.xlu1 %659 }
 0x15e   : > { %v547_v17 = vsel %vm542_vm2, %v541_v16, 0 }
 0x15f   : > { %1155 = vmatpush3.bf16.xpose.msra.mxu0 %v547_v17 }
 0x160   : > { %1160 = vmatprep.subr.bf16.mxu0 %v1252_v3 }
 0x161   : > { %v662_v18 = vpop.permute.xlu0 %661 }
 0x162   : > { %v667_v19 = vsel %vm542_vm2, %v662_v18, 0 }
 0x163   : > { %1167 = vmatpush3.bf16.xpose.msra.mxu1 %v667_v19 }
 0x164   : > { %1178 = vmatprep.subr.bf16.mxu1 %v1252_v3 }
 0x166   : > { %1157 = vmatmul.mubr.msk.bf16.vlgmr.msra.gmra.mrb[4].mxu0 %vm542_vm2, %v538_v14 }
 0x167   : > { %1162 = vmatprep.mubr.msk.bf16.mxu0 %vm1253_vm0, %v1252_v3 }
 0x16a   : > { %1169 = vmatmul.mubr.msk.bf16.vlgmr.msra.gmra.mrb[0].mxu1 %vm542_vm2, %v660_v20 }
 0x16b   : > { %1182 = vmatprep.mubr.msk.bf16.mxu1 %vm1253_vm0, %v1252_v3  ;;  %1179 = vmatpush3.bf16.msra.mxu1 %v782_v60  ;;  %v943_v60 = vld [vmem:[%s1544_s10 + $0x68] sm:$0xff] }
 0x16c   : > { %1180 = vmatprep.subr.bf16.mxu1 %v1252_v3  ;;  %v954_v61 = vpack.c.bf16 %v943_v60, %v942_v59 }
 0x16f   : > { %1181 = vmatpush3.bf16.msra.mxu1 %v783_v63  ;;  %v945_v63 = vld [vmem:[%s1544_s10 + $0x78] sm:$0xff] }
 0x170   : > { %1194 = vmatprep.subr.bf16.mxu1 %v1252_v3 }
 0x239   : > { %v583_v21 = vpop.f32.mrb[4].mxu0 }
 0x23a   : > { %v589_v23 = vmul.f32 0.25, %v583_v21  ;;  %v1158_v24 = vpop.f32.mrb[5].mxu0 }
 0x23b   : > { %v586_v25 = vpop.f32.mrb[6].mxu0 }
 0x23c   : > { %v1159_v26 = vpop.f32.mrb[7].mxu0  ;;  %v596_v27 = vadd.f32 %v1105_v22, %v589_v23 }
 0x23d   : > { %v703_v28 = vpop.f32.mrb[0].mxu1  ;;  %v864_v26 = vld [vmem:[%s1542_s8] sm:$0xff] }
 0x23e   : > { %v709_v29 = vmul.f32 0.25, %v703_v28  ;;  %v1170_v30 = vpop.f32.mrb[1].mxu1  ;;  %v598_v31 = vsel %vm597_vm3, %v596_v27, -inf }
 0x23f   : > { %v706_v32 = vpop.f32.mrb[2].mxu1  ;;  %599 = vmax.xlane.f32.xlu1 %v598_v31 }
 0x240   : > { %v1171_v33 = vpop.f32.mrb[3].mxu1  ;;  %v710_v34 = vadd.f32 %v1105_v22, %v709_v29  ;;  %v867_v29 = vld [vmem:[%s1542_s8 + $0x18] sm:$0xff] }
 0x242   : > { %v711_v35 = vsel %vm597_vm3, %v710_v34, -inf }
 0x243   : > { %712 = vmax.xlane.f32.xlu0 %v711_v35  ;;  %v1111_v35 = vld [vmem:[%s1540_s6] ss:$0 sm:$0xff] }
 0x2cc   : > { %v600_v36 = vpop.xlane.xlu1 %599 }
 0x2cd   : > { %v601_v37 = vsub.f32 %v596_v27, %v600_v36  ;;  %v865_v27 = vld [vmem:[%s1542_s8 + $0x8] sm:$0xff] }
 0x2ce   : > { %v870_v28 = vpack.c.bf16 %v865_v27, %v864_v26 }
 0x2cf   : > { %v602_v38 = vmul.f32 1.442695, %v601_v37  ;;  %v1112_v37 = vld [vmem:[%s1541_s7] ss:$0 sm:$0xff] }
 0x2d0   : > { %v713_v39 = vpop.xlane.xlu0 %712 }
 0x2d1   : > { %1230 = vpow2.f32 %v602_v38  ;;  %v714_v40 = vsub.f32 %v710_v34, %v713_v39 }
 0x2d3   : > { %v715_v41 = vmul.f32 1.442695, %v714_v40 }
 0x2d5   : > { %1232 = vpow2.f32 %v715_v41  ;;  %v930_v41 = vld [vmem:[%s1544_s10] sm:$0xff] }
 0x2db   : > { %v1231_v42 = vpop.eup %1230 }
 0x2dc   : > { %v604_v43 = vsel %vm597_vm3, %v1231_v42, 0.0 }
 0x2dd   : > { %605 = vadd.xlane.f32.xlu0 %v604_v43 }
 0x2df   : > { %v1233_v44 = vpop.eup %1232 }
 0x2e0   : > { %v717_v45 = vsel %vm597_vm3, %v1233_v44, 0.0 }
 0x2e1   : > { %718 = vadd.xlane.f32.xlu1 %v717_v45  ;;  %v933_v45 = vld [vmem:[%s1544_s10 + $0x18] sm:$0xff] }
 0x2f2   : > { %723 = vrot.lane.b32.xlu1 %v538_v14, %s1257_s21 }
 0x2f3   : > { %610 = vrot.lane.b32.xlu0 %v538_v14, %s1258_s22 }
 0x36a   : > { %v606_v46 = vpop.xlane.xlu0 %605 }
 0x36b   : > { %1234 = vrcp.f32 %v606_v46 }
 0x36e   : > { %v611_v47 = vpop.permute.xlu0 %610  ;;  %v719_v48 = vpop.xlane.xlu1 %718 }
 0x36f   : > { %v617_v49 = vsel %vm615_vm4, %v611_v47, 0  ;;  %1236 = vrcp.f32 %v719_v48  ;;  %v934_v47 = vld [vmem:[%s1544_s10 + $0x20] sm:$0xff]  ;;  %v935_v48 = vld [vmem:[%s1544_s10 + $0x28] sm:$0xff] }
 0x370   : > { %1161 = vmatpush3.bf16.msra.mxu0 %v617_v49  ;;  %v950_v49 = vpack.c.bf16 %v935_v48, %v934_v47 }
 0x371   : > { %1172 = vmatprep.subr.bf16.mxu0 %v1252_v3 }
 0x372   : > { %v724_v52 = vpop.permute.xlu1 %723 }
 0x373   : > { %v729_v55 = vsel %vm615_vm4, %v724_v52, 0 }
 0x375   : > { %v1235_v50 = vpop.eup %1234 }
 0x376   : > { %v608_v51 = vmul.f32 %v1235_v50, %v1231_v42  ;;  %v931_v42 = vld [vmem:[%s1544_s10 + $0x8] sm:$0xff]  ;;  %v936_v50 = vld [vmem:[%s1544_s10 + $0x30] sm:$0xff] }
 0x377   : > { %v948_v43 = vpack.c.bf16 %v931_v42, %v930_v41 }
 0x378   : > { %v609_v53 = vpack.c.bf16 %v608_v51, %v608_v51  ;;  %v937_v51 = vld [vmem:[%s1544_s10 + $0x38] sm:$0xff] }
 0x379   : > { %v1237_v54 = vpop.eup %1236  ;;  %v951_v52 = vpack.c.bf16 %v937_v51, %v936_v50 }
 0x37a   : > { %1163 = vmatmul.mubr.msk.bf16.vlgmr.msra.gmra.mrb[8].mxu0 %vm597_vm3, %v609_v53  ;;  %v721_v56 = vmul.f32 %v1237_v54, %v1233_v44  ;;  %v932_v44 = vld [vmem:[%s1544_s10 + $0x10] sm:$0xff]  ;;  %v938_v53 = vld [vmem:[%s1544_s10 + $0x40] sm:$0xff]  ;;  %v939_v54 = vld [vmem:[%s1544_s10 + $0x48] sm:$0xff] }
 0x37b   : > { %1173 = vmatpush3.bf16.msra.mxu0 %v729_v55  ;;  %1174 = vmatprep.mubr.msk.bf16.mxu0 %vm1253_vm0, %v1252_v3  ;;  %v949_v46 = vpack.c.bf16 %v933_v45, %v932_v44  ;;  %v952_v55 = vpack.c.bf16 %v939_v54, %v938_v53 }
 0x37c   : > { %1186 = vmatprep.subr.bf16.mxu0 %v1252_v3  ;;  %v722_v57 = vpack.c.bf16 %v721_v56, %v721_v56  ;;  %v940_v56 = vld [vmem:[%s1544_s10 + $0x50] sm:$0xff] }
 0x382   : > { %1175 = vmatmul.mubr.msk.bf16.vlgmr.msra.gmra.mrb[12].mxu0 %vm597_vm3, %v722_v57  ;;  %v941_v57 = vld [vmem:[%s1544_s10 + $0x58] sm:$0xff] }
 0x383   : > { %1190 = vmatprep.mubr.msk.bf16.mxu0 %vm1253_vm0, %v1252_v3  ;;  %1187 = vmatpush3.bf16.msra.mxu0 %v870_v28  ;;  %v953_v58 = vpack.c.bf16 %v941_v57, %v940_v56 }
 0x384   : > { %1188 = vmatprep.subr.bf16.mxu0 %v1252_v3 }
 0x44d   : > { %v653_v0 = vpop.f32.mrb[8].mxu0 }
 0x44e   : > { %v1164_v1 = vpop.f32.mrb[9].mxu0 }
 0x44f   : > { %v656_v2 = vpop.f32.mrb[10].mxu0  ;;  %v1113_v1 = vld [vmem:[%s1543_s9] ss:$0 sm:$0xff] }
 0x450   : > { %v1165_v4 = vpop.f32.mrb[11].mxu0 }
 0x455   : > { %v765_v5 = vpop.f32.mrb[12].mxu0 }
 0x456   : > { %772 = vrot.lane.b32.xlu1 %v765_v5, %s1259_s18  ;;  %v1176_v6 = vpop.f32.mrb[13].mxu0 }
 0x457   : > { %v768_v8 = vpop.f32.mrb[14].mxu0 }
 0x458   : > { %v1177_v9 = vpop.f32.mrb[15].mxu0 }
 0x4c8   : > { %v773_v10 = vpop.permute.xlu1 %772 }
 0x4c9   : > { %v775_v11 = vsel %vm542_vm2, %v653_v0, %v773_v10  ;;  %v955_v0 = vpack.c.bf16 %v945_v63, %v944_v62 }
 0x4ca   : > { %v781_v12 = vpack.c.bf16 %v775_v11, %v775_v11 }
 0x4cc   : > { %1183 = vmatmul.mubr.msk.bf16.vlgmr.msra.gmra.mrb[4].mxu1 %vm494_vm1, %v781_v12 }
 0x4cd   : > { %1210 = vmatprep.mubr.msk.bf16.mxu1 %vm1253_vm0, %v1252_v3  ;;  %1195 = vmatpush3.bf16.msra.mxu1 %v948_v43 }
 0x4ce   : > { %1196 = vmatprep.subr.bf16.mxu1 %v1252_v3 }
 0x4d1   : > { %1197 = vmatpush3.bf16.msra.mxu1 %v949_v46 }
 0x4d2   : > { %1198 = vmatprep.subr.bf16.mxu1 %v1252_v3 }
 0x4d5   : > { %1199 = vmatpush3.bf16.msra.mxu1 %v950_v49 }
 0x4d6   : > { %1200 = vmatprep.subr.bf16.mxu1 %v1252_v3 }
 0x4d9   : > { %1201 = vmatpush3.bf16.msra.mxu1 %v951_v52 }
 0x4da   : > { %1202 = vmatprep.subr.bf16.mxu1 %v1252_v3 }
 0x4dd   : > { %1203 = vmatpush3.bf16.msra.mxu1 %v952_v55 }
 0x4de   : > { %1204 = vmatprep.subr.bf16.mxu1 %v1252_v3 }
 0x4e1   : > { %1205 = vmatpush3.bf16.msra.mxu1 %v953_v58 }
 0x4e2   : > { %1206 = vmatprep.subr.bf16.mxu1 %v1252_v3 }
 0x4e5   : > { %1207 = vmatpush3.bf16.msra.mxu1 %v954_v61 }
 0x4e6   : > { %1208 = vmatprep.subr.bf16.mxu1 %v1252_v3 }
 0x4e9   : > { %1209 = vmatpush3.bf16.msra.mxu1 %v955_v0 }
 0x59f   : > { %v827_v14 = vpop.f32.mrb[4].mxu1 }
 0x5a0   : > { %v828_v15 = vadd.f32 %v1109_v13, %v827_v14  ;;  %v1184_v16 = vpop.f32.mrb[5].mxu1 }
 0x5a1   : > { %v830_v17 = vpop.f32.mrb[6].mxu1 }
 0x5a2   : > { %v1185_v18 = vpop.f32.mrb[7].mxu1  ;;  %v833_v19 = vadd.f32 %v828_v15, %v1370_v7  ;;  %v866_v7 = vld [vmem:[%s1542_s8 + $0x10] sm:$0xff] }
 0x5a3   : > { %v871_v30 = vpack.c.bf16 %v867_v29, %v866_v7  ;;  %v1115_v18 = vld [vmem:[%s1545_s11] ss:$0 sm:$0xff] }
 0x5a4   : > { %v836_v20 = vsel %vm494_vm1, %v833_v19, 0.0 }
 0x5a5   : > { %837 = vadd.xlane.f32.xlu0 %v836_v20  ;;  %1189 = vmatpush3.bf16.msra.mxu0 %v871_v30 }
 0x632   : > { %v838_v21 = vpop.xlane.xlu0 %837 }
 0x633   : > { %v840_v22 = vmul.f32 0.03125, %v838_v21 }
 0x635   : > { %v841_v23 = vsub.f32 %v833_v19, %v840_v22 }
 0x637   : > { %v842_v24 = vmul.f32 %v841_v23, %v841_v23 }
 0x639   : > { %v843_v25 = vsel %vm494_vm1, %v842_v24, 0.0 }
 0x63a   : > { %844 = vadd.xlane.f32.xlu1 %v843_v25 }
 0x6c7   : > { %v845_v31 = vpop.xlane.xlu1 %844 }
 0x6c8   : > { %v846_v32 = vmul.f32 0.03125, %v845_v31 }
 0x6ca   : > { %v847_v33 = vadd.f32 1e-12, %v846_v32 }
 0x6cc   : > { %1238 = vrsqrt.f32 %v847_v33 }
 0x6d6   : > { %v1239_v34 = vpop.eup %1238 }
 0x6d7   : > { %v849_v36 = vmul.f32 %v1239_v34, %v841_v23  ;;  %v1116_v34 = vld [vmem:[%s1546_s12] ss:$0 sm:$0xff] }
 0x6d9   : > { %v856_v38 = vmul.f32 %v1111_v35, %v849_v36  ;;  %v1117_v36 = vld [vmem:[%s1547_s13] ss:$0 sm:$0xff] }
 0x6db   : > { %v1450_v39 = vadd.f32 %v1112_v37, %v856_v38 }
 0x6dd   : > { %v869_v40 = vpack.c.bf16 %v1450_v39, %v1450_v39 }
 0x6df   : > { %1191 = vmatmul.mubr.msk.bf16.vlgmr.msra.gmra.mrb[16].mxu0 %vm494_vm1, %v869_v40 }
 0x7b2   : > { %v915_v2 = vpop.f32.mrb[16].mxu0 }
 0x7b3   : > { %v916_v4 = vadd.f32 %v1113_v1, %v915_v2  ;;  %v1192_v5 = vpop.f32.mrb[17].mxu0 }
 0x7b4   : > { %v918_v6 = vpop.f32.mrb[18].mxu0 }
 0x7b5   : > { %v921_v8 = vmul.f32 %v916_v4, %v916_v4  ;;  %v1193_v9 = vpop.f32.mrb[19].mxu0 }
 0x7b7   : > { %v922_v10 = vmul.f32 %v921_v8, %v916_v4 }
 0x7b9   : > { %v923_v11 = vmul.f32 0.044715, %v922_v10 }
 0x7bb   : > { %v924_v12 = vadd.f32 %v923_v11, %v916_v4 }
 0x7bd   : > { %v925_v13 = vmul.f32 0.7978846, %v924_v12 }
 0x7bf   : > { %1240 = vtanh.f32 %v925_v13 }
 0x7c9   : > { %v1241_v14 = vpop.eup %1240 }
 0x7ca   : > { %v927_v15 = vadd.f32 1.0, %v1241_v14 }
 0x7cc   : > { %v928_v16 = vmul.f32 0.5, %v927_v15 }
 0x7ce   : > { %v929_v3 = vmul.f32 %v928_v16, %v916_v4 }
 0x7d0   : > { %v947_v17 = vpack.c.bf16 %v929_v3, %v929_v3 }
 0x7d2   : > { %1211 = vmatmul.mubr.bf16.vlgmr.msra.gmra.mrb[8].mxu1 %v947_v17 }
 0x8a5   : > { %v996_v19 = vpop.f32.mrb[8].mxu1 }
 0x8a6   : > { %v997_v20 = vadd.f32 %v1115_v18, %v996_v19  ;;  %v1212_v21 = vpop.f32.mrb[9].mxu1 }
 0x8a7   : > { %v999_v22 = vpop.f32.mrb[10].mxu1 }
 0x8a8   : > { %v1213_v23 = vpop.f32.mrb[11].mxu1  ;;  %v1002_v24 = vadd.f32 %v997_v20, %v1450_v39 }
 0x8aa   : > { %v1005_v25 = vsel %vm494_vm1, %v1002_v24, 0.0 }
 0x8ab   : > { %1006 = vadd.xlane.f32.xlu0 %v1005_v25 }
 0x938   : > { %v1007_v26 = vpop.xlane.xlu0 %1006 }
 0x939   : > { %v1008_v27 = vmul.f32 0.03125, %v1007_v26 }
 0x93b   : > { %v1009_v28 = vsub.f32 %v1002_v24, %v1008_v27 }
 0x93d   : > { %v1010_v7 = vmul.f32 %v1009_v28, %v1009_v28 }
 0x93f   : > { %v1011_v29 = vsel %vm494_vm1, %v1010_v7, 0.0 }
 0x940   : > { %1012 = vadd.xlane.f32.xlu0 %v1011_v29 }
 0x9cd   : > { %v1013_v30 = vpop.xlane.xlu0 %1012 }
 0x9ce   : > { %v1014_v31 = vmul.f32 0.03125, %v1013_v30 }
 0x9d0   : > { %v1015_v32 = vadd.f32 1e-12, %v1014_v31 }
 0x9d2   : > { %1242 = vrsqrt.f32 %v1015_v32 }
 0x9dc   : > { %v1243_v33 = vpop.eup %1242 }
 0x9dd   : > { %v1017_v35 = vmul.f32 %v1243_v33, %v1009_v28 }
 0x9df   : > { %v1024_v37 = vmul.f32 %v1116_v34, %v1017_v35 }
 0x9e1   : > { %v1031_v38 = vadd.f32 %v1117_v36, %v1024_v37 }
 0x9e3   : > { %1032 = vst.msk [vmem:[%s476_s24] sm:$0xff] %vm494_vm1, %v1031_v38 }
 0x9e4 PF: > { %s24_s29 = sadd.s32 1, %s1250_s29  }
 0x9e5   : > { %p21_p4 = scmp.ge.s32.totalorder %s24_s29, 4  }
 0x9e7   :  { %23 = sbr.rel (!%p21_p4) target bundleno = 1 (0x1), region = 109 }

// kernel: fashion_sap_forward.13
= control target key start
LH: loop header
LB: loop body
LE: loop exit
PB: predicated region body
PF: predicated region fallthrough
CT: control target
= control target key end

     0   :  { %s348_s12 = smov 0   ;;  %s387_s0 = inlined_call_operand.vmem [shape: f32[2,17,32], index: 0, kind: input, shape index: {}]   ;;  %s388_s1 = inlined_call_operand.vmem [shape: f32[1,32], index: 1, kind: input, shape index: {}]   ;;  %s389_s2 = inlined_call_operand.vmem [shape: f32[1,32], index: 2, kind: input, shape index: {}]   ;;  %s390_s3 = inlined_call_operand.vmem [shape: f32[2,17,32], index: 3, kind: output, shape index: {}]  }
   0x1 LB: > { %s294_s13 = sadd.s32 4294967295, %s326_s12   ;;  %p298_p0 = scmp.ge.s32.totalorder %s326_s12, 1  ;;  %s326_s12 = sphi %s348_s12, %s13_s12  }
   0x2   : > { %p137_p1 = scmp.lt.s32.totalorder %s326_s12, 3 }
   0x4   : > { %p138_p2 = pnand %p298_p0, %p137_p1 }
   0x5   : > { %p161_p3 = scmp.lt.s32.totalorder (!%p138_p2), %s294_s13, 1  ;;  %vm176_vm0 = vcmask (!%p138_p2), 261120   ;;  %vm183_vm1 = vcmask (!%p138_p2), 253952   ;;  %v301_v31 = vld [vmem:[%s388_s1] ss:$0 sm:$0xff] (!%p138_p2) }
   0x6   : > { %141 = sbr.rel (%p138_p2) target bundleno = 337 (0x151), region = 32  ;;  %v302_v33 = vld [vmem:[%s389_s2] ss:$0 sm:$0xff] (!%p138_p2) }
   0xd   : > { %s392_s13 = smov (!%p161_p3, %s294_s13), 1 }
   0xe   : > { %s305_s14 = smul.u32 24, %s392_s13 }
  0x10   : > { %s165_s17 = scalar_lea.vmem %s387_s0, %s305_s14  ;;  %s170_s24 = scalar_lea.vmem %s390_s3, %s305_s14 }
  0x11   : > { %v171_v0 = vld [vmem:[%s165_s17] sm:$0xff]  ;;  %v173_v1 = vld [vmem:[%s165_s17 + $0x10] sm:$0x1]  ;;  %v172_v2 = vld [vmem:[%s165_s17 + $0x8] sm:$0xff] }
  0x12   : > { %v177_v3 = vsel %vm176_vm0, %v171_v0, 0.0  ;;  %v184_v4 = vsel %vm183_vm1, %v173_v1, 0.0  ;;  %v180_v5 = vsel %vm176_vm0, %v172_v2, 0.0 }
  0x13   : > { %178 = vadd.xlane.f32.xlu0 %v177_v3  ;;  %185 = vadd.xlane.f32.xlu1 %v184_v4 }
  0x17   : > { %181 = vadd.xlane.f32.xlu0 %v180_v5 }
  0xa0   : > { %v179_v6 = vpop.xlane.xlu0 %178  ;;  %v186_v7 = vpop.xlane.xlu1 %185 }
  0xa1   : > { %v188_v8 = vmul.f32 0.03125, %v179_v6  ;;  %v190_v9 = vmul.f32 0.03125, %v186_v7 }
  0xa3   : > { %v191_v10 = vsub.f32 %v171_v0, %v188_v8  ;;  %v193_v11 = vsub.f32 %v173_v1, %v190_v9 }
  0xa4   : > { %v182_v12 = vpop.xlane.xlu0 %181 }
  0xa5   : > { %v189_v13 = vmul.f32 0.03125, %v182_v12  ;;  %v194_v14 = vmul.f32 %v191_v10, %v191_v10  ;;  %v196_v15 = vmul.f32 %v193_v11, %v193_v11 }
  0xa7   : > { %v192_v16 = vsub.f32 %v172_v2, %v189_v13  ;;  %v197_v17 = vsel %vm176_vm0, %v194_v14, 0.0  ;;  %v203_v18 = vsel %vm183_vm1, %v196_v15, 0.0 }
  0xa8   : > { %198 = vadd.xlane.f32.xlu1 %v197_v17 }
  0xa9   : > { %v195_v19 = vmul.f32 %v192_v16, %v192_v16 }
  0xab   : > { %v200_v20 = vsel %vm176_vm0, %v195_v19, 0.0 }
  0xac   : > { %204 = vadd.xlane.f32.xlu1 %v203_v18  ;;  %201 = vadd.xlane.f32.xlu0 %v200_v20 }
 0x135   : > { %v199_v21 = vpop.xlane.xlu1 %198 }
 0x136   : > { %v206_v22 = vmul.f32 0.03125, %v199_v21 }
 0x138   : > { %v209_v23 = vadd.f32 1e-06, %v206_v22 }
 0x139   : > { %v205_v24 = vpop.xlane.xlu1 %204  ;;  %v202_v25 = vpop.xlane.xlu0 %201 }
 0x13a   : > { %314 = vrsqrt.f32 %v209_v23  ;;  %v208_v26 = vmul.f32 0.03125, %v205_v24  ;;  %v207_v27 = vmul.f32 0.03125, %v202_v25 }
 0x13c   : > { %v211_v28 = vadd.f32 1e-06, %v208_v26  ;;  %v210_v29 = vadd.f32 1e-06, %v207_v27 }
 0x13e   : > { %316 = vrsqrt.f32 %v211_v28 }
 0x13f   : > { %318 = vrsqrt.f32 %v210_v29 }
 0x144   : > { %v315_v30 = vpop.eup %314 }
 0x145   : > { %v215_v32 = vmul.f32 %v315_v30, %v191_v10 }
 0x147   : > { %v224_v34 = vmul.f32 %v301_v31, %v215_v32 }
 0x148   : > { %v317_v35 = vpop.eup %316 }
 0x149   : > { %v319_v36 = vpop.eup %318  ;;  %v233_v37 = vadd.f32 %v302_v33, %v224_v34  ;;  %v217_v38 = vmul.f32 %v317_v35, %v193_v11 }
 0x14a   : > { %v216_v39 = vmul.f32 %v319_v36, %v192_v16 }
 0x14b   : > { %236 = vst.msk [vmem:[%s170_s24] sm:$0xff] %vm176_vm0, %v233_v37  ;;  %v226_v40 = vmul.f32 %v301_v31, %v217_v38 }
 0x14c   : > { %v225_v41 = vmul.f32 %v301_v31, %v216_v39 }
 0x14d   : > { %v235_v42 = vadd.f32 %v302_v33, %v226_v40 }
 0x14e   : > { %v234_v43 = vadd.f32 %v302_v33, %v225_v41 }
 0x14f   : > { %238 = vst.msk [vmem:[%s170_s24 + $0x10] sm:$0x1] %vm183_vm1, %v235_v42 }
 0x150   : > { %237 = vst.msk [vmem:[%s170_s24 + $0x8] sm:$0xff] %vm176_vm0, %v234_v43 }
 0x151 PF: > { %s13_s12 = sadd.s32 1, %s326_s12  }
 0x152   : > { %p10_p4 = scmp.ge.s32.totalorder %s13_s12, 4  }
 0x154   :  { %12 = sbr.rel (!%p10_p4) target bundleno = 1 (0x1), region = 62 }

// kernel: fashion_sap_forward.10
= control target key start
LH: loop header
LB: loop body
LE: loop exit
PB: predicated region body
PF: predicated region fallthrough
CT: control target
= control target key end

     0   :  { %s445_s18 = smov 0   ;;  %s499_s0 = inlined_call_operand.vmem [shape: f32[2,16,48], index: 0, kind: input, shape index: {}]   ;;  %s500_s1 = inlined_call_operand.vmem [shape: f32[48,32], index: 1, kind: input, shape index: {}]   ;;  %s501_s2 = inlined_call_operand.vmem [shape: f32[1,32], index: 2, kind: input, shape index: {}]   ;;  %s502_s3 = inlined_call_operand.vmem [shape: f32[1,1,32], index: 3, kind: input, shape index: {}]   ;;  %s503_s4 = inlined_call_operand.vmem [shape: f32[1,17,32], index: 4, kind: input, shape index: {}]   ;;  %s504_s5 = inlined_call_operand.vmem [shape: f32[2,17,32], index: 5, kind: output, shape index: {}]  }
   0x1 LB: > { %s367_s19 = sadd.s32 4294967295, %s411_s18   ;;  %p371_p0 = scmp.ge.s32.totalorder %s411_s18, 1  ;;  %s411_s18 = sphi %s445_s18, %s15_s18  }
   0x2   : > { %p187_p1 = scmp.lt.s32.totalorder %s411_s18, 3 }
   0x4   : > { %p188_p2 = pnand %p371_p0, %p187_p1 }
   0x5   : > { %v228_v0 = vld [vmem:[%s500_s1] sm:$0xff] (!%p188_p2)  ;;  %v229_v1 = vld [vmem:[%s500_s1 + $0x8] sm:$0xff] (!%p188_p2)  ;;  %v230_v2 = vld [vmem:[%s500_s1 + $0x10] sm:$0xff] (!%p188_p2)  ;;  %p215_p3 = scmp.lt.s32.totalorder (!%p188_p2), %s367_s19, 1  ;;  %v413_v3 = vmov (!%p188_p2), 0.0   ;;  %vm414_vm0 = vmmov (!%p188_p2), 0  }
   0x6   : > { %191 = sbr.rel (%p188_p2) target bundleno = 241 (0xf1), region = 40  ;;  %384 = vmatprep.subr.bf16.mxu0 (!%p188_p2), %v413_v3  ;;  %v236_v4 = vpack.c.bf16 (!%p188_p2), %v229_v1, %v228_v0  ;;  %v231_v5 = vld [vmem:[%s500_s1 + $0x18] sm:$0xff] (!%p188_p2)  ;;  %390 = vmatprep.mubr.msk.bf16.mxu0 (!%p188_p2), %vm414_vm0, %v413_v3  ;;  %v232_v7 = vld [vmem:[%s500_s1 + $0x20] sm:$0xff] (!%p188_p2)  ;;  %v233_v8 = vld [vmem:[%s500_s1 + $0x28] sm:$0xff] (!%p188_p2)  ;;  %vm245_vm1 = vcmask (!%p188_p2), 392192   ;;  %vm293_vm2 = vcmask (!%p188_p2), 1040384  }
   0x7   : > { %v237_v6 = vpack.c.bf16 (!%p188_p2), %v231_v5, %v230_v2  ;;  %v238_v9 = vpack.c.bf16 (!%p188_p2), %v233_v8, %v232_v7  ;;  %v375_v13 = vld [vmem:[%s501_s2] ss:$0 sm:$0xff] (!%p188_p2)  ;;  %v303_v23 = vld [vmem:[%s503_s4 + $0x10] sm:$0x1] (!%p188_p2)  ;;  %v302_v26 = vld [vmem:[%s503_s4 + $0x8] sm:$0xff] (!%p188_p2)  ;;  %vm307_vm3 = vcmask (!%p188_p2), 261120  }
   0x8   : > { %385 = vmatpush3.bf16.msra.mxu0 (!%p188_p2), %v236_v4  ;;  %v290_v17 = vld [vmem:[%s502_s3] sm:$0x1] (!%p188_p2)  ;;  %vm310_vm4 = vcmask (!%p188_p2), 253952  }
   0x9   : > { %386 = vmatprep.subr.bf16.mxu0 (!%p188_p2), %v413_v3  ;;  %v301_v20 = vld [vmem:[%s503_s4] sm:$0xff] (!%p188_p2) }
   0xc   : > { %387 = vmatpush3.bf16.msra.mxu0 (!%p188_p2), %v237_v6 }
   0xd   : > { %s506_s19 = smov (!%p215_p3, %s367_s19), 1  ;;  %388 = vmatprep.subr.bf16.mxu0 %v413_v3 }
   0xe   : > { %s379_s7 = sshll.u32 %s506_s19, 4  ;;  %s394_s13 = smul.u32 24, %s506_s19 }
   0xf   : > { %s219_s10 = scalar_lea.vmem %s499_s0, %s379_s7 }
  0x10   : > { %v226_v10 = vld [vmem:[%s219_s10] sm:$0xff]  ;;  %v227_v11 = vld [vmem:[%s219_s10 + $0x8] sm:$0xff]  ;;  %389 = vmatpush3.bf16.msra.mxu0 %v238_v9  ;;  %s224_s23 = scalar_lea.vmem %s504_s5, %s394_s13 }
  0x11   : > { %v235_v12 = vpack.c.bf16 %v227_v11, %v226_v10 }
  0x13   : > { %391 = vmatmul.mubr.msk.bf16.vlgmr.msra.gmra.mrb[0].mxu0 %vm245_vm1, %v235_v12 }
  0xe6   : > { %v283_v14 = vpop.f32.mrb[0].mxu0 }
  0xe7   : > { %v284_v15 = vadd.f32 %v375_v13, %v283_v14  ;;  %v392_v16 = vpop.f32.mrb[1].mxu0 }
  0xe8   : > { %v286_v18 = vpop.f32.mrb[2].mxu0 }
  0xe9   : > { %v294_v19 = vrot.slane %v284_v15, 7  ;;  %v287_v21 = vadd.f32 %v375_v13, %v286_v18  ;;  %v393_v22 = vpop.f32.mrb[3].mxu0 }
  0xeb   : > { %v300_v24 = vsel %vm293_vm2, %v290_v17, %v294_v19  ;;  %v295_v25 = vrot.slane %v287_v21, 7 }
  0xec   : > { %v304_v27 = vadd.f32 %v301_v20, %v300_v24 }
  0xed   : > { %v296_v28 = vsel %vm293_vm2, %v294_v19, %v295_v25  ;;  %v306_v29 = vadd.f32 %v303_v23, %v295_v25 }
  0xee   : > { %v305_v30 = vadd.f32 %v302_v26, %v296_v28  ;;  %308 = vst.msk [vmem:[%s224_s23] sm:$0xff] %vm307_vm3, %v304_v27 }
  0xef   : > { %311 = vst.msk [vmem:[%s224_s23 + $0x10] sm:$0x1] %vm310_vm4, %v306_v29 }
  0xf0   : > { %309 = vst.msk [vmem:[%s224_s23 + $0x8] sm:$0xff] %vm307_vm3, %v305_v30 }
  0xf1 PF: > { %s15_s18 = sadd.s32 1, %s411_s18  }
  0xf2   : > { %p12_p4 = scmp.ge.s32.totalorder %s15_s18, 4  }
  0xf4   :  { %14 = sbr.rel (!%p12_p4) target bundleno = 1 (0x1), region = 70 }

// kernel: fashion_sap_forward.11
= control target key start
LH: loop header
LB: loop body
LE: loop exit
PB: predicated region body
PF: predicated region fallthrough
CT: control target
= control target key end

     0   :  { %s1599_s25 = smov 0   ;;  %s1842_s0 = inlined_call_operand.vmem [shape: f32[2,17,32], index: 0, kind: input, shape index: {}]   ;;  %s1843_s1 = inlined_call_operand.vmem [shape: f32[1,32], index: 1, kind: input, shape index: {}]   ;;  %s1844_s2 = inlined_call_operand.vmem [shape: f32[1,32], index: 2, kind: input, shape index: {}]   ;;  %s1845_s3 = inlined_call_operand.vmem [shape: f32[32,96], index: 3, kind: input, shape index: {}]   ;;  %s1846_s4 = inlined_call_operand.vmem [shape: f32[1,96], index: 4, kind: input, shape index: {}]   ;;  %s1847_s5 = inlined_call_operand.vmem [shape: f32[32,32], index: 5, kind: input, shape index: {}]   ;;  %s1848_s6 = inlined_call_operand.vmem [shape: f32[1,32], index: 6, kind: input, shape index: {}]   ;;  %s1849_s7 = inlined_call_operand.vmem [shape: f32[1,32], index: 7, kind: input, shape index: {}]   ;;  %s1850_s8 = inlined_call_operand.vmem [shape: f32[1,32], index: 8, kind: input, shape index: {}]   ;;  %s1851_s9 = inlined_call_operand.vmem [shape: f32[32,128], index: 9, kind: input, shape index: {}]   ;;  %s1852_s10 = inlined_call_operand.vmem [shape: f32[1,128], index: 10, kind: input, shape index: {}]   ;;  %s1853_s11 = inlined_call_operand.vmem [shape: f32[128,32], index: 11, kind: input, shape index: {}]   ;;  %s1854_s12 = inlined_call_operand.vmem [shape: f32[1,32], index: 12, kind: input, shape index: {}]   ;;  %s1855_s13 = inlined_call_operand.vmem [shape: f32[2,17,32], index: 13, kind: output, shape index: {}]  }
   0x1 LB: > { %s1302_s26 = sadd.s32 4294967295, %s1520_s25   ;;  %p1306_p0 = scmp.ge.s32.totalorder %s1520_s25, 1  ;;  %s1520_s25 = sphi %s1599_s25, %s23_s25  }
   0x2   : > { %p387_p1 = scmp.lt.s32.totalorder %s1520_s25, 3 }
   0x4   : > { %p388_p2 = pnand %p1306_p0, %p387_p1 }
   0x5   : > { %p431_p3 = scmp.lt.s32.totalorder (!%p388_p2), %s1302_s26, 1  ;;  %vm447_vm0 = vcmask (!%p388_p2), 261120   ;;  %vm454_vm1 = vcmask (!%p388_p2), 253952   ;;  %v507_v21 = vld [vmem:[%s1845_s3] sm:$0xff] (!%p388_p2)  ;;  %v508_v22 = vld [vmem:[%s1845_s3 + $0x8] sm:$0xff] (!%p388_p2)  ;;  %v509_v23 = vld [vmem:[%s1845_s3 + $0x10] sm:$0xff] (!%p388_p2) }
   0x6   : > { %391 = sbr.rel (%p388_p2) target bundleno = 3127 (0xc37), region = 72  ;;  %v514_v24 = vpack.c.bf16 (!%p388_p2), %v508_v22, %v507_v21  ;;  %v510_v25 = vld [vmem:[%s1845_s3 + $0x18] sm:$0xff] (!%p388_p2)  ;;  %v1309_v38 = vld [vmem:[%s1843_s1] ss:$0 sm:$0xff] (!%p388_p2)  ;;  %s1522_s14 = smov (!%p388_p2), 96   ;;  %vm584_vm2 = vcmask (!%p388_p2), 130048  }
   0x7   : > { %v515_v26 = vpack.c.bf16 (!%p388_p2), %v510_v25, %v509_v23  ;;  %v1310_v44 = vld [vmem:[%s1844_s2] ss:$0 sm:$0xff] (!%p388_p2)  ;;  %vm648_vm3 = vcmask (!%p388_p2), 138240   ;;  %vm655_vm4 = vcmask (!%p388_p2), 131072   ;;  %s1523_s15 = smov (!%p388_p2), 64   ;;  %s1524_s16 = smov (!%p388_p2), 112  }
   0x8   : > { %1371 = vmatprep.subr.bf16.mxu0 (!%p388_p2), %v514_v24  ;;  %v1311_v52 = vld [vmem:[%s1846_s4] ss:$0 sm:$0xff] (!%p388_p2)  ;;  %s1525_s17 = smov (!%p388_p2), 80   ;;  %vm696_vm5 = vcmask (!%p388_p2), 1040384   ;;  %s1527_s18 = smov (!%p388_p2), 48  }
   0x9   : > { %1372 = vmatpush3.bf16.msra.mxu0 (!%p388_p2), %v514_v24 }
   0xa   : > { %1373 = vmatprep.subr.bf16.mxu0 (!%p388_p2), %v515_v26 }
   0xd   : > { %s1857_s26 = smov (!%p431_p3, %s1302_s26), 1  ;;  %1374 = vmatpush3.bf16.msra.mxu0 %v515_v26 }
   0xe   : > { %s1451_s27 = smul.u32 24, %s1857_s26 }
  0x10   : > { %s435_s30 = scalar_lea.vmem %s1842_s0, %s1451_s27  ;;  %s440_s24 = scalar_lea.vmem %s1855_s13, %s1451_s27 }
  0x11   : > { %v1615_v0 = vld [vmem:[%s435_s30] sm:$0xff]  ;;  %v1617_v1 = vld [vmem:[%s435_s30 + $0x10] sm:$0x1]  ;;  %v1619_v2 = vld [vmem:[%s435_s30 + $0x8] sm:$0xff]  ;;  %s1528_s30 = smov 16  }
  0x12   : > { %v448_v3 = vsel %vm447_vm0, %v1615_v0, 0.0  ;;  %v455_v4 = vsel %vm454_vm1, %v1617_v1, 0.0  ;;  %v451_v5 = vsel %vm447_vm0, %v1619_v2, 0.0 }
  0x13   : > { %449 = vadd.xlane.f32.xlu0 %v448_v3  ;;  %456 = vadd.xlane.f32.xlu1 %v455_v4 }
  0x17   : > { %452 = vadd.xlane.f32.xlu0 %v451_v5 }
  0xa0   : > { %v450_v6 = vpop.xlane.xlu0 %449  ;;  %v457_v7 = vpop.xlane.xlu1 %456 }
  0xa1   : > { %v459_v8 = vmul.f32 0.03125, %v450_v6  ;;  %v461_v9 = vmul.f32 0.03125, %v457_v7 }
  0xa3   : > { %v462_v10 = vsub.f32 %v1615_v0, %v459_v8  ;;  %v464_v11 = vsub.f32 %v1617_v1, %v461_v9 }
  0xa4   : > { %v453_v12 = vpop.xlane.xlu0 %452 }
  0xa5   : > { %v460_v13 = vmul.f32 0.03125, %v453_v12  ;;  %v465_v14 = vmul.f32 %v462_v10, %v462_v10  ;;  %v467_v15 = vmul.f32 %v464_v11, %v464_v11 }
  0xa7   : > { %v463_v16 = vsub.f32 %v1619_v2, %v460_v13  ;;  %v468_v17 = vsel %vm447_vm0, %v465_v14, 0.0  ;;  %v474_v18 = vsel %vm454_vm1, %v467_v15, 0.0 }
  0xa8   : > { %469 = vadd.xlane.f32.xlu1 %v468_v17 }
  0xa9   : > { %v466_v19 = vmul.f32 %v463_v16, %v463_v16 }
  0xab   : > { %v471_v20 = vsel %vm447_vm0, %v466_v19, 0.0 }
  0xac   : > { %475 = vadd.xlane.f32.xlu1 %v474_v18  ;;  %472 = vadd.xlane.f32.xlu0 %v471_v20 }
 0x135   : > { %v470_v27 = vpop.xlane.xlu1 %469 }
 0x136   : > { %v477_v28 = vmul.f32 0.03125, %v470_v27 }
 0x138   : > { %v480_v29 = vadd.f32 1e-06, %v477_v28 }
 0x139   : > { %v476_v30 = vpop.xlane.xlu1 %475  ;;  %v473_v31 = vpop.xlane.xlu0 %472 }
 0x13a   : > { %1472 = vrsqrt.f32 %v480_v29  ;;  %v479_v32 = vmul.f32 0.03125, %v476_v30  ;;  %v478_v33 = vmul.f32 0.03125, %v473_v31 }
 0x13c   : > { %v482_v34 = vadd.f32 1e-06, %v479_v32  ;;  %v481_v35 = vadd.f32 1e-06, %v478_v33 }
 0x13e   : > { %1474 = vrsqrt.f32 %v482_v34  ;;  %v1526_v34 = vmov 0  }
 0x13f   : > { %1476 = vrsqrt.f32 %v481_v35  ;;  %v1682_v35 = vsel %vm696_vm5, 65535, %v1526_v34  ;;  %v933_v34 = vld [vmem:[%s1847_s5] sm:$0xff] }
 0x144   : > { %v1473_v36 = vpop.eup %1472 }
 0x145   : > { %v486_v37 = vmul.f32 %v1473_v36, %v462_v10 }
 0x147   : > { %v495_v43 = vmul.f32 %v1309_v38, %v486_v37 }
 0x148   : > { %v1475_v39 = vpop.eup %1474 }
 0x149   : > { %v1477_v40 = vpop.eup %1476  ;;  %v488_v41 = vmul.f32 %v1475_v39, %v464_v11  ;;  %v504_v48 = vadd.f32 %v1310_v44, %v495_v43 }
 0x14a   : > { %v487_v42 = vmul.f32 %v1477_v40, %v463_v16 }
 0x14b   : > { %v497_v45 = vmul.f32 %v1309_v38, %v488_v41 }
 0x14c   : > { %v496_v46 = vmul.f32 %v1309_v38, %v487_v42 }
 0x14d   : > { %v506_v47 = vadd.f32 %v1310_v44, %v497_v45 }
 0x14e   : > { %v505_v49 = vadd.f32 %v1310_v44, %v496_v46 }
 0x14f   : > { %v513_v50 = vpack.c.bf16 %v506_v47, %v506_v47 }
 0x150   : > { %v512_v51 = vpack.c.bf16 %v505_v49, %v504_v48 }
 0x152   : > { %1375 = vmatprep.mubr.msk.bf16.mxu0 %vm447_vm0, %v512_v51 }
 0x153   : > { %1376 = vmatmul.mubr.msk.bf16.vlgmr.msra.gmra.mrb[0].mxu0 %vm447_vm0, %v513_v50 }
 0x226   : > { %v1377_v53 = vpop.f32.mrb[0].mxu0 }
 0x227   : > { %v571_v54 = vadd.f32 %v1377_v53, %v1311_v52  ;;  %v562_v55 = vpop.f32.mrb[1].mxu0 }
 0x228   : > { %v1378_v56 = vpop.f32.mrb[2].mxu0  ;;  %v563_v59 = vadd.f32 %v1311_v52, %v562_v55 }
 0x229   : > { %v1656_v57 = vpack.c.bf16 %v571_v54, %v571_v54  ;;  %v565_v58 = vpop.f32.mrb[3].mxu0 }
 0x22a   : > { %v566_v60 = vadd.f32 %v1311_v52, %v565_v58 }
 0x22b   : > { %582 = vrot.lane.b32.xlu1 %v1656_v57, %s1522_s14 }
 0x22c   : > { %v1659_v61 = vpack.c.bf16 %v566_v60, %v563_v59 }
 0x22e   : > { %580 = vrot.lane.b32.xlu0 %v1659_v61, %s1522_s14  ;;  %1383 = vmatprep.mubr.msk.bf16.mxu0 %vm584_vm2, %v1659_v61 }
 0x29d   : > { %v583_v3 = vpop.permute.xlu1 %582 }
 0x29e   : > { %v595_v4 = vsel %vm584_vm2, %v583_v3, 0 }
 0x2a0   : > { %v581_v62 = vpop.permute.xlu0 %580 }
 0x2a1   : > { %v592_v63 = vsel %vm584_vm2, %v581_v62, 0  ;;  %1447 = vmatprep.subr.msk.bf16.mxu0 %vm584_vm2, %v581_v62 }
 0x2a2   : > { %1380 = vmatpush3.bf16.xpose.msra.mxu0 %v592_v63 }
 0x2a3   : > { %1448 = vmatprep.subr.msk.bf16.mxu0 %vm584_vm2, %v583_v3 }
 0x2aa   : > { %1382 = vmatpush3.bf16.xpose.msra.mxu0 %v595_v4 }
 0x2b1   : > { %1384 = vmatmul.mubr.msk.bf16.vlgmr.msra.gmra.mrb[4].mxu0 %vm584_vm2, %v1656_v57 }
 0x384   : > { %v1385_v5 = vpop.f32.mrb[4].mxu0 }
 0x385   : > { %v631_v6 = vpop.f32.mrb[5].mxu0  ;;  %v647_v12 = vmul.f32 0.25, %v1385_v5 }
 0x386   : > { %v645_v7 = vmul.f32 0.25, %v631_v6  ;;  %v1386_v8 = vpop.f32.mrb[6].mxu0 }
 0x387   : > { %v634_v9 = vpop.f32.mrb[7].mxu0  ;;  %v656_v14 = vsel %vm655_vm4, %v647_v12, -inf }
 0x388   : > { %v646_v10 = vmul.f32 0.25, %v634_v9  ;;  %v649_v11 = vsel %vm648_vm3, %v645_v7, -inf }
 0x389   : > { %650 = vmax.xlane.f32.xlu1 %v649_v11 }
 0x38a   : > { %v652_v13 = vsel %vm648_vm3, %v646_v10, -inf }
 0x38b   : > { %653 = vmax.xlane.f32.xlu0 %v652_v13 }
 0x38f   : > { %657 = vmax.xlane.f32.xlu0 %v656_v14 }
 0x416   : > { %v651_v15 = vpop.xlane.xlu1 %650 }
 0x417   : > { %v659_v18 = vsub.f32 %v645_v7, %v651_v15 }
 0x418   : > { %v654_v16 = vpop.xlane.xlu0 %653 }
 0x419   : > { %v660_v17 = vsub.f32 %v646_v10, %v654_v16  ;;  %v662_v22 = vmul.f32 1.442695, %v659_v18 }
 0x41b   : > { %v664_v19 = vmul.f32 1.442695, %v660_v17 }
 0x41c   : > { %v658_v20 = vpop.xlane.xlu0 %657 }
 0x41d   : > { %1478 = vpow2.f32 %v664_v19  ;;  %v661_v21 = vsub.f32 %v647_v12, %v658_v20 }
 0x41f   : > { %v666_v23 = vmul.f32 1.442695, %v661_v21 }
 0x421   : > { %1480 = vpow2.f32 %v666_v23 }
 0x422   : > { %1482 = vpow2.f32 %v662_v22 }
 0x427   : > { %v1479_v24 = vpop.eup %1478 }
 0x428   : > { %v671_v25 = vsel %vm648_vm3, %v1479_v24, 0.0 }
 0x429   : > { %672 = vadd.xlane.f32.xlu0 %v671_v25 }
 0x42b   : > { %v1481_v26 = vpop.eup %1480 }
 0x42c   : > { %v674_v27 = vsel %vm655_vm4, %v1481_v26, 0.0  ;;  %v1483_v28 = vpop.eup %1482 }
 0x42d   : > { %675 = vadd.xlane.f32.xlu1 %v674_v27  ;;  %v668_v29 = vsel %vm648_vm3, %v1483_v28, 0.0 }
 0x431   : > { %669 = vadd.xlane.f32.xlu1 %v668_v29 }
 0x43f   : > { %685 = vrot.lane.b32.xlu0 %v1659_v61, %s1523_s15 }
 0x442   : > { %687 = vrot.lane.b32.xlu1 %v1656_v57, %s1523_s15 }
 0x443   : > { %750 = vrot.lane.b32.xlu0 %v1659_v61, %s1524_s16 }
 0x446   : > { %754 = vrot.lane.b32.xlu1 %v1659_v61, %s1525_s17 }
 0x44a   : > { %756 = vrot.lane.b32.xlu1 %v1656_v57, %s1525_s17 }
 0x44e   : > { %752 = vrot.lane.b32.xlu1 %v1656_v57, %s1524_s16 }
 0x4b6   : > { %v673_v30 = vpop.xlane.xlu0 %672 }
 0x4ba   : > { %v676_v31 = vpop.xlane.xlu1 %675  ;;  %v686_v32 = vpop.permute.xlu0 %685 }
 0x4bb   : > { %1387 = vmatprep.subr.bf16.mxu0 %v686_v32  ;;  %1484 = vrcp.f32 %v676_v31 }
 0x4bc   : > { %1388 = vmatpush3.bf16.msra.mxu0 %v686_v32  ;;  %1486 = vrcp.f32 %v673_v30 }
 0x4be   : > { %v670_v33 = vpop.xlane.xlu1 %669  ;;  %v751_v47 = vpop.permute.xlu0 %750 }
 0x4bf   : > { %1488 = vrcp.f32 %v670_v33 }
 0x4c2   : > { %v688_v36 = vpop.permute.xlu1 %687 }
 0x4c3   : > { %v700_v37 = vand.u32 %v1682_v35, %v688_v36 }
 0x4c5   : > { %1389 = vmatprep.subr.bf16.mxu0 %v700_v37  ;;  %v1485_v38 = vpop.eup %1484 }
 0x4c6   : > { %v755_v39 = vpop.permute.xlu1 %754  ;;  %1390 = vmatpush3.bf16.msra.mxu0 %v700_v37  ;;  %v1487_v40 = vpop.eup %1486  ;;  %v682_v42 = vmul.f32 %v1485_v38, %v1481_v26  ;;  %v935_v37 = vld [vmem:[%s1847_s5 + $0x10] sm:$0xff]  ;;  %v936_v38 = vld [vmem:[%s1847_s5 + $0x18] sm:$0xff] }
 0x4c7   : > { %1449 = vmatprep.subr.msk.bf16.mxu0 %vm584_vm2, %v755_v39  ;;  %v681_v44 = vmul.f32 %v1487_v40, %v1479_v24  ;;  %v765_v48 = vsel %vm584_vm2, %v755_v39, 0  ;;  %v941_v39 = vpack.c.bf16 %v936_v38, %v935_v37 }
 0x4c8   : > { %v684_v46 = vpack.c.bf16 %v682_v42, %v682_v42 }
 0x4c9   : > { %v1489_v41 = vpop.eup %1488 }
 0x4ca   : > { %v680_v43 = vmul.f32 %v1489_v41, %v1483_v28  ;;  %v757_v49 = vpop.permute.xlu1 %756 }
 0x4cb   : > { %v768_v50 = vsel %vm584_vm2, %v757_v49, 0 }
 0x4cc   : > { %v683_v45 = vpack.c.bf16 %v681_v44, %v680_v43 }
 0x4ce   : > { %1391 = vmatprep.mubr.msk.bf16.mxu0 %vm648_vm3, %v683_v45  ;;  %v753_v51 = vpop.permute.xlu1 %752 }
 0x4cf   : > { %1392 = vmatmul.mubr.msk.bf16.vlgmr.msra.gmra.mrb[8].mxu0 %vm648_vm3, %v684_v46 }
 0x4d0   : > { %1396 = vmatpush3.bf16.xpose.msra.mxu0 %v765_v48  ;;  %1399 = vmatprep.mubr.msk.bf16.mxu0 %vm584_vm2, %v751_v47 }
 0x4d1   : > { %1450 = vmatprep.subr.msk.bf16.mxu0 %vm584_vm2, %v757_v49 }
 0x4d8   : > { %1398 = vmatpush3.bf16.xpose.msra.mxu0 %v768_v50 }
 0x4df   : > { %1400 = vmatmul.mubr.msk.bf16.vlgmr.msra.gmra.mrb[12].mxu0 %vm584_vm2, %v753_v51 }
 0x5a2   : > { %v1693_v52 = vpop.f32.mrb[8].mxu0 }
 0x5a3   : > { %v1695_v53 = vpop.f32.mrb[9].mxu0 }
 0x5a4   : > { %v1394_v54 = vpop.f32.mrb[10].mxu0 }
 0x5a5   : > { %v1697_v55 = vpop.f32.mrb[11].mxu0 }
 0x5b2   : > { %v1401_v56 = vpop.f32.mrb[12].mxu0 }
 0x5b3   : > { %v804_v58 = vpop.f32.mrb[13].mxu0  ;;  %v820_v63 = vmul.f32 0.25, %v1401_v56 }
 0x5b4   : > { %v818_v59 = vmul.f32 0.25, %v804_v58  ;;  %v1402_v60 = vpop.f32.mrb[14].mxu0  ;;  %v1322_v58 = vld [vmem:[%s1848_s6] ss:$0 sm:$0xff] }
 0x5b5   : > { %v807_v62 = vpop.f32.mrb[15].mxu0  ;;  %v827_v6 = vsel %vm655_vm4, %v820_v63, -inf }
 0x5b6   : > { %v819_v3 = vmul.f32 0.25, %v807_v62  ;;  %v821_v4 = vsel %vm648_vm3, %v818_v59, -inf }
 0x5b7   : > { %822 = vmax.xlane.f32.xlu0 %v821_v4 }
 0x5b8   : > { %v824_v5 = vsel %vm648_vm3, %v819_v3, -inf }
 0x5b9   : > { %825 = vmax.xlane.f32.xlu1 %v824_v5 }
 0x5bb   : > { %828 = vmax.xlane.f32.xlu0 %v827_v6 }
 0x644   : > { %v823_v7 = vpop.xlane.xlu0 %822 }
 0x645   : > { %v830_v8 = vsub.f32 %v818_v59, %v823_v7 }
 0x646   : > { %v826_v9 = vpop.xlane.xlu1 %825 }
 0x647   : > { %v833_v10 = vmul.f32 1.442695, %v830_v8  ;;  %v831_v11 = vsub.f32 %v819_v3, %v826_v9 }
 0x648   : > { %v829_v12 = vpop.xlane.xlu0 %828 }
 0x649   : > { %1490 = vpow2.f32 %v833_v10  ;;  %v835_v13 = vmul.f32 1.442695, %v831_v11  ;;  %v832_v14 = vsub.f32 %v820_v63, %v829_v12 }
 0x64b   : > { %1492 = vpow2.f32 %v835_v13  ;;  %v837_v15 = vmul.f32 1.442695, %v832_v14 }
 0x64d   : > { %1494 = vpow2.f32 %v837_v15 }
 0x653   : > { %v1491_v16 = vpop.eup %1490 }
 0x654   : > { %v839_v17 = vsel %vm648_vm3, %v1491_v16, 0.0 }
 0x655   : > { %v1493_v18 = vpop.eup %1492  ;;  %840 = vadd.xlane.f32.xlu0 %v839_v17 }
 0x656   : > { %v842_v21 = vsel %vm648_vm3, %v1493_v18, 0.0 }
 0x657   : > { %v1495_v19 = vpop.eup %1494 }
 0x658   : > { %v845_v20 = vsel %vm655_vm4, %v1495_v19, 0.0 }
 0x659   : > { %846 = vadd.xlane.f32.xlu1 %v845_v20  ;;  %843 = vadd.xlane.f32.xlu0 %v842_v21  ;;  %v1064_v21 = vld [vmem:[%s1851_s9] sm:$0xff] }
 0x66a   : > { %858 = vrot.lane.b32.xlu1 %v1656_v57, %s1527_s18 }
 0x66f   : > { %856 = vrot.lane.b32.xlu0 %v1659_v61, %s1527_s18 }
 0x6e2   : > { %v841_v22 = vpop.xlane.xlu0 %840 }
 0x6e3   : > { %1496 = vrcp.f32 %v841_v22  ;;  %v1065_v22 = vld [vmem:[%s1851_s9 + $0x8] sm:$0xff] }
 0x6e6   : > { %v844_v23 = vpop.xlane.xlu0 %843  ;;  %v847_v24 = vpop.xlane.xlu1 %846 }
 0x6e7   : > { %1498 = vrcp.f32 %v844_v23  ;;  %v1071_v23 = vpack.c.bf16 %v1065_v22, %v1064_v21 }
 0x6e8   : > { %1500 = vrcp.f32 %v847_v24  ;;  %v1066_v24 = vld [vmem:[%s1851_s9 + $0x10] sm:$0xff] }
 0x6e9   : > { %1419 = vmatprep.subr.bf16.mxu0 %v1071_v23 }
 0x6ea   : > { %v857_v25 = vpop.permute.xlu0 %856  ;;  %v859_v26 = vpop.permute.xlu1 %858  ;;  %1420 = vmatpush3.bf16.msra.mxu0 %v1071_v23 }
 0x6eb   : > { %v868_v27 = vand.u32 %v859_v26, %v1682_v35  ;;  %1403 = vmatprep.subr.bf16.mxu1 %v857_v25  ;;  %v934_v35 = vld [vmem:[%s1847_s5 + $0x8] sm:$0xff] }
 0x6ec   : > { %1404 = vmatpush3.bf16.msra.mxu1 %v857_v25  ;;  %v940_v36 = vpack.c.bf16 %v934_v35, %v933_v34  ;;  %v1067_v25 = vld [vmem:[%s1851_s9 + $0x18] sm:$0xff] }
 0x6ed   : > { %1405 = vmatprep.subr.bf16.mxu1 %v868_v27  ;;  %v1497_v28 = vpop.eup %1496  ;;  %v1072_v26 = vpack.c.bf16 %v1067_v25, %v1066_v24 }
 0x6ee   : > { %v851_v57 = vmul.f32 %v1497_v28, %v1491_v16 }
 0x6ef   : > { %1421 = vmatprep.subr.bf16.mxu0 %v1072_v26 }
 0x6f0   : > { %1406 = vmatpush3.bf16.msra.mxu1 %v868_v27  ;;  %1422 = vmatpush3.bf16.msra.mxu0 %v1072_v26 }
 0x6f1   : > { %v1499_v29 = vpop.eup %1498  ;;  %1411 = vmatprep.subr.bf16.mxu1 %v940_v36 }
 0x6f2   : > { %v1501_v30 = vpop.eup %1500  ;;  %v852_v31 = vmul.f32 %v1499_v29, %v1493_v18 }
 0x6f3   : > { %v853_v61 = vmul.f32 %v1501_v30, %v1495_v19 }
 0x6f4   : > { %v854_v32 = vpack.c.bf16 %v852_v31, %v851_v57 }
 0x6f5   : > { %v855_v33 = vpack.c.bf16 %v853_v61, %v853_v61 }
 0x6f6   : > { %1407 = vmatprep.mubr.msk.bf16.mxu1 %vm648_vm3, %v854_v32 }
 0x6f7   : > { %1408 = vmatmul.mubr.msk.bf16.vlgmr.msra.gmra.mrb[0].mxu1 %vm648_vm3, %v855_v33 }
 0x6f8   : > { %1412 = vmatpush3.bf16.msra.mxu1 %v940_v36  ;;  %v1325_v36 = vld [vmem:[%s1849_s7] ss:$0 sm:$0xff] }
 0x6f9   : > { %1413 = vmatprep.subr.bf16.mxu1 %v941_v39 }
 0x6fc   : > { %1414 = vmatpush3.bf16.msra.mxu1 %v941_v39 }
 0x7ca   : > { %v1409_v40 = vpop.f32.mrb[0].mxu1 }
 0x7cb   : > { %v904_v41 = vpop.f32.mrb[1].mxu1 }
 0x7cc   : > { %v1410_v42 = vpop.f32.mrb[2].mxu1 }
 0x7cd   : > { %v907_v43 = vpop.f32.mrb[3].mxu1 }
 0x7ce   : > { %v1467_v44 = vpack.i.bf16 %v907_v43, %v904_v41  ;;  %v1326_v43 = vld [vmem:[%s1850_s8] ss:$0 sm:$0xff] }
 0x7d0   : > { %1468 = vrot.lane.b32.xlu1 %v1467_v44, %s1528_s30 }
 0x7d4   : > { %925 = vrot.lane.b32.xlu1 %v1409_v40, %s1528_s30 }
 0x842   : > { %v1469_v45 = vpop.permute.xlu1 %1468 }
 0x843   : > { %v1471_v46 = vunpack.i.h.bf16 %v1469_v45  ;;  %v1470_v47 = vunpack.i.l.bf16 %v1469_v45 }
 0x845   : > { %v931_v48 = vsel %vm584_vm2, %v1697_v55, %v1471_v46  ;;  %v930_v49 = vsel %vm584_vm2, %v1695_v53, %v1470_v47 }
 0x846   : > { %v938_v50 = vpack.c.bf16 %v931_v48, %v930_v49  ;;  %v926_v51 = vpop.permute.xlu1 %925 }
 0x847   : > { %v932_v54 = vsel %vm584_vm2, %v1693_v52, %v926_v51  ;;  %v1161_v51 = vld [vmem:[%s1853_s11 + $0x8] sm:$0xff] }
 0x848   : > { %v939_v56 = vpack.c.bf16 %v932_v54, %v932_v54  ;;  %1415 = vmatprep.mubr.msk.bf16.mxu1 %vm447_vm0, %v938_v50  ;;  %v1160_v50 = vld [vmem:[%s1853_s11] sm:$0xff] }
 0x849   : > { %v1179_v54 = vpack.c.bf16 %v1161_v51, %v1160_v50  ;;  %v1330_v50 = vld [vmem:[%s1854_s12] ss:$0 sm:$0xff] }
 0x84a   : > { %1416 = vmatmul.mubr.msk.bf16.vlgmr.msra.gmra.mrb[4].mxu1 %vm447_vm0, %v939_v56  ;;  %v1162_v56 = vld [vmem:[%s1853_s11 + $0x10] sm:$0xff] }
 0x84b   : > { %1427 = vmatprep.subr.bf16.mxu1 %v1179_v54 }
 0x84c   : > { %1428 = vmatpush3.bf16.msra.mxu1 %v1179_v54 }
 0x91d   : > { %v1417_v59 = vpop.f32.mrb[4].mxu1 }
 0x91e   : > { %v988_v60 = vpop.f32.mrb[5].mxu1  ;;  %v997_v55 = vadd.f32 %v1417_v59, %v1322_v58 }
 0x91f   : > { %v989_v62 = vadd.f32 %v1322_v58, %v988_v60  ;;  %v1418_v63 = vpop.f32.mrb[6].mxu1  ;;  %v1164_v60 = vld [vmem:[%s1853_s11 + $0x20] sm:$0xff] }
 0x920   : > { %v991_v53 = vpop.f32.mrb[7].mxu1  ;;  %v1737_v52 = vadd.f32 %v997_v55, %v1617_v1  ;;  %v1165_v55 = vld [vmem:[%s1853_s11 + $0x28] sm:$0xff]  ;;  %v1166_v63 = vld [vmem:[%s1853_s11 + $0x30] sm:$0xff] }
 0x921   : > { %v1734_v3 = vadd.f32 %v989_v62, %v1615_v0  ;;  %v992_v4 = vadd.f32 %v1322_v58, %v991_v53  ;;  %v1163_v58 = vld [vmem:[%s1853_s11 + $0x18] sm:$0xff]  ;;  %v1181_v62 = vpack.c.bf16 %v1165_v55, %v1164_v60 }
 0x922   : > { %v1013_v8 = vsel %vm454_vm1, %v1737_v52, 0.0  ;;  %v1180_v59 = vpack.c.bf16 %v1163_v58, %v1162_v56  ;;  %v1167_v53 = vld [vmem:[%s1853_s11 + $0x38] sm:$0xff] }
 0x923   : > { %v1740_v5 = vadd.f32 %v992_v4, %v1619_v2  ;;  %v1007_v6 = vsel %vm447_vm0, %v1734_v3, 0.0  ;;  %v1182_v4 = vpack.c.bf16 %v1167_v53, %v1166_v63 }
 0x924   : > { %1008 = vadd.xlane.f32.xlu0 %v1007_v6  ;;  %1429 = vmatprep.subr.bf16.mxu1 %v1180_v59  ;;  %v1168_v6 = vld [vmem:[%s1853_s11 + $0x40] sm:$0xff] }
 0x925   : > { %v1010_v7 = vsel %vm447_vm0, %v1740_v5, 0.0  ;;  %1430 = vmatpush3.bf16.msra.mxu1 %v1180_v59 }
 0x926   : > { %1011 = vadd.xlane.f32.xlu1 %v1010_v7  ;;  %1431 = vmatprep.subr.bf16.mxu1 %v1181_v62  ;;  %v1169_v7 = vld [vmem:[%s1853_s11 + $0x48] sm:$0xff] }
 0x928   : > { %1014 = vadd.xlane.f32.xlu0 %v1013_v8  ;;  %v1170_v8 = vld [vmem:[%s1853_s11 + $0x50] sm:$0xff] }
 0x929   : > { %1432 = vmatpush3.bf16.msra.mxu1 %v1181_v62 }
 0x92a   : > { %1433 = vmatprep.subr.bf16.mxu1 %v1182_v4 }
 0x92d   : > { %1434 = vmatpush3.bf16.msra.mxu1 %v1182_v4 }
 0x9b1   : > { %v1009_v0 = vpop.xlane.xlu0 %1008 }
 0x9b2   : > { %v1016_v9 = vmul.f32 0.03125, %v1009_v0  ;;  %v1183_v0 = vpack.c.bf16 %v1169_v7, %v1168_v6 }
 0x9b3   : > { %v1012_v10 = vpop.xlane.xlu1 %1011 }
 0x9b4   : > { %v1019_v1 = vsub.f32 %v1734_v3, %v1016_v9  ;;  %v1017_v11 = vmul.f32 0.03125, %v1012_v10  ;;  %v1171_v9 = vld [vmem:[%s1853_s11 + $0x58] sm:$0xff]  ;;  %1435 = vmatprep.subr.bf16.mxu1 %v1183_v0 }
 0x9b5   : > { %v1015_v2 = vpop.xlane.xlu0 %1014  ;;  %v1184_v10 = vpack.c.bf16 %v1171_v9, %v1170_v8  ;;  %1436 = vmatpush3.bf16.msra.mxu1 %v1183_v0 }
 0x9b6   : > { %v1020_v12 = vsub.f32 %v1740_v5, %v1017_v11  ;;  %v1018_v13 = vmul.f32 0.03125, %v1015_v2  ;;  %v1022_v14 = vmul.f32 %v1019_v1, %v1019_v1  ;;  %v1173_v11 = vld [vmem:[%s1853_s11 + $0x68] sm:$0xff] }
 0x9b7   : > { %1437 = vmatprep.subr.bf16.mxu1 %v1184_v10 }
 0x9b8   : > { %v1021_v15 = vsub.f32 %v1737_v52, %v1018_v13  ;;  %v1025_v16 = vsel %vm447_vm0, %v1022_v14, 0.0  ;;  %v1023_v17 = vmul.f32 %v1020_v12, %v1020_v12  ;;  %v1175_v13 = vld [vmem:[%s1853_s11 + $0x78] sm:$0xff] }
 0x9b9   : > { %1026 = vadd.xlane.f32.xlu0 %v1025_v16  ;;  %1438 = vmatpush3.bf16.msra.mxu1 %v1184_v10 }
 0x9ba   : > { %v1024_v18 = vmul.f32 %v1021_v15, %v1021_v15  ;;  %v1028_v19 = vsel %vm447_vm0, %v1023_v17, 0.0 }
 0x9bc   : > { %v1031_v20 = vsel %vm454_vm1, %v1024_v18, 0.0 }
 0x9bd   : > { %1029 = vadd.xlane.f32.xlu0 %v1028_v19  ;;  %1032 = vadd.xlane.f32.xlu1 %v1031_v20 }
 0xa46   : > { %v1027_v27 = vpop.xlane.xlu0 %1026 }
 0xa47   : > { %v1034_v28 = vmul.f32 0.03125, %v1027_v27 }
 0xa49   : > { %v1037_v29 = vadd.f32 1e-06, %v1034_v28 }
 0xa4a   : > { %v1033_v30 = vpop.xlane.xlu1 %1032  ;;  %v1030_v57 = vpop.xlane.xlu0 %1029 }
 0xa4b   : > { %1502 = vrsqrt.f32 %v1037_v29  ;;  %v1036_v31 = vmul.f32 0.03125, %v1033_v30  ;;  %v1035_v61 = vmul.f32 0.03125, %v1030_v57 }
 0xa4d   : > { %v1039_v32 = vadd.f32 1e-06, %v1036_v31  ;;  %v1038_v33 = vadd.f32 1e-06, %v1035_v61 }
 0xa4f   : > { %1504 = vrsqrt.f32 %v1039_v32 }
 0xa50   : > { %1506 = vrsqrt.f32 %v1038_v33 }
 0xa55   : > { %v1503_v34 = vpop.eup %1502 }
 0xa56   : > { %v1043_v35 = vmul.f32 %v1503_v34, %v1019_v1  ;;  %v1172_v1 = vld [vmem:[%s1853_s11 + $0x60] sm:$0xff] }
 0xa57   : > { %v1185_v2 = vpack.c.bf16 %v1173_v11, %v1172_v1 }
 0xa58   : > { %v1052_v41 = vmul.f32 %v1325_v36, %v1043_v35 }
 0xa59   : > { %v1505_v37 = vpop.eup %1504  ;;  %1439 = vmatprep.subr.bf16.mxu1 %v1185_v2 }
 0xa5a   : > { %v1507_v38 = vpop.eup %1506  ;;  %v1045_v39 = vmul.f32 %v1505_v37, %v1021_v15  ;;  %v1061_v46 = vadd.f32 %v1326_v43, %v1052_v41  ;;  %1440 = vmatpush3.bf16.msra.mxu1 %v1185_v2  ;;  %v1327_v15 = vld [vmem:[%s1852_s10] ss:$0 sm:$0xff] }
 0xa5b   : > { %v1044_v40 = vmul.f32 %v1507_v38, %v1020_v12  ;;  %v1174_v12 = vld [vmem:[%s1853_s11 + $0x70] sm:$0xff] }
 0xa5c   : > { %v1054_v42 = vmul.f32 %v1325_v36, %v1045_v39  ;;  %v1186_v14 = vpack.c.bf16 %v1175_v13, %v1174_v12 }
 0xa5d   : > { %v1053_v44 = vmul.f32 %v1325_v36, %v1044_v40 }
 0xa5e   : > { %v1063_v45 = vadd.f32 %v1326_v43, %v1054_v42  ;;  %1441 = vmatprep.subr.bf16.mxu1 %v1186_v14 }
 0xa5f   : > { %v1062_v47 = vadd.f32 %v1326_v43, %v1053_v44  ;;  %1442 = vmatpush3.bf16.msra.mxu1 %v1186_v14 }
 0xa60   : > { %v1070_v48 = vpack.c.bf16 %v1063_v45, %v1063_v45 }
 0xa61   : > { %v1069_v49 = vpack.c.bf16 %v1062_v47, %v1061_v46 }
 0xa63   : > { %1423 = vmatprep.mubr.msk.bf16.mxu0 %vm447_vm0, %v1069_v49 }
 0xa64   : > { %1424 = vmatmul.mubr.msk.bf16.vlgmr.msra.gmra.mrb[16].mxu0 %vm447_vm0, %v1070_v48 }
 0xb37   : > { %v1425_v16 = vpop.f32.mrb[16].mxu0 }
 0xb38   : > { %v1128_v17 = vadd.f32 %v1425_v16, %v1327_v15  ;;  %v1119_v18 = vpop.f32.mrb[17].mxu0 }
 0xb39   : > { %v1120_v19 = vadd.f32 %v1327_v15, %v1119_v18  ;;  %v1426_v20 = vpop.f32.mrb[18].mxu0 }
 0xb3a   : > { %v1135_v21 = vmul.f32 %v1128_v17, %v1128_v17  ;;  %v1122_v22 = vpop.f32.mrb[19].mxu0 }
 0xb3b   : > { %v1133_v23 = vmul.f32 %v1120_v19, %v1120_v19  ;;  %v1123_v24 = vadd.f32 %v1327_v15, %v1122_v22 }
 0xb3c   : > { %v1138_v25 = vmul.f32 %v1135_v21, %v1128_v17 }
 0xb3d   : > { %v1136_v26 = vmul.f32 %v1133_v23, %v1120_v19  ;;  %v1134_v27 = vmul.f32 %v1123_v24, %v1123_v24 }
 0xb3e   : > { %v1141_v28 = vmul.f32 0.044715, %v1138_v25 }
 0xb3f   : > { %v1139_v29 = vmul.f32 0.044715, %v1136_v26  ;;  %v1137_v30 = vmul.f32 %v1134_v27, %v1123_v24 }
 0xb40   : > { %v1144_v57 = vadd.f32 %v1141_v28, %v1128_v17 }
 0xb41   : > { %v1142_v31 = vadd.f32 %v1139_v29, %v1120_v19  ;;  %v1140_v61 = vmul.f32 0.044715, %v1137_v30 }
 0xb42   : > { %v1147_v32 = vmul.f32 0.7978846, %v1144_v57 }
 0xb43   : > { %v1145_v33 = vmul.f32 0.7978846, %v1142_v31  ;;  %v1143_v34 = vadd.f32 %v1140_v61, %v1123_v24 }
 0xb44   : > { %1508 = vtanh.f32 %v1147_v32 }
 0xb45   : > { %1510 = vtanh.f32 %v1145_v33  ;;  %v1146_v35 = vmul.f32 0.7978846, %v1143_v34 }
 0xb47   : > { %1512 = vtanh.f32 %v1146_v35 }
 0xb4e   : > { %v1509_v36 = vpop.eup %1508 }
 0xb4f   : > { %v1511_v37 = vpop.eup %1510  ;;  %v1153_v38 = vadd.f32 1.0, %v1509_v36 }
 0xb50   : > { %v1151_v39 = vadd.f32 1.0, %v1511_v37 }
 0xb51   : > { %v1513_v40 = vpop.eup %1512  ;;  %v1156_v41 = vmul.f32 0.5, %v1153_v38 }
 0xb52   : > { %v1152_v42 = vadd.f32 1.0, %v1513_v40  ;;  %v1154_v43 = vmul.f32 0.5, %v1151_v39 }
 0xb53   : > { %v1159_v45 = vmul.f32 %v1156_v41, %v1128_v17 }
 0xb54   : > { %v1155_v44 = vmul.f32 0.5, %v1152_v42  ;;  %v1157_v46 = vmul.f32 %v1154_v43, %v1120_v19 }
 0xb55   : > { %v1178_v49 = vpack.c.bf16 %v1159_v45, %v1159_v45 }
 0xb56   : > { %v1158_v47 = vmul.f32 %v1155_v44, %v1123_v24 }
 0xb58   : > { %v1177_v48 = vpack.c.bf16 %v1158_v47, %v1157_v46 }
 0xb5a   : > { %1443 = vmatprep.mubr.bf16.mxu1 %v1177_v48 }
 0xb5b   : > { %1444 = vmatmul.mubr.bf16.vlgmr.msra.gmra.mrb[8].mxu1 %v1178_v49 }
 0xc2e   : > { %v1445_v51 = vpop.f32.mrb[8].mxu1 }
 0xc2f   : > { %v1236_v54 = vadd.f32 %v1445_v51, %v1330_v50  ;;  %v1227_v56 = vpop.f32.mrb[9].mxu1 }
 0xc30   : > { %v1228_v58 = vadd.f32 %v1330_v50, %v1227_v56  ;;  %v1446_v59 = vpop.f32.mrb[10].mxu1 }
 0xc31   : > { %v1243_v60 = vadd.f32 %v1236_v54, %v1737_v52  ;;  %v1230_v55 = vpop.f32.mrb[11].mxu1 }
 0xc32   : > { %v1241_v62 = vadd.f32 %v1228_v58, %v1734_v3  ;;  %v1231_v63 = vadd.f32 %v1330_v50, %v1230_v55 }
 0xc33   : > { %1246 = vst.msk [vmem:[%s440_s24 + $0x10] sm:$0x1] %vm454_vm1, %v1243_v60 }
 0xc34   : > { %1244 = vst.msk [vmem:[%s440_s24] sm:$0xff] %vm447_vm0, %v1241_v62  ;;  %v1242_v53 = vadd.f32 %v1231_v63, %v1740_v5 }
 0xc36   : > { %1245 = vst.msk [vmem:[%s440_s24 + $0x8] sm:$0xff] %vm447_vm0, %v1242_v53 }
 0xc37 PF: > { %s23_s25 = sadd.s32 1, %s1520_s25  }
 0xc38   : > { %p20_p4 = scmp.ge.s32.totalorder %s23_s25, 4  }
 0xc3a   :  { %22 = sbr.rel (!%p20_p4) target bundleno = 1 (0x1), region = 102 }

// kernel: fashion_sap_forward.19
= control target key start
LH: loop header
LB: loop body
LE: loop exit
PB: predicated region body
PF: predicated region fallthrough
CT: control target
= control target key end

     0   :  { %v248_v3 = vmov 0.0   ;;  %vm249_vm0 = vmmov 0   ;;  %s344_s0 = inlined_call_operand.vmem [shape: f32[2,32], index: 0, kind: input, shape index: {}]   ;;  %s345_s1 = inlined_call_operand.vmem [shape: f32[32,32], index: 1, kind: input, shape index: {}]   ;;  %s346_s2 = inlined_call_operand.vmem [shape: f32[1,32], index: 2, kind: input, shape index: {}]   ;;  %s347_s3 = inlined_call_operand.vmem [shape: f32[1,32], index: 3, kind: input, shape index: {}]   ;;  %s348_s4 = inlined_call_operand.vmem [shape: f32[1,32], index: 4, kind: input, shape index: {}]   ;;  %s349_s5 = inlined_call_operand.vmem [shape: f32[32,5], index: 5, kind: input, shape index: {}]   ;;  %s350_s6 = inlined_call_operand.vmem [shape: f32[1,5], index: 6, kind: input, shape index: {}]   ;;  %s351_s7 = inlined_call_operand.hbm [shape: f32[2,5], index: 7, kind: output, shape index: {}]  }
   0x1   :  { %v29_v0 = vld [vmem:[%s345_s1] sm:$0xff]  ;;  %v30_v1 = vld [vmem:[%s345_s1 + $0x8] sm:$0xff]  ;;  %v31_v2 = vld [vmem:[%s345_s1 + $0x10] sm:$0xff]  ;;  %203 = vmatprep.subr.bf16.mxu0 %v248_v3  ;;  %207 = vmatprep.mubr.msk.bf16.mxu0 %vm249_vm0, %v248_v3 }
   0x2   :  { %v35_v4 = vpack.c.bf16 %v30_v1, %v29_v0  ;;  %v32_v5 = vld [vmem:[%s345_s1 + $0x18] sm:$0xff]  ;;  %211 = vmatprep.subr.bf16.mxu1 %v248_v3  ;;  %215 = vmatprep.mubr.msk.bf16.mxu1 %vm249_vm0, %v248_v3 }
   0x3   :  { %12 = vsyncpa [#allocation3], 0  ;;  %v36_v6 = vpack.c.bf16 %v32_v5, %v31_v2  ;;  %v28_v7 = vld [vmem:[%s344_s0] sm:$0x3]  ;;  %vm43_vm1 = vcmask 261120   ;;  %vm89_vm2 = vcmask 254976  }
   0x4   :  { %204 = vmatpush3.bf16.msra.mxu0 %v35_v4  ;;  %v34_v8 = vpack.c.bf16 %v28_v7, %v28_v7  ;;  %v191_v9 = vld [vmem:[%s346_s2] ss:$0 sm:$0xff]  ;;  %v119_v22 = vld [vmem:[%s349_s5 + $0x8] sm:$0xff]  ;;  %v120_v24 = vld [vmem:[%s349_s5 + $0x10] sm:$0xff]  ;;  %s250_s23 = smov [#allocation2]   ;;  %vm175_vm3 = vcmask 33792  }
   0x5   :  { %205 = vmatprep.subr.bf16.mxu0 %v248_v3  ;;  %v118_v21 = vld [vmem:[%s349_s5] sm:$0xff]  ;;  %v121_v25 = vld [vmem:[%s349_s5 + $0x18] sm:$0xff]  ;;  %s183_s24 = sshll.u32 %s250_s23, 4  ;;  %s184_s24 = int_to_ptr.vmem [resolvable:$true] %s183_s24 }
   0x6   :  { %v124_v23 = vpack.c.bf16 %v119_v22, %v118_v21  ;;  %v125_v26 = vpack.c.bf16 %v121_v25, %v120_v24  ;;  %v193_v31 = vld [vmem:[%s347_s3] ss:$0 sm:$0xff]  ;;  %s224_s3 = scalar_lea.vmem %s184_s24, 32  ;;  %p229_p1 = scmp.lt.s32.totalorder %s184_s24, %s184_s24 }
   0x7   :  { %v194_v33 = vld [vmem:[%s348_s4] ss:$0 sm:$0xff]  ;;  %p225_p0 = scmp.ne.s32.totalorder %s184_s24, %s224_s3  ;;  %p230_p2 = scmp.lt.s32.totalorder %s224_s3, %s224_s3 }
   0x8   :  { %206 = vmatpush3.bf16.msra.mxu0 %v36_v6  ;;  %212 = vmatpush3.bf16.msra.mxu1 %v124_v23  ;;  %v195_v37 = vld [vmem:[%s350_s6] ss:$0 sm:$0xff] }
   0x9   :  { %213 = vmatprep.subr.bf16.mxu1 %v248_v3  ;;  %p231_p3 = por %p230_p2, %p229_p1 }
   0xb   :  { %208 = vmatmul.mubr.msk.bf16.vlgmr.msra.gmra.mrb[0].mxu0 %vm43_vm1, %v34_v8  ;;  %p232_p4 = pnand %p231_p3, %p225_p0 }
   0xc   :  { %214 = vmatpush3.bf16.msra.mxu1 %v125_v26 }
  0xde   :  { %v81_v10 = vpop.f32.mrb[0].mxu0 }
  0xdf   :  { %v82_v11 = vadd.f32 %v191_v9, %v81_v10  ;;  %v209_v12 = vpop.f32.mrb[1].mxu0 }
  0xe0   :  { %v84_v13 = vpop.f32.mrb[2].mxu0 }
  0xe1   :  { %v210_v14 = vpop.f32.mrb[3].mxu0  ;;  %v90_v15 = vsel %vm89_vm2, %v82_v11, 0.0 }
  0xe2   :  { %91 = vadd.xlane.f32.xlu0 %v90_v15 }
 0x16f   :  { %v92_v16 = vpop.xlane.xlu0 %91 }
 0x170   :  { %v94_v17 = vmul.f32 0.03125, %v92_v16 }
 0x172   :  { %v95_v18 = vsub.f32 %v82_v11, %v94_v17 }
 0x174   :  { %v96_v19 = vmul.f32 %v95_v18, %v95_v18 }
 0x176   :  { %v97_v20 = vsel %vm89_vm2, %v96_v19, 0.0 }
 0x177   :  { %98 = vadd.xlane.f32.xlu0 %v97_v20 }
 0x204   :  { %v99_v27 = vpop.xlane.xlu0 %98 }
 0x205   :  { %v100_v28 = vmul.f32 0.03125, %v99_v27 }
 0x207   :  { %v101_v29 = vadd.f32 1e-12, %v100_v28 }
 0x209   :  { %222 = vrsqrt.f32 %v101_v29 }
 0x213   :  { %v223_v30 = vpop.eup %222 }
 0x214   :  { %v103_v32 = vmul.f32 %v223_v30, %v95_v18 }
 0x216   :  { %v110_v34 = vmul.f32 %v193_v31, %v103_v32 }
 0x218   :  { %v117_v35 = vadd.f32 %v194_v33, %v110_v34 }
 0x21a   :  { %v123_v36 = vpack.c.bf16 %v117_v35, %v117_v35 }
 0x21c   :  { %216 = vmatmul.mubr.msk.bf16.vlgmr.msra.gmra.mrb[0].mxu1 %vm43_vm1, %v123_v36 }
 0x2ef   :  { %v169_v38 = vpop.f32.mrb[0].mxu1 }
 0x2f0   :  { %v170_v39 = vadd.f32 %v195_v37, %v169_v38  ;;  %v217_v40 = vpop.f32.mrb[1].mxu1 }
 0x2f1   :  { %v172_v41 = vpop.f32.mrb[2].mxu1 }
 0x2f2   :  { %v218_v42 = vpop.f32.mrb[3].mxu1  ;;  %176 = vst.msk [vmem:[#allocation2] sm:$0x3] %vm175_vm3, %v170_v39 }
 0x2f3   :  { %235 = shalt.err (!%p232_p4)
}
 0x2f4   :  { %s236_s6 = scalar_lea.hbm %s351_s7, 32 }
 0x2f5   :  { %p237_p5 = scmp.ne.s32.totalorder %s351_s7, %s236_s6  ;;  %p240_p6 = scmp.lt.u32.totalorder %s236_s6, %s351_s7 }
 0x2f7   :  { %p242_p7 = pnand %p240_p6, %p237_p5 }
 0x2f9   :  { %245 = shalt.err (!%p242_p7)
}
 0x2fa   :  { %186 = dma.vmem_to_hbm [thread:$0]  %s184_s24, 32, %s351_s7, [#allocation3]  }
 0x2fb   :  { %246 = dma.done.wait [#allocation3], 32  }
 0x2fc   :  { %247 = vsyncadd [#allocation3], 4294967264 }
 0x2fd   :  { %190 = vsyncpa [#allocation3], 1 }

// kernel: fashion_sap_forward.17
= control target key start
LH: loop header
LB: loop body
LE: loop exit
PB: predicated region body
PF: predicated region fallthrough
CT: control target
= control target key end

     0   :  { %s2549_s0 = inlined_call_operand.vmem [shape: f32[2,8,32], index: 0, kind: input, shape index: {}]   ;;  %s2550_s1 = inlined_call_operand.vmem [shape: f32[2,17,32], index: 1, kind: input, shape index: {}]   ;;  %s2551_s2 = inlined_call_operand.vmem [shape: f32[2,1,8], index: 2, kind: input, shape index: {}]   ;;  %s2552_s3 = inlined_call_operand.vmem [shape: f32[32,96], index: 3, kind: input, shape index: {}]   ;;  %s2553_s4 = inlined_call_operand.vmem [shape: f32[1,96], index: 4, kind: input, shape index: {}]   ;;  %s2554_s5 = inlined_call_operand.vmem [shape: f32[32,32], index: 5, kind: input, shape index: {}]   ;;  %s2555_s6 = inlined_call_operand.vmem [shape: f32[1,32], index: 6, kind: input, shape index: {}]   ;;  %s2556_s7 = inlined_call_operand.vmem [shape: f32[1,32], index: 7, kind: input, shape index: {}]   ;;  %s2557_s8 = inlined_call_operand.vmem [shape: f32[1,32], index: 8, kind: input, shape index: {}]   ;;  %s2558_s9 = inlined_call_operand.vmem [shape: f32[32,32], index: 9, kind: input, shape index: {}]   ;;  %s2559_s10 = inlined_call_operand.vmem [shape: f32[1,32], index: 10, kind: input, shape index: {}]   ;;  %s2560_s11 = inlined_call_operand.vmem [shape: f32[32,64], index: 11, kind: input, shape index: {}]   ;;  %s2561_s12 = inlined_call_operand.vmem [shape: f32[1,64], index: 12, kind: input, shape index: {}]   ;;  %s2562_s13 = inlined_call_operand.vmem [shape: f32[32,32], index: 13, kind: input, shape index: {}]   ;;  %s2563_s14 = inlined_call_operand.vmem [shape: f32[1,32], index: 14, kind: input, shape index: {}]   ;;  %s2564_s15 = inlined_call_operand.vmem [shape: f32[1,32], index: 15, kind: input, shape index: {}]   ;;  %s2565_s16 = inlined_call_operand.vmem [shape: f32[1,32], index: 16, kind: input, shape index: {}]   ;;  %s2566_s17 = inlined_call_operand.vmem [shape: f32[32,128], index: 17, kind: input, shape index: {}]   ;;  %s2567_s18 = inlined_call_operand.vmem [shape: f32[1,128], index: 18, kind: input, shape index: {}]   ;;  %s2568_s19 = inlined_call_operand.vmem [shape: f32[128,32], index: 19, kind: input, shape index: {}]   ;;  %s2569_s20 = inlined_call_operand.vmem [shape: f32[1,32], index: 20, kind: input, shape index: {}]   ;;  %s2570_s21 = inlined_call_operand.vmem [shape: f32[1,32], index: 21, kind: input, shape index: {}]   ;;  %s2571_s22 = inlined_call_operand.vmem [shape: f32[1,32], index: 22, kind: input, shape index: {}]   ;;  %s2572_s23 = inlined_call_operand.vmem [shape: f32[2,8,32], index: 23, kind: output, shape index: {}]  }
   0x1   :  { %2584 = sst [smem:[#allocation2_spill]] %s2549_s0 }
   0x2   :  { %2585 = sst [smem:[#allocation3_spill]] %s2550_s1 }
   0x3   :  { %2586 = sst [smem:[#allocation4_spill]] %s2551_s2 }
   0x4   :  { %2587 = sst [smem:[#allocation5_spill]] %s2552_s3 }
   0x5   :  { %2588 = sst [smem:[#allocation6_spill]] %s2553_s4  ;;  %s2223_s4 = smov 0  }
   0x6   :  { %2589 = sst [smem:[#allocation7_spill]] %s2554_s5 }
   0x7   :  { %2590 = sst [smem:[#allocation8_spill]] %s2555_s6 }
   0x8   :  { %2591 = sst [smem:[#allocation9_spill]] %s2556_s7 }
   0x9 LB: > { %s1833_s30 = sadd.s32 4294967295, %s2092_s4   ;;  %p1837_p0 = scmp.ge.s32.totalorder %s2092_s4, 1  ;;  %s2092_s4 = sphi %s2223_s4, %s33_s4  }
   0xa   : > { %p654_p1 = scmp.lt.s32.totalorder %s2092_s4, 3 }
   0xc   : > { %p655_p2 = pnand %p1837_p0, %p654_p1 }
   0xd   : > { %s2592_s5 = sld [smem:[#allocation5_spill]] (!%p655_p2)  ;;  %p724_p3 = scmp.lt.s32.totalorder (!%p655_p2), %s1833_s30, 1  ;;  %v2094_v3 = vmov (!%p655_p2), 0.0   ;;  %vm2095_vm0 = vmmov (!%p655_p2), 0   ;;  %vm760_vm1 = vcmask (!%p655_p2), 261120   ;;  %vm808_vm2 = vcmask (!%p655_p2), 130048  }
   0xe   : > { %658 = sbr.rel (%p655_p2) target bundleno = 4695 (0x1257), region = 112  ;;  %1920 = vmatprep.subr.bf16.mxu0 (!%p655_p2), %v2094_v3  ;;  %1924 = vmatprep.mubr.msk.bf16.mxu0 (!%p655_p2), %vm2095_vm0, %v2094_v3  ;;  %s2593_s0 = sld [smem:[#allocation2_spill]] (!%p655_p2)  ;;  %vm863_vm3 = vcmask (!%p655_p2), 64512   ;;  %vm881_vm4 = vcmask (!%p655_p2), 1043456   ;;  %vm1309_vm5 = vcmask (!%p655_p2), 138240   ;;  %vm1332_vm6 = vcmask (!%p655_p2), 1040384  }
   0xf   : > { %1928 = vmatprep.subr.bf16.mxu1 (!%p655_p2), %v2094_v3  ;;  %1930 = vmatprep.mubr.msk.bf16.mxu1 (!%p655_p2), %vm2095_vm0, %v2094_v3  ;;  %s2594_s26 = sld [smem:[#allocation6_spill]] (!%p655_p2)  ;;  %s2579_s2 = smov (!%p655_p2), 112  }
  0x10   : > { %s2581_s6 = smov (!%p655_p2), 96   ;;  %s2577_s27 = smov (!%p655_p2), 80  }
  0x11   : > { %s2595_s3 = sld [smem:[#allocation4_spill]] (!%p655_p2)  ;;  %s2100_s25 = smov (!%p655_p2), 48  }
  0x12   : > { %s2596_s7 = sld [smem:[#allocation7_spill]] (!%p655_p2)  ;;  %s2576_s1 = smov (!%p655_p2), 16  }
  0x13   : > { %v746_v0 = vld [vmem:[%s2592_s5] sm:$0xff] (!%p655_p2)  ;;  %v747_v1 = vld [vmem:[%s2592_s5 + $0x8] sm:$0xff] (!%p655_p2)  ;;  %v748_v2 = vld [vmem:[%s2592_s5 + $0x10] sm:$0xff] (!%p655_p2)  ;;  %s2597_s29 = sld [smem:[#allocation8_spill]] (!%p655_p2) }
  0x14   : > { %v752_v4 = vpack.c.bf16 (!%p655_p2), %v747_v1, %v746_v0  ;;  %v749_v5 = vld [vmem:[%s2592_s5 + $0x18] sm:$0xff] (!%p655_p2)  ;;  %s2598_s5 = sld [smem:[#allocation3_spill]] (!%p655_p2) }
  0x15   : > { %s2606_s30 = smov (!%p724_p3, %s1833_s30), 1  ;;  %v753_v6 = vpack.c.bf16 %v749_v5, %v748_v2  ;;  %v1841_v9 = vld [vmem:[%s2594_s26] ss:$0 sm:$0xff] }
  0x16   : > { %1921 = vmatpush3.bf16.msra.mxu0 %v752_v4  ;;  %s2575_s28 = sshll.u32 %s2606_s30, 3 }
  0x17   : > { %1922 = vmatprep.subr.bf16.mxu0 %v2094_v3  ;;  %s727_s24 = scalar_lea.vmem %s2593_s0, %s2575_s28  ;;  %s735_s0 = scalar_lea.vmem %s2595_s3, %s2606_s30 }
  0x18   : > { %v2258_v7 = vld [vmem:[%s727_s24] sm:$0xff]  ;;  %s2099_s24 = smov 64   ;;  %v1043_v59 = vld [vmem:[%s2596_s7 + $0x8] sm:$0xff]  ;;  %v1044_v61 = vld [vmem:[%s2596_s7 + $0x10] sm:$0xff] }
  0x19   : > { %v751_v8 = vpack.c.bf16 %v2258_v7, %v2258_v7  ;;  %v1844_v22 = vld [vmem:[%s735_s0] ss:$0 sm:$0xff]  ;;  %v1045_v62 = vld [vmem:[%s2596_s7 + $0x18] sm:$0xff] }
  0x1a   : > { %1923 = vmatpush3.bf16.msra.mxu0 %v753_v6  ;;  %v1042_v58 = vld [vmem:[%s2596_s7] sm:$0xff]  ;;  %v1049_v63 = vpack.c.bf16 %v1045_v62, %v1044_v61 }
  0x1b   : > { %1934 = vmatprep.subr.bf16.mxu0 %v2094_v3  ;;  %v1048_v60 = vpack.c.bf16 %v1043_v59, %v1042_v58 }
  0x1d   : > { %1925 = vmatmul.mubr.msk.bf16.vlgmr.msra.gmra.mrb[0].mxu0 %vm760_vm1, %v751_v8 }
  0x1e   : > { %1936 = vmatprep.mubr.msk.bf16.mxu0 %vm2095_vm0, %v2094_v3 }
  0xf0   : > { %v798_v10 = vpop.f32.mrb[0].mxu0 }
  0xf1   : > { %v799_v11 = vadd.f32 %v1841_v9, %v798_v10  ;;  %v1926_v12 = vpop.f32.mrb[1].mxu0 }
  0xf2   : > { %v801_v13 = vpop.f32.mrb[2].mxu0 }
  0xf3   : > { %v804_v14 = vpack.c.bf16 %v799_v11, %v799_v11  ;;  %v1927_v15 = vpop.f32.mrb[3].mxu0  ;;  %v1848_v13 = vld [vmem:[%s2597_s29] ss:$0 sm:$0xff]  ;;  %s2044_s29 = smul.u32 24, %s2606_s30 }
  0xf5   : > { %925 = vrot.lane.b32.xlu1 %v804_v14, %s2579_s2  ;;  %806 = vrot.lane.b32.xlu0 %v804_v14, %s2581_s6  ;;  %s732_s3 = scalar_lea.vmem %s2598_s5, %s2044_s29  ;;  %s2599_s29 = smov 96  }
  0xf6   : > { %s2601_s6 = sld [smem:[#allocation9_spill]] }
  0xf9   : > { %927 = vrot.lane.b32.xlu0 %v804_v14, %s2577_s27 }
  0xfc   : > { %v1850_v58 = vld [vmem:[%s2601_s6] ss:$0 sm:$0xff] }
 0x167   : > { %v807_v16 = vpop.permute.xlu0 %806  ;;  %v926_v20 = vpop.permute.xlu1 %925 }
 0x168   : > { %v813_v17 = vsel %vm808_vm2, %v807_v16, 0 }
 0x169   : > { %1929 = vmatpush3.bf16.xpose.msra.mxu1 %v813_v17 }
 0x16a   : > { %1940 = vmatprep.subr.bf16.mxu1 %v2094_v3 }
 0x16b   : > { %v928_v18 = vpop.permute.xlu0 %927 }
 0x16c   : > { %v933_v19 = vsel %vm808_vm2, %v928_v18, 0 }
 0x170   : > { %1931 = vmatmul.mubr.msk.bf16.vlgmr.msra.gmra.mrb[0].mxu1 %vm808_vm2, %v804_v14 }
 0x171   : > { %1941 = vmatpush3.bf16.xpose.msra.mxu1 %v933_v19  ;;  %1942 = vmatprep.mubr.msk.bf16.mxu1 %vm2095_vm0, %v2094_v3 }
 0x172   : > { %1952 = vmatprep.subr.bf16.mxu1 %v2094_v3 }
 0x178   : > { %1943 = vmatmul.mubr.msk.bf16.vlgmr.msra.gmra.mrb[4].mxu1 %vm808_vm2, %v926_v20 }
 0x179   : > { %1956 = vmatprep.mubr.msk.bf16.mxu1 %vm2095_vm0, %v2094_v3  ;;  %1953 = vmatpush3.bf16.msra.mxu1 %v1048_v60  ;;  %v1851_v60 = vld [vmem:[%s2557_s8] ss:$0 sm:$0xff] }
 0x17a   : > { %1954 = vmatprep.subr.bf16.mxu1 %v2094_v3 }
 0x17d   : > { %1955 = vmatpush3.bf16.msra.mxu1 %v1049_v63 }
 0x243   : > { %v849_v21 = vpop.f32.mrb[0].mxu1 }
 0x244   : > { %v855_v23 = vmul.f32 0.25, %v849_v21  ;;  %v1932_v24 = vpop.f32.mrb[1].mxu1  ;;  %v1187_v21 = vld [vmem:[%s2560_s11] sm:$0xff] }
 0x245   : > { %v852_v25 = vpop.f32.mrb[2].mxu1 }
 0x246   : > { %v1933_v26 = vpop.f32.mrb[3].mxu1  ;;  %v862_v27 = vadd.f32 %v1844_v22, %v855_v23  ;;  %v1189_v23 = vld [vmem:[%s2560_s11 + $0x10] sm:$0xff] }
 0x247   : > { %v742_v26 = vld [vmem:[%s732_s3] sm:$0xff] }
 0x248   : > { %v864_v28 = vsel %vm863_vm3, %v862_v27, -inf }
 0x249   : > { %865 = vmax.xlane.f32.xlu1 %v864_v28 }
 0x24b   : > { %v969_v29 = vpop.f32.mrb[4].mxu1 }
 0x24c   : > { %v975_v30 = vmul.f32 0.25, %v969_v29  ;;  %v1944_v31 = vpop.f32.mrb[5].mxu1  ;;  %v744_v29 = vld [vmem:[%s732_s3 + $0x10] sm:$0x1] }
 0x24d   : > { %v972_v32 = vpop.f32.mrb[6].mxu1 }
 0x24e   : > { %v1945_v33 = vpop.f32.mrb[7].mxu1  ;;  %v976_v34 = vadd.f32 %v1844_v22, %v975_v30  ;;  %v1188_v22 = vld [vmem:[%s2560_s11 + $0x8] sm:$0xff]  ;;  %v1193_v30 = vpack.c.bf16 %v744_v29, %v744_v29 }
 0x24f   : > { %v1194_v24 = vpack.c.bf16 %v1188_v22, %v1187_v21  ;;  %v2102_v22 = vmov 0  }
 0x250   : > { %v977_v35 = vsel %vm863_vm3, %v976_v34, -inf }
 0x251   : > { %978 = vmax.xlane.f32.xlu0 %v977_v35  ;;  %1968 = vmatprep.subr.bf16.mxu1 %v1194_v24 }
 0x2d6   : > { %v866_v36 = vpop.xlane.xlu1 %865 }
 0x2d7   : > { %v867_v37 = vsub.f32 %v862_v27, %v866_v36  ;;  %v743_v27 = vld [vmem:[%s732_s3 + $0x8] sm:$0xff]  ;;  %v1130_v36 = vld [vmem:[%s2558_s9] sm:$0xff]  ;;  %s2600_s3 = smov 112  }
 0x2d8   : > { %v1192_v28 = vpack.c.bf16 %v743_v27, %v742_v26 }
 0x2d9   : > { %v868_v38 = vmul.f32 1.442695, %v867_v37  ;;  %v1131_v37 = vld [vmem:[%s2558_s9 + $0x8] sm:$0xff] }
 0x2db   : > { %2062 = vpow2.f32 %v868_v38  ;;  %v1136_v38 = vpack.c.bf16 %v1131_v37, %v1130_v36 }
 0x2de   : > { %v979_v39 = vpop.xlane.xlu0 %978 }
 0x2df   : > { %v980_v40 = vsub.f32 %v976_v34, %v979_v39  ;;  %v1132_v39 = vld [vmem:[%s2558_s9 + $0x10] sm:$0xff] }
 0x2e1   : > { %v981_v41 = vmul.f32 1.442695, %v980_v40  ;;  %v1133_v40 = vld [vmem:[%s2558_s9 + $0x18] sm:$0xff] }
 0x2e3   : > { %2064 = vpow2.f32 %v981_v41  ;;  %v1137_v41 = vpack.c.bf16 %v1133_v40, %v1132_v39 }
 0x2e5   : > { %v2063_v42 = vpop.eup %2062 }
 0x2e6   : > { %v870_v43 = vsel %vm863_vm3, %v2063_v42, 0.0 }
 0x2e7   : > { %871 = vadd.xlane.f32.xlu0 %v870_v43 }
 0x2ed   : > { %v2065_v44 = vpop.eup %2064 }
 0x2ee   : > { %v983_v45 = vsel %vm863_vm3, %v2065_v44, 0.0 }
 0x2ef   : > { %984 = vadd.xlane.f32.xlu1 %v983_v45 }
 0x2fd   : > { %876 = vrot.lane.b32.xlu0 %v804_v14, %s2099_s24 }
 0x300   : > { %989 = vrot.lane.b32.xlu1 %v804_v14, %s2100_s25  ;;  %s2602_s25 = smov 80  }
 0x374   : > { %v872_v46 = vpop.xlane.xlu0 %871 }
 0x375   : > { %2066 = vrcp.f32 %v872_v46 }
 0x378   : > { %v877_v47 = vpop.permute.xlu0 %876 }
 0x379   : > { %v883_v48 = vsel %vm881_vm4, %v877_v47, 0 }
 0x37a   : > { %1935 = vmatpush3.bf16.msra.mxu0 %v883_v48 }
 0x37b   : > { %1946 = vmatprep.subr.bf16.mxu0 %v2094_v3 }
 0x37c   : > { %v985_v49 = vpop.xlane.xlu1 %984 }
 0x37d   : > { %2068 = vrcp.f32 %v985_v49 }
 0x37f   : > { %v2067_v50 = vpop.eup %2066 }
 0x380   : > { %v874_v51 = vmul.f32 %v2067_v50, %v2063_v42  ;;  %v990_v52 = vpop.permute.xlu1 %989  ;;  %v1854_v42 = vld [vmem:[%s2561_s12] ss:$0 sm:$0xff] }
 0x381   : > { %v995_v54 = vsel %vm881_vm4, %v990_v52, 0 }
 0x382   : > { %v875_v53 = vpack.c.bf16 %v874_v51, %v874_v51 }
 0x384   : > { %1937 = vmatmul.mubr.msk.bf16.vlgmr.msra.gmra.mrb[4].mxu0 %vm863_vm3, %v875_v53 }
 0x385   : > { %1947 = vmatpush3.bf16.msra.mxu0 %v995_v54  ;;  %1948 = vmatprep.mubr.msk.bf16.mxu0 %vm2095_vm0, %v2094_v3 }
 0x386   : > { %1960 = vmatprep.subr.bf16.mxu0 %v2094_v3 }
 0x387   : > { %v2069_v55 = vpop.eup %2068 }
 0x388   : > { %v987_v56 = vmul.f32 %v2069_v55, %v2065_v44 }
 0x38a   : > { %v988_v57 = vpack.c.bf16 %v987_v56, %v987_v56 }
 0x38c   : > { %1949 = vmatmul.mubr.msk.bf16.vlgmr.msra.gmra.mrb[8].mxu0 %vm863_vm3, %v988_v57 }
 0x38d   : > { %1964 = vmatprep.mubr.msk.bf16.mxu0 %vm2095_vm0, %v2094_v3  ;;  %1961 = vmatpush3.bf16.msra.mxu0 %v1136_v38 }
 0x38e   : > { %1962 = vmatprep.subr.bf16.mxu0 %v2094_v3 }
 0x391   : > { %1963 = vmatpush3.bf16.msra.mxu0 %v1137_v41 }
 0x392   : > { %2000 = vmatprep.subr.bf16.mxu0 %v2094_v3 }
 0x457   : > { %v919_v0 = vpop.f32.mrb[4].mxu0 }
 0x458   : > { %v1938_v1 = vpop.f32.mrb[5].mxu0 }
 0x459   : > { %v922_v2 = vpop.f32.mrb[6].mxu0 }
 0x45a   : > { %v1939_v4 = vpop.f32.mrb[7].mxu0 }
 0x45f   : > { %v1031_v5 = vpop.f32.mrb[8].mxu0 }
 0x460   : > { %1038 = vrot.lane.b32.xlu1 %v1031_v5, %s2576_s1  ;;  %v1950_v6 = vpop.f32.mrb[9].mxu0  ;;  %s2603_s1 = smov 16  }
 0x461   : > { %v1034_v8 = vpop.f32.mrb[10].mxu0 }
 0x462   : > { %v1951_v9 = vpop.f32.mrb[11].mxu0 }
 0x4d2   : > { %v1039_v10 = vpop.permute.xlu1 %1038 }
 0x4d3   : > { %v1041_v11 = vsel %vm808_vm2, %v919_v0, %v1039_v10  ;;  %v1852_v0 = vld [vmem:[%s2559_s10] ss:$0 sm:$0xff] }
 0x4d4   : > { %v1047_v12 = vpack.c.bf16 %v1041_v11, %v1041_v11 }
 0x4d6   : > { %1957 = vmatmul.mubr.msk.bf16.vlgmr.msra.gmra.mrb[8].mxu1 %vm760_vm1, %v1047_v12 }
 0x4d7   : > { %1969 = vmatpush3.bf16.msra.mxu1 %v1194_v24  ;;  %1972 = vmatprep.mubr.msk.bf16.mxu1 %vm760_vm1, %v1192_v28 }
 0x5a9   : > { %v1093_v14 = vpop.f32.mrb[8].mxu1 }
 0x5aa   : > { %v1094_v15 = vadd.f32 %v1848_v13, %v1093_v14  ;;  %v1958_v16 = vpop.f32.mrb[9].mxu1 }
 0x5ab   : > { %v1096_v17 = vpop.f32.mrb[10].mxu1 }
 0x5ac   : > { %v1959_v18 = vpop.f32.mrb[11].mxu1  ;;  %v1099_v19 = vadd.f32 %v1094_v15, %v2258_v7  ;;  %v1190_v7 = vld [vmem:[%s2560_s11 + $0x18] sm:$0xff] }
 0x5ad   : > { %v1195_v25 = vpack.c.bf16 %v1190_v7, %v1189_v23  ;;  %v1334_v23 = vsel %vm1332_vm6, 65535, %v2102_v22 }
 0x5ae   : > { %v1102_v20 = vsel %vm760_vm1, %v1099_v19, 0.0 }
 0x5af   : > { %1103 = vadd.xlane.f32.xlu0 %v1102_v20  ;;  %1970 = vmatprep.subr.bf16.mxu1 %v1195_v25 }
 0x5b0   : > { %1971 = vmatpush3.bf16.msra.mxu1 %v1195_v25 }
 0x5b1   : > { %1976 = vmatprep.subr.bf16.mxu1 %v2094_v3 }
 0x5b3   : > { %1973 = vmatmul.mubr.msk.bf16.vlgmr.msra.gmra.mrb[12].mxu1 %vm760_vm1, %v1193_v30 }
 0x5b4   : > { %1980 = vmatprep.mubr.msk.bf16.mxu1 %vm2095_vm0, %v2094_v3 }
 0x63c   : > { %v1104_v31 = vpop.xlane.xlu0 %1103 }
 0x63d   : > { %v1106_v32 = vmul.f32 0.03125, %v1104_v31 }
 0x63f   : > { %v1107_v33 = vsub.f32 %v1099_v19, %v1106_v32 }
 0x641   : > { %v1108_v34 = vmul.f32 %v1107_v33, %v1107_v33 }
 0x643   : > { %v1109_v35 = vsel %vm760_vm1, %v1108_v34, 0.0 }
 0x644   : > { %1110 = vadd.xlane.f32.xlu1 %v1109_v35 }
 0x686   : > { %v1974_v43 = vpop.f32.mrb[12].mxu1 }
 0x687   : > { %v1242_v44 = vpop.f32.mrb[13].mxu1  ;;  %v1251_v49 = vadd.f32 %v1974_v43, %v1854_v42 }
 0x688   : > { %v1243_v45 = vadd.f32 %v1854_v42, %v1242_v44  ;;  %v1975_v46 = vpop.f32.mrb[14].mxu1 }
 0x689   : > { %v1245_v47 = vpop.f32.mrb[15].mxu1  ;;  %v2364_v52 = vpack.c.bf16 %v1251_v49, %v1251_v49 }
 0x68a   : > { %v1246_v48 = vadd.f32 %v1854_v42, %v1245_v47 }
 0x68b   : > { %v1266_v53 = vsel %vm808_vm2, %v2364_v52, 0 }
 0x68c   : > { %v2358_v50 = vpack.c.bf16 %v1246_v48, %v1243_v45 }
 0x68e   : > { %1324 = vrot.lane.b32.xlu1 %v2358_v50, %s2599_s29  ;;  %v1263_v51 = vsel %vm808_vm2, %v2358_v50, 0 }
 0x68f   : > { %1977 = vmatpush3.bf16.xpose.msra.mxu1 %v1263_v51 }
 0x690   : > { %1978 = vmatprep.subr.bf16.mxu1 %v2094_v3 }
 0x692   : > { %1381 = vrot.lane.b32.xlu1 %v2358_v50, %s2600_s3 }
 0x696   : > { %1383 = vrot.lane.b32.xlu1 %v2364_v52, %s2600_s3 }
 0x697   : > { %1979 = vmatpush3.bf16.xpose.msra.mxu1 %v1266_v53 }
 0x698   : > { %1984 = vmatprep.subr.bf16.mxu1 %v2094_v3 }
 0x6d1   : > { %v1111_v54 = vpop.xlane.xlu1 %1110 }
 0x6d2   : > { %v1112_v55 = vmul.f32 0.03125, %v1111_v54 }
 0x6d4   : > { %v1113_v56 = vadd.f32 1e-12, %v1112_v55 }
 0x6d6   : > { %2070 = vrsqrt.f32 %v1113_v56  ;;  %v1504_v56 = vld [vmem:[%s2562_s13 + $0x8] sm:$0xff] }
 0x6e0   : > { %v2071_v57 = vpop.eup %2070 }
 0x6e1   : > { %v1115_v59 = vmul.f32 %v2071_v57, %v1107_v33 }
 0x6e3   : > { %v1122_v61 = vmul.f32 %v1850_v58, %v1115_v59  ;;  %v1505_v58 = vld [vmem:[%s2562_s13 + $0x10] sm:$0xff]  ;;  %v1506_v59 = vld [vmem:[%s2562_s13 + $0x18] sm:$0xff] }
 0x6e5   : > { %v2380_v62 = vadd.f32 %v1851_v60, %v1122_v61  ;;  %v1510_v60 = vpack.c.bf16 %v1506_v59, %v1505_v58  ;;  %v1865_v58 = vld [vmem:[%s2567_s18] ss:$0 sm:$0xff] }
 0x6e7   : > { %v1135_v63 = vpack.c.bf16 %v2380_v62, %v2380_v62 }
 0x6e9   : > { %1965 = vmatmul.mubr.msk.bf16.vlgmr.msra.gmra.mrb[12].mxu0 %vm760_vm1, %v1135_v63 }
 0x6ea   : > { %2004 = vmatprep.mubr.msk.bf16.mxu0 %vm2095_vm0, %v2094_v3 }
 0x700   : > { %v1325_v9 = vpop.permute.xlu1 %1324 }
 0x704   : > { %v1382_v28 = vpop.permute.xlu1 %1381 }
 0x705   : > { %v1389_v29 = vsel %vm808_vm2, %v1382_v28, 0  ;;  %v1863_v28 = vld [vmem:[%s2564_s15] ss:$0 sm:$0xff] }
 0x708   : > { %v1384_v30 = vpop.permute.xlu1 %1383 }
 0x709   : > { %v1392_v31 = vsel %vm808_vm2, %v1384_v30, 0  ;;  %v1864_v30 = vld [vmem:[%s2565_s16] ss:$0 sm:$0xff] }
 0x7bc   : > { %v1181_v1 = vpop.f32.mrb[12].mxu0 }
 0x7bd   : > { %v1182_v2 = vadd.f32 %v1852_v0, %v1181_v1  ;;  %v1966_v4 = vpop.f32.mrb[13].mxu0 }
 0x7be   : > { %v1184_v5 = vpop.f32.mrb[14].mxu0 }
 0x7bf   : > { %v1256_v6 = vpack.c.bf16 %v1182_v2, %v1182_v2  ;;  %v1967_v8 = vpop.f32.mrb[15].mxu0 }
 0x7c1   : > { %1981 = vmatmul.mubr.msk.bf16.vlgmr.msra.gmra.mrb[16].mxu1 %vm808_vm2, %v1256_v6 }
 0x7c2   : > { %1985 = vmatpush3.bf16.msra.mxu1 %v1325_v9  ;;  %1988 = vmatprep.mubr.msk.bf16.mxu1 %vm2095_vm0, %v2094_v3 }
 0x7c3   : > { %1986 = vmatprep.subr.bf16.mxu1 %v2094_v3 }
 0x894   : > { %v1302_v10 = vpop.f32.mrb[16].mxu1 }
 0x895   : > { %v1308_v11 = vmul.f32 0.25, %v1302_v10  ;;  %v1982_v12 = vpop.f32.mrb[17].mxu1 }
 0x896   : > { %v1305_v13 = vpop.f32.mrb[18].mxu1 }
 0x897   : > { %v1983_v14 = vpop.f32.mrb[19].mxu1  ;;  %v1310_v15 = vsel %vm1309_vm5, %v1308_v11, -inf }
 0x898   : > { %1311 = vmax.xlane.f32.xlu0 %v1310_v15 }
 0x925   : > { %v1312_v16 = vpop.xlane.xlu0 %1311 }
 0x926   : > { %v1313_v17 = vsub.f32 %v1308_v11, %v1312_v16 }
 0x928   : > { %v1314_v18 = vmul.f32 1.442695, %v1313_v17 }
 0x92a   : > { %2072 = vpow2.f32 %v1314_v18 }
 0x934   : > { %v2073_v19 = vpop.eup %2072 }
 0x935   : > { %v1316_v20 = vsel %vm1309_vm5, %v2073_v19, 0.0 }
 0x936   : > { %1317 = vadd.xlane.f32.xlu0 %v1316_v20  ;;  %v1590_v20 = vld [vmem:[%s2566_s17] sm:$0xff] }
 0x94c   : > { %1326 = vrot.lane.b32.xlu0 %v2364_v52, %s2599_s29 }
 0x950   : > { %1379 = vrot.lane.b32.xlu0 %v1256_v6, %s2600_s3  ;;  %v1861_v6 = vld [vmem:[%s2563_s14] ss:$0 sm:$0xff]  ;;  %s2604_s3 = sshll.u32 %s2606_s30, 3 }
 0x951   : > { %s739_s6 = scalar_lea.vmem %s2572_s23, %s2604_s3 }
 0x9c3   : > { %v1318_v21 = vpop.xlane.xlu0 %1317 }
 0x9c4   : > { %2074 = vrcp.f32 %v1318_v21  ;;  %v1591_v21 = vld [vmem:[%s2566_s17 + $0x8] sm:$0xff] }
 0x9c5   : > { %v1596_v22 = vpack.c.bf16 %v1591_v21, %v1590_v20 }
 0x9c7   : > { %v1327_v24 = vpop.permute.xlu0 %1326 }
 0x9c8   : > { %v1336_v7 = vand.u32 %v1334_v23, %v1327_v24 }
 0x9ca   : > { %1987 = vmatpush3.bf16.msra.mxu1 %v1336_v7 }
 0x9cb   : > { %1992 = vmatprep.subr.bf16.mxu1 %v2094_v3  ;;  %v1380_v32 = vpop.permute.xlu0 %1379 }
 0x9ce   : > { %v2075_v25 = vpop.eup %2074 }
 0x9cf   : > { %v1320_v26 = vmul.f32 %v2075_v25, %v2073_v19 }
 0x9d1   : > { %v1321_v27 = vpack.c.bf16 %v1320_v26, %v1320_v26 }
 0x9d3   : > { %1989 = vmatmul.mubr.msk.bf16.vlgmr.msra.gmra.mrb[20].mxu1 %vm1309_vm5, %v1321_v27 }
 0x9d4   : > { %1993 = vmatpush3.bf16.xpose.msra.mxu1 %v1389_v29  ;;  %1996 = vmatprep.mubr.msk.bf16.mxu1 %vm2095_vm0, %v2094_v3 }
 0x9d5   : > { %1994 = vmatprep.subr.bf16.mxu1 %v2094_v3 }
 0x9dc   : > { %1995 = vmatpush3.bf16.xpose.msra.mxu1 %v1392_v31 }
 0x9dd   : > { %2016 = vmatprep.subr.bf16.mxu1 %v2094_v3 }
 0x9e3   : > { %1997 = vmatmul.mubr.msk.bf16.vlgmr.msra.gmra.mrb[24].mxu1 %vm808_vm2, %v1380_v32 }
 0x9e4   : > { %2020 = vmatprep.mubr.msk.bf16.mxu1 %vm2095_vm0, %v2094_v3  ;;  %2017 = vmatpush3.bf16.msra.mxu1 %v1596_v22 }
 0x9e5   : > { %2018 = vmatprep.subr.bf16.mxu1 %v2094_v3 }
 0xaa6   : > { %v1372_v33 = vpop.f32.mrb[20].mxu1 }
 0xaa7   : > { %v1990_v34 = vpop.f32.mrb[21].mxu1 }
 0xaa8   : > { %v1375_v35 = vpop.f32.mrb[22].mxu1  ;;  %v1656_v34 = vld [vmem:[%s2568_s19] sm:$0xff] }
 0xaa9   : > { %v1991_v36 = vpop.f32.mrb[23].mxu1  ;;  %v1657_v35 = vld [vmem:[%s2568_s19 + $0x8] sm:$0xff] }
 0xaaa   : > { %v1674_v36 = vpack.c.bf16 %v1657_v35, %v1656_v34 }
 0xab6   : > { %v1428_v37 = vpop.f32.mrb[24].mxu1 }
 0xab7   : > { %v1434_v38 = vmul.f32 0.25, %v1428_v37  ;;  %v1998_v39 = vpop.f32.mrb[25].mxu1  ;;  %v1658_v37 = vld [vmem:[%s2568_s19 + $0x10] sm:$0xff] }
 0xab8   : > { %v1431_v40 = vpop.f32.mrb[26].mxu1 }
 0xab9   : > { %v1999_v41 = vpop.f32.mrb[27].mxu1  ;;  %v1435_v42 = vsel %vm1309_vm5, %v1434_v38, -inf  ;;  %v1660_v40 = vld [vmem:[%s2568_s19 + $0x20] sm:$0xff] }
 0xaba   : > { %1436 = vmax.xlane.f32.xlu1 %v1435_v42  ;;  %v1661_v41 = vld [vmem:[%s2568_s19 + $0x28] sm:$0xff] }
 0xabb   : > { %v1676_v42 = vpack.c.bf16 %v1661_v41, %v1660_v40 }
 0xacb   : > { %1449 = vrot.lane.b32.xlu1 %v2364_v52, %s2602_s25 }
 0xb47   : > { %v1437_v43 = vpop.xlane.xlu1 %1436 }
 0xb48   : > { %v1438_v44 = vsub.f32 %v1434_v38, %v1437_v43  ;;  %v1659_v38 = vld [vmem:[%s2568_s19 + $0x18] sm:$0xff]  ;;  %v1662_v43 = vld [vmem:[%s2568_s19 + $0x30] sm:$0xff] }
 0xb49   : > { %v1675_v39 = vpack.c.bf16 %v1659_v38, %v1658_v37 }
 0xb4a   : > { %v1439_v45 = vmul.f32 1.442695, %v1438_v44  ;;  %v1663_v44 = vld [vmem:[%s2568_s19 + $0x38] sm:$0xff] }
 0xb4b   : > { %v1450_v49 = vpop.permute.xlu1 %1449 }
 0xb4c   : > { %2076 = vpow2.f32 %v1439_v45  ;;  %v1456_v53 = vand.u32 %v1450_v49, %v1334_v23  ;;  %v1593_v23 = vld [vmem:[%s2566_s17 + $0x18] sm:$0xff]  ;;  %v1677_v45 = vpack.c.bf16 %v1663_v44, %v1662_v43  ;;  %v1666_v49 = vld [vmem:[%s2568_s19 + $0x50] sm:$0xff] }
 0xb56   : > { %v2077_v46 = vpop.eup %2076 }
 0xb57   : > { %v1441_v47 = vsel %vm1309_vm5, %v2077_v46, 0.0 }
 0xb58   : > { %1442 = vadd.xlane.f32.xlu0 %v1441_v47  ;;  %v1665_v47 = vld [vmem:[%s2568_s19 + $0x48] sm:$0xff] }
 0xb6e   : > { %1447 = vrot.lane.b32.xlu0 %v2358_v50, %s2602_s25  ;;  %v1503_v50 = vld [vmem:[%s2562_s13] sm:$0xff] }
 0xb6f   : > { %v1509_v57 = vpack.c.bf16 %v1504_v56, %v1503_v50  ;;  %v1670_v50 = vld [vmem:[%s2568_s19 + $0x70] sm:$0xff]  ;;  %v1671_v56 = vld [vmem:[%s2568_s19 + $0x78] sm:$0xff] }
 0xbe5   : > { %v1443_v48 = vpop.xlane.xlu0 %1442 }
 0xbe6   : > { %2078 = vrcp.f32 %v1443_v48 }
 0xbe9   : > { %v1448_v51 = vpop.permute.xlu0 %1447 }
 0xbea   : > { %2001 = vmatpush3.bf16.msra.mxu0 %v1448_v51  ;;  %v1667_v51 = vld [vmem:[%s2568_s19 + $0x58] sm:$0xff] }
 0xbeb   : > { %2002 = vmatprep.subr.bf16.mxu0 %v2094_v3 }
 0xbee   : > { %2003 = vmatpush3.bf16.msra.mxu0 %v1456_v53  ;;  %v1679_v53 = vpack.c.bf16 %v1667_v51, %v1666_v49 }
 0xbef   : > { %2008 = vmatprep.subr.bf16.mxu0 %v2094_v3 }
 0xbf0   : > { %v2079_v52 = vpop.eup %2078 }
 0xbf1   : > { %v1445_v54 = vmul.f32 %v2079_v52, %v2077_v46  ;;  %v1664_v46 = vld [vmem:[%s2568_s19 + $0x40] sm:$0xff] }
 0xbf2   : > { %v1678_v48 = vpack.c.bf16 %v1665_v47, %v1664_v46  ;;  %v1668_v52 = vld [vmem:[%s2568_s19 + $0x60] sm:$0xff] }
 0xbf3   : > { %v1446_v55 = vpack.c.bf16 %v1445_v54, %v1445_v54  ;;  %v1669_v54 = vld [vmem:[%s2568_s19 + $0x68] sm:$0xff] }
 0xbf5   : > { %2005 = vmatmul.mubr.msk.bf16.vlgmr.msra.gmra.mrb[16].mxu0 %vm1309_vm5, %v1446_v55  ;;  %v1680_v55 = vpack.c.bf16 %v1669_v54, %v1668_v52 }
 0xbf6   : > { %2012 = vmatprep.mubr.msk.bf16.mxu0 %vm2095_vm0, %v2094_v3  ;;  %2009 = vmatpush3.bf16.msra.mxu0 %v1509_v57  ;;  %v1681_v57 = vpack.c.bf16 %v1671_v56, %v1670_v50 }
 0xbf7   : > { %2010 = vmatprep.subr.bf16.mxu0 %v2094_v3 }
 0xbfa   : > { %2011 = vmatpush3.bf16.msra.mxu0 %v1510_v60 }
 0xbfb   : > { %2024 = vmatprep.subr.bf16.mxu0 %v2094_v3 }
 0xcc8   : > { %v1492_v61 = vpop.f32.mrb[16].mxu0 }
 0xcc9   : > { %1499 = vrot.lane.b32.xlu1 %v1492_v61, %s2603_s1  ;;  %v2006_v63 = vpop.f32.mrb[17].mxu0 }
 0xcca   : > { %v1495_v0 = vpop.f32.mrb[18].mxu0 }
 0xccb   : > { %v2007_v1 = vpop.f32.mrb[19].mxu0 }
 0xd3b   : > { %v1500_v2 = vpop.permute.xlu1 %1499 }
 0xd3c   : > { %v1502_v4 = vsel %vm808_vm2, %v1372_v33, %v1500_v2 }
 0xd3d   : > { %v1508_v5 = vpack.c.bf16 %v1502_v4, %v1502_v4 }
 0xd3f   : > { %2013 = vmatmul.mubr.msk.bf16.vlgmr.msra.gmra.mrb[20].mxu0 %vm760_vm1, %v1508_v5 }
 0xd40   : > { %2040 = vmatprep.mubr.msk.bf16.mxu0 %vm2095_vm0, %v2094_v3  ;;  %2025 = vmatpush3.bf16.msra.mxu0 %v1674_v36 }
 0xd41   : > { %2026 = vmatprep.subr.bf16.mxu0 %v2094_v3 }
 0xd44   : > { %2027 = vmatpush3.bf16.msra.mxu0 %v1675_v39 }
 0xd45   : > { %2028 = vmatprep.subr.bf16.mxu0 %v2094_v3 }
 0xd48   : > { %2029 = vmatpush3.bf16.msra.mxu0 %v1676_v42 }
 0xd49   : > { %2030 = vmatprep.subr.bf16.mxu0 %v2094_v3 }
 0xd4c   : > { %2031 = vmatpush3.bf16.msra.mxu0 %v1677_v45 }
 0xd4d   : > { %2032 = vmatprep.subr.bf16.mxu0 %v2094_v3 }
 0xd50   : > { %2033 = vmatpush3.bf16.msra.mxu0 %v1678_v48 }
 0xd51   : > { %2034 = vmatprep.subr.bf16.mxu0 %v2094_v3 }
 0xd54   : > { %2035 = vmatpush3.bf16.msra.mxu0 %v1679_v53 }
 0xd55   : > { %2036 = vmatprep.subr.bf16.mxu0 %v2094_v3 }
 0xd58   : > { %2037 = vmatpush3.bf16.msra.mxu0 %v1680_v55 }
 0xd59   : > { %2038 = vmatprep.subr.bf16.mxu0 %v2094_v3 }
 0xd5c   : > { %2039 = vmatpush3.bf16.msra.mxu0 %v1681_v57 }
 0xe12   : > { %v1554_v8 = vpop.f32.mrb[20].mxu0 }
 0xe13   : > { %v1555_v9 = vadd.f32 %v1861_v6, %v1554_v8  ;;  %v2014_v10 = vpop.f32.mrb[21].mxu0 }
 0xe14   : > { %v1557_v11 = vpop.f32.mrb[22].mxu0 }
 0xe15   : > { %v2015_v12 = vpop.f32.mrb[23].mxu0  ;;  %v1560_v13 = vadd.f32 %v1555_v9, %v2380_v62  ;;  %v1592_v62 = vld [vmem:[%s2566_s17 + $0x10] sm:$0xff] }
 0xe16   : > { %v1597_v24 = vpack.c.bf16 %v1593_v23, %v1592_v62  ;;  %v1867_v12 = vld [vmem:[%s2569_s20] ss:$0 sm:$0xff] }
 0xe17   : > { %v1563_v14 = vsel %vm760_vm1, %v1560_v13, 0.0 }
 0xe18   : > { %1564 = vadd.xlane.f32.xlu0 %v1563_v14  ;;  %2019 = vmatpush3.bf16.msra.mxu1 %v1597_v24 }
 0xea5   : > { %v1565_v15 = vpop.xlane.xlu0 %1564 }
 0xea6   : > { %v1566_v16 = vmul.f32 0.03125, %v1565_v15 }
 0xea8   : > { %v1567_v17 = vsub.f32 %v1560_v13, %v1566_v16 }
 0xeaa   : > { %v1568_v18 = vmul.f32 %v1567_v17, %v1567_v17 }
 0xeac   : > { %v1569_v19 = vsel %vm760_vm1, %v1568_v18, 0.0 }
 0xead   : > { %1570 = vadd.xlane.f32.xlu1 %v1569_v19 }
 0xf3a   : > { %v1571_v7 = vpop.xlane.xlu1 %1570 }
 0xf3b   : > { %v1572_v25 = vmul.f32 0.03125, %v1571_v7 }
 0xf3d   : > { %v1573_v26 = vadd.f32 1e-12, %v1572_v25 }
 0xf3f   : > { %2080 = vrsqrt.f32 %v1573_v26 }
 0xf49   : > { %v2081_v27 = vpop.eup %2080 }
 0xf4a   : > { %v1575_v29 = vmul.f32 %v2081_v27, %v1567_v17  ;;  %v1868_v27 = vld [vmem:[%s2570_s21] ss:$0 sm:$0xff] }
 0xf4c   : > { %v1582_v31 = vmul.f32 %v1863_v28, %v1575_v29  ;;  %v1869_v29 = vld [vmem:[%s2571_s22] ss:$0 sm:$0xff] }
 0xf4e   : > { %v2465_v32 = vadd.f32 %v1864_v30, %v1582_v31 }
 0xf50   : > { %v1595_v33 = vpack.c.bf16 %v2465_v32, %v2465_v32 }
 0xf52   : > { %2021 = vmatmul.mubr.msk.bf16.vlgmr.msra.gmra.mrb[28].mxu1 %vm760_vm1, %v1595_v33 }
0x1025   : > { %v1641_v59 = vpop.f32.mrb[28].mxu1 }
0x1026   : > { %v1642_v60 = vadd.f32 %v1865_v58, %v1641_v59  ;;  %v2022_v61 = vpop.f32.mrb[29].mxu1 }
0x1027   : > { %v1644_v63 = vpop.f32.mrb[30].mxu1 }
0x1028   : > { %v1647_v0 = vmul.f32 %v1642_v60, %v1642_v60  ;;  %v2023_v1 = vpop.f32.mrb[31].mxu1 }
0x102a   : > { %v1648_v2 = vmul.f32 %v1647_v0, %v1642_v60 }
0x102c   : > { %v1649_v4 = vmul.f32 0.044715, %v1648_v2 }
0x102e   : > { %v1650_v5 = vadd.f32 %v1649_v4, %v1642_v60 }
0x1030   : > { %v1651_v6 = vmul.f32 0.7978846, %v1650_v5 }
0x1032   : > { %2082 = vtanh.f32 %v1651_v6 }
0x103c   : > { %v2083_v8 = vpop.eup %2082 }
0x103d   : > { %v1653_v9 = vadd.f32 1.0, %v2083_v8 }
0x103f   : > { %v1654_v10 = vmul.f32 0.5, %v1653_v9 }
0x1041   : > { %v1655_v3 = vmul.f32 %v1654_v10, %v1642_v60 }
0x1043   : > { %v1673_v11 = vpack.c.bf16 %v1655_v3, %v1655_v3 }
0x1045   : > { %2041 = vmatmul.mubr.bf16.vlgmr.msra.gmra.mrb[24].mxu0 %v1673_v11 }
0x1118   : > { %v1722_v13 = vpop.f32.mrb[24].mxu0 }
0x1119   : > { %v1723_v14 = vadd.f32 %v1867_v12, %v1722_v13  ;;  %v2042_v15 = vpop.f32.mrb[25].mxu0 }
0x111a   : > { %v1725_v16 = vpop.f32.mrb[26].mxu0 }
0x111b   : > { %v2043_v17 = vpop.f32.mrb[27].mxu0  ;;  %v1728_v18 = vadd.f32 %v1723_v14, %v2465_v32 }
0x111d   : > { %v1731_v19 = vsel %vm760_vm1, %v1728_v18, 0.0 }
0x111e   : > { %1732 = vadd.xlane.f32.xlu0 %v1731_v19 }
0x11ab   : > { %v1733_v20 = vpop.xlane.xlu0 %1732 }
0x11ac   : > { %v1734_v21 = vmul.f32 0.03125, %v1733_v20 }
0x11ae   : > { %v1735_v22 = vsub.f32 %v1728_v18, %v1734_v21 }
0x11b0   : > { %v1736_v62 = vmul.f32 %v1735_v22, %v1735_v22 }
0x11b2   : > { %v1737_v23 = vsel %vm760_vm1, %v1736_v62, 0.0 }
0x11b3   : > { %1738 = vadd.xlane.f32.xlu0 %v1737_v23 }
0x1240   : > { %v1739_v24 = vpop.xlane.xlu0 %1738 }
0x1241   : > { %v1740_v7 = vmul.f32 0.03125, %v1739_v24 }
0x1243   : > { %v1741_v25 = vadd.f32 1e-12, %v1740_v7 }
0x1245   : > { %2084 = vrsqrt.f32 %v1741_v25 }
0x124f   : > { %v2085_v26 = vpop.eup %2084 }
0x1250   : > { %v1743_v28 = vmul.f32 %v2085_v26, %v1735_v22 }
0x1252   : > { %v1750_v30 = vmul.f32 %v1868_v27, %v1743_v28 }
0x1254   : > { %v1757_v31 = vadd.f32 %v1869_v29, %v1750_v30 }
0x1256   : > { %1758 = vst.msk [vmem:[%s739_s6] sm:$0xff] %vm760_vm1, %v1757_v31 }
0x1257 PF: > { %s33_s4 = sadd.s32 1, %s2092_s4  }
0x1258   : > { %p30_p4 = scmp.ge.s32.totalorder %s33_s4, 4  }
0x125a   :  { %32 = sbr.rel (!%p30_p4) target bundleno = 9 (0x9), region = 148 }

</bundles_post_ra>
